<compile_context>
chip_gen: v6e
topology: v6e:2x2x1
jax: 0.10.0
libtpu: 0.0.40
codegen_flags: <defaults>
</compile_context>

<pallas_src>
import jax
import jax.numpy as jnp
from jax.experimental import pallas as pl
from jax.experimental.pallas import tpu as pltpu

EPS = 1e-5


def _fused_kernel(xa_ref, xb_ref, w_ref, gamma_ref, beta_ref, o_ref):
    k = pl.program_id(0)
    nk = pl.num_programs(0)

    # add + relu on this Cin chunk (VPU), then the 1x1-conv chunk on the MXU:
    # (Cout, TK) @ (TK, P) -> (Cout, P), accumulated in the resident f32 output.
    x = jnp.maximum(xa_ref[...] + xb_ref[...], 0.0)
    partial = jnp.dot(w_ref[...].astype(x.dtype), x,
                      preferred_element_type=jnp.float32)

    @pl.when(k == 0)
    def _init():
        o_ref[...] = partial

    @pl.when(k > 0)
    def _accum():
        o_ref[...] += partial

    @pl.when(k == nk - 1)
    def _bn_epilogue():
        y = o_ref[...]                                    # (Cout, P) f32
        n = y.shape[-1]                                   # logical P (=196)
        s1 = jnp.sum(y, axis=-1, keepdims=True)           # one-pass stats
        s2 = jnp.sum(y * y, axis=-1, keepdims=True)
        mean = s1 / n
        var = s2 / n - mean * mean                        # biased variance
        inv = jax.lax.rsqrt(var + EPS)
        o_ref[...] = ((y - mean) * inv * gamma_ref[...] + beta_ref[...]).astype(o_ref.dtype)


def fused_add_relu_conv1x1_bn(x128, x120, conv_w, gamma, beta, *,
                              tk=512, param_dtype=jnp.float32):
    """x128, x120: (1, Cin, H, W) f32.  conv_w: (Cout, Cin, 1, 1).  gamma/beta: (Cout,)."""
    N, Cin, H, W = x128.shape
    Cout = conv_w.shape[0]
    assert N == 1, "NCHW->(Cin,P) reshape without transpose requires N == 1"
    P = H * W

    # NCHW (N==1) flattens to (Cin, P) with pure reshapes -- no transposes.
    xa = x128.reshape(Cin, P)
    xb = x120.reshape(Cin, P)
    w = conv_w.reshape(Cout, Cin).astype(param_dtype)   # no weight transpose either
    g = gamma.reshape(Cout, 1).astype(jnp.float32)
    b = beta.reshape(Cout, 1).astype(jnp.float32)

    tk = min(tk, Cin)
    assert Cin % tk == 0
    grid = (Cin // tk,)                                  # single Cout tile; Cin reduction only

    bytes_accessed = (xa.size * xa.dtype.itemsize
                      + xb.size * xb.dtype.itemsize
                      + w.size * w.dtype.itemsize
                      + Cout * P * 4)
    cost = pl.CostEstimate(
        flops=2 * Cout * Cin * P + 2 * Cin * P,          # matmul + add/relu
        transcendentals=Cout,                            # rsqrt per channel
        bytes_accessed=bytes_accessed,
    )

    out_flat = pl.pallas_call(
        _fused_kernel,
        out_shape=jax.ShapeDtypeStruct((Cout, P), jnp.float32),
        grid_spec=pltpu.PrefetchScalarGridSpec(
            num_scalar_prefetch=0,
            grid=grid,
            in_specs=[
                pl.BlockSpec((tk, P), lambda k: (k, 0)),       # xa chunk
                pl.BlockSpec((tk, P), lambda k: (k, 0)),       # xb chunk
                pl.BlockSpec((Cout, tk), lambda k: (0, k)),    # weight tile
                pl.BlockSpec((Cout, 1), lambda k: (0, 0)),     # gamma
                pl.BlockSpec((Cout, 1), lambda k: (0, 0)),     # beta
            ],
            # Same block index for every k -> output resident in VMEM across the
            # whole reduction; it doubles as the accumulator.
            out_specs=pl.BlockSpec((Cout, P), lambda k: (0, 0)),
        ),
        compiler_params=pltpu.CompilerParams(
            dimension_semantics=("arbitrary",)),
        cost_estimate=cost,
    )(xa, xb, w, g, b)

    # (Cout, P) is already NCHW order for N == 1 -- plain reshape, no transpose.
    return out_flat.reshape(N, Cout, H, W)


def _reference(x128, x120, conv_w, gamma, beta):
    """Pure-JAX reference mirroring the PyTorch forward (training-mode BN)."""
    x = jnp.maximum(x128 + x120, 0.0)
    N, Cin, H, W = x.shape
    Cout = conv_w.shape[0]
    xf = x.reshape(Cin, H * W)
    y = conv_w.reshape(Cout, Cin) @ xf                              # (Cout, P)
    mean = jnp.mean(y, axis=1, keepdims=True)
    var = jnp.mean(jnp.square(y - mean), axis=1, keepdims=True)     # biased
    out = (y - mean) * jax.lax.rsqrt(var + EPS) * gamma[:, None] + beta[:, None]
    return out.reshape(N, Cout, H, W)


if __name__ == "__main__":
    key = jax.random.PRNGKey(0)
    k1, k2, k3, k4, k5 = jax.random.split(key, 5)

    N, Cin, H, W, Cout = 1, 1024, 14, 14, 256

    x128 = jax.random.normal(k1, (N, Cin, H, W), dtype=jnp.float32)
    x120 = jax.random.normal(k2, (N, Cin, H, W), dtype=jnp.float32)
    # Deterministic synthetic parameters (not a checkpoint load).
    conv_w = jax.random.normal(k3, (Cout, Cin, 1, 1), dtype=jnp.float32) * 0.02
    gamma = 1.0 + 0.1 * jax.random.normal(k4, (Cout,), dtype=jnp.float32)
    beta = 0.1 * jax.random.normal(k5, (Cout,), dtype=jnp.float32)

    out = fused_add_relu_conv1x1_bn(x128, x120, conv_w, gamma, beta)
    out = jax.block_until_ready(out)

    ref = _reference(x128, x120, conv_w, gamma, beta)
    assert out.shape == (N, Cout, H, W)
    assert jnp.allclose(out, ref, atol=1e-3, rtol=1e-3)

    print("KERNEL_OK")
</pallas_src>

<mosaic_0001>
module attributes {stable_mosaic.version = 11 : i64} {
  func.func @_fused_kernel(%arg0: i32, %arg1: memref<512x196xf32, #tpu.memory_space<vmem>>, %arg2: memref<512x196xf32, #tpu.memory_space<vmem>>, %arg3: memref<256x512xf32, #tpu.memory_space<vmem>>, %arg4: memref<256x1xf32, #tpu.memory_space<vmem>>, %arg5: memref<256x1xf32, #tpu.memory_space<vmem>>, %arg6: memref<256x196xf32, #tpu.memory_space<vmem>>) attributes {dimension_semantics = [#tpu.dimension_semantics<arbitrary>], iteration_bounds = array<i64: 2>, scalar_prefetch = 0 : i64, scratch_operands = 0 : i64, tpu.core_type = #tpu.core_type<tc>, window_params = [{transform_indices = @transform_0, window_bounds = array<i64: 512, 196>}, {transform_indices = @transform_1, window_bounds = array<i64: 512, 196>}, {transform_indices = @transform_2, window_bounds = array<i64: 256, 512>}, {pipeline_mode = #tpu.pipeline_mode<synchronous>, transform_indices = @transform_3, window_bounds = array<i64: 256, 1>}, {pipeline_mode = #tpu.pipeline_mode<synchronous>, transform_indices = @transform_4, window_bounds = array<i64: 256, 1>}, {pipeline_mode = #tpu.pipeline_mode<synchronous>, transform_indices = @transform_5, window_bounds = array<i64: 256, 196>}]} {
    %c0 = arith.constant 0 : index
    %c0_0 = arith.constant 0 : index
    %0 = vector.load %arg1[%c0, %c0_0] : memref<512x196xf32, #tpu.memory_space<vmem>>, vector<512x196xf32>
    %c0_1 = arith.constant 0 : index
    %c0_2 = arith.constant 0 : index
    %1 = vector.load %arg2[%c0_1, %c0_2] : memref<512x196xf32, #tpu.memory_space<vmem>>, vector<512x196xf32>
    %2 = arith.addf %0, %1 : vector<512x196xf32>
    %cst = arith.constant 0.000000e+00 : f32
    %3 = vector.broadcast %cst : f32 to vector<512x196xf32>
    %4 = arith.maximumf %2, %3 : vector<512x196xf32>
    %c0_3 = arith.constant 0 : index
    %c0_4 = arith.constant 0 : index
    %5 = vector.load %arg3[%c0_3, %c0_4] : memref<256x512xf32, #tpu.memory_space<vmem>>, vector<256x512xf32>
    %cst_5 = arith.constant dense<0.000000e+00> : vector<256x196xf32>
    %6 = tpu.matmul %5, %4, %cst_5 {dimension_numbers = #tpu.dot_dimension_numbers<[1], [0], [0], [1], [0, 0, 1, 1], [], []>} : vector<256x512xf32>, vector<512x196xf32>, vector<256x196xf32> -> vector<256x196xf32>
    %c0_i32 = arith.constant 0 : i32
    %7 = arith.cmpi eq, %arg0, %c0_i32 : i32
    %8 = arith.extui %7 : i1 to i32
    %c0_i32_6 = arith.constant 0 : i32
    %9 = arith.cmpi ne, %8, %c0_i32_6 : i32
    scf.if %9 {
      %c0_10 = arith.constant 0 : index
      %c0_11 = arith.constant 0 : index
      %16 = vector.load %arg6[%c0_10, %c0_11] : memref<256x196xf32, #tpu.memory_space<vmem>>, vector<256x196xf32>
      tpu.vector_store %arg6[%c0_10, %c0_11], %6 {strides = array<i32>} : memref<256x196xf32, #tpu.memory_space<vmem>>, vector<256x196xf32>,
    } else {
    }
    %c0_i32_7 = arith.constant 0 : i32
    %10 = arith.cmpi sgt, %arg0, %c0_i32_7 : i32
    %11 = arith.extui %10 : i1 to i32
    %c0_i32_8 = arith.constant 0 : i32
    %12 = arith.cmpi ne, %11, %c0_i32_8 : i32
    scf.if %12 {
      %c0_10 = arith.constant 0 : index
      %c0_11 = arith.constant 0 : index
      %16 = vector.load %arg6[%c0_10, %c0_11] : memref<256x196xf32, #tpu.memory_space<vmem>>, vector<256x196xf32>
      %17 = arith.addf %16, %6 : vector<256x196xf32>
      %c0_12 = arith.constant 0 : index
      %c0_13 = arith.constant 0 : index
      %18 = vector.load %arg6[%c0_12, %c0_13] : memref<256x196xf32, #tpu.memory_space<vmem>>, vector<256x196xf32>
      tpu.vector_store %arg6[%c0_12, %c0_13], %17 {strides = array<i32>} : memref<256x196xf32, #tpu.memory_space<vmem>>, vector<256x196xf32>,
    } else {
    }
    %c1_i32 = arith.constant 1 : i32
    %13 = arith.cmpi eq, %arg0, %c1_i32 : i32
    %14 = arith.extui %13 : i1 to i32
    %c0_i32_9 = arith.constant 0 : i32
    %15 = arith.cmpi ne, %14, %c0_i32_9 : i32
    scf.if %15 {
      %c0_10 = arith.constant 0 : index
      %c0_11 = arith.constant 0 : index
      %16 = vector.load %arg6[%c0_10, %c0_11] : memref<256x196xf32, #tpu.memory_space<vmem>>, vector<256x196xf32>
      %cst_12 = arith.constant dense<0.000000e+00> : vector<256xf32>
      %17 = vector.multi_reduction <add>, %16, %cst_12 [1] : vector<256x196xf32> to vector<256xf32>
      %18 = vector.shape_cast %17 : vector<256xf32> to vector<256x1xf32>
      %19 = arith.mulf %16, %16 : vector<256x196xf32>
      %cst_13 = arith.constant dense<0.000000e+00> : vector<256xf32>
      %20 = vector.multi_reduction <add>, %19, %cst_13 [1] : vector<256x196xf32> to vector<256xf32>
      %21 = vector.shape_cast %20 : vector<256xf32> to vector<256x1xf32>
      %cst_14 = arith.constant 1.960000e+02 : f32
      %22 = vector.broadcast %cst_14 : f32 to vector<256x1xf32>
      %23 = arith.divf %18, %22 : vector<256x1xf32>
      %cst_15 = arith.constant 1.960000e+02 : f32
      %24 = vector.broadcast %cst_15 : f32 to vector<256x1xf32>
      %25 = arith.divf %21, %24 : vector<256x1xf32>
      %26 = arith.mulf %23, %23 : vector<256x1xf32>
      %27 = arith.subf %25, %26 : vector<256x1xf32>
      %cst_16 = arith.constant 9.99999974E-6 : f32
      %28 = vector.broadcast %cst_16 : f32 to vector<256x1xf32>
      %29 = arith.addf %27, %28 : vector<256x1xf32>
      %30 = math.rsqrt %29 : vector<256x1xf32>
      %31 = vector.broadcast %23 : vector<256x1xf32> to vector<256x196xf32>
      %32 = arith.subf %16, %31 : vector<256x196xf32>
      %33 = vector.broadcast %30 : vector<256x1xf32> to vector<256x196xf32>
      %34 = arith.mulf %32, %33 : vector<256x196xf32>
      %c0_17 = arith.constant 0 : index
      %c0_18 = arith.constant 0 : index
      %35 = vector.load %arg4[%c0_17, %c0_18] : memref<256x1xf32, #tpu.memory_space<vmem>>, vector<256x1xf32>
      %36 = vector.broadcast %35 : vector<256x1xf32> to vector<256x196xf32>
      %37 = arith.mulf %34, %36 : vector<256x196xf32>
      %c0_19 = arith.constant 0 : index
      %c0_20 = arith.constant 0 : index
      %38 = vector.load %arg5[%c0_19, %c0_20] : memref<256x1xf32, #tpu.memory_space<vmem>>, vector<256x1xf32>
      %39 = vector.broadcast %38 : vector<256x1xf32> to vector<256x196xf32>
      %40 = arith.addf %37, %39 : vector<256x196xf32>
      %c0_21 = arith.constant 0 : index
      %c0_22 = arith.constant 0 : index
      %41 = vector.load %arg6[%c0_21, %c0_22] : memref<256x196xf32, #tpu.memory_space<vmem>>, vector<256x196xf32>
      tpu.vector_store %arg6[%c0_21, %c0_22], %40 {strides = array<i32>} : memref<256x196xf32, #tpu.memory_space<vmem>>, vector<256x196xf32>,
    } else {
    }
    return
  }
  func.func @transform_0(%arg0: i32) -> (i32, i32) {
    %c0_i32 = arith.constant 0 : i32
    %c0_i32_0 = arith.constant 0 : i32
    return %arg0, %c0_i32 : i32, i32
  }
  func.func @transform_1(%arg0: i32) -> (i32, i32) {
    %c0_i32 = arith.constant 0 : i32
    %c0_i32_0 = arith.constant 0 : i32
    return %arg0, %c0_i32 : i32, i32
  }
  func.func @transform_2(%arg0: i32) -> (i32, i32) {
    %c0_i32 = arith.constant 0 : i32
    %c0_i32_0 = arith.constant 0 : i32
    return %c0_i32, %arg0 : i32, i32
  }
  func.func @transform_3(%arg0: i32) -> (i32, i32) {
    %c0_i32 = arith.constant 0 : i32
    %c0_i32_0 = arith.constant 0 : i32
    %c0_i32_1 = arith.constant 0 : i32
    return %c0_i32, %c0_i32_0 : i32, i32
  }
  func.func @transform_4(%arg0: i32) -> (i32, i32) {
    %c0_i32 = arith.constant 0 : i32
    %c0_i32_0 = arith.constant 0 : i32
    %c0_i32_1 = arith.constant 0 : i32
    return %c0_i32, %c0_i32_0 : i32, i32
  }
  func.func @transform_5(%arg0: i32) -> (i32, i32) {
    %c0_i32 = arith.constant 0 : i32
    %c0_i32_0 = arith.constant 0 : i32
    %c0_i32_1 = arith.constant 0 : i32
    return %c0_i32, %c0_i32_0 : i32, i32
  }
}

</mosaic_0001>

<bundles_post_ra>
// kernel: tpu_custom_call.1
= control target key start
LH: loop header
LB: loop body
LE: loop exit
PB: predicated region body
PF: predicated region fallthrough
CT: control target
= control target key end

     0   :  { %s3523_s18 = smov 0   ;;  %s3525_s19 = smov 0   ;;  %s7059_s0 = inlined_call_operand.vmem [shape: f32[1024,196], index: 0, kind: input, shape index: {}]   ;;  %s7060_s1 = inlined_call_operand.vmem [shape: f32[1024,196], index: 1, kind: input, shape index: {}]   ;;  %s7061_s2 = inlined_call_operand.vmem [shape: f32[256,1024], index: 2, kind: input, shape index: {}]   ;;  %s7062_s3 = inlined_call_operand.vmem [shape: f32[256,1], index: 3, kind: input, shape index: {}]   ;;  %s7063_s4 = inlined_call_operand.vmem [shape: f32[256,1], index: 4, kind: input, shape index: {}]   ;;  %s7064_s5 = inlined_call_operand.vmem [shape: f32[256,196], index: 5, kind: output, shape index: {}]  }
   0x1   :  { %s3527_s20 = smov 0  }
   0x2 LB: > { %s3539_s21 = sadd.s32 4294967295, %s3490_s20   ;;  %s3542_s22 = sadd.s32 1, %s3490_s20   ;;  %s3490_s20 = sphi %s3527_s20, %s7351_s20   ;;  %s3486_s19 = sphi %s3525_s19, %s7350_s19   ;;  %s3482_s18 = sphi %s3523_s18, %s7349_s18  }
   0x3   : > { %s71_s23 = ssub.s32 %s3490_s20, %s3542_s22  ;;  %s74_s24 = sadd.s32 1, %s3486_s19 }
   0x4   : > { %p72_p0 = scmp.eq.s32.totalorder %s71_s23, 0  ;;  %p81_p1 = scmp.ne.s32.totalorder %s3486_s19, %s3482_s18 }
   0x5   : > { %p82_p2 = scmp.eq.s32.totalorder %s3490_s20, 0  ;;  %p3301_p4 = scmp.ge.s32.totalorder %s3490_s20, 2 }
   0x6   : > { %s3551_s25 = scalar_select %p72_p0, %s3486_s19, %s74_s24  }
   0x7   : > { %p83_p3 = por %p82_p2, %p81_p1  ;;  %176 = sbr.rel (%p3301_p4) target bundleno = 80 (0x50), region = 24 }
   0xc   : > { %199 = sbr.rel (!%p83_p3) target bundleno = 80 (0x50), region = 36  ;;  %s201_s26 = sand.u32 (%p83_p3), 1, %s3486_s19  }
   0xd   : > { %s3318_s27 = sshll.u32 (%p83_p3), %s3490_s20, 5  ;;  %s3302_s28 = sshll.u32 (%p83_p3), %s201_s26, 10 }
   0xe   : > { %s3559_s6 = scalar_lea.vmem (%p83_p3), %s7061_s2, %s3318_s27  ;;  %s3564_s7 = scalar_lea.vmem (%p83_p3), [#allocation2], %s3302_s28 }
   0xf   : > { %v219_v0 = vld [vmem:[%s3559_s6] sm:$0xff] (%p83_p3)  ;;  %v221_v1 = vld [vmem:[%s3559_s6 + $0x8] sm:$0xff] (%p83_p3)  ;;  %v223_v2 = vld [vmem:[%s3559_s6 + $0x10] sm:$0xff] (%p83_p3) }
  0x10   : > { %220 = vst [vmem:[%s3564_s7] sm:$0xff] (%p83_p3), %v219_v0  ;;  %222 = vst [vmem:[%s3564_s7 + $0x8] sm:$0xff] (%p83_p3), %v221_v1  ;;  %v225_v3 = vld [vmem:[%s3559_s6 + $0x18] sm:$0xff] (%p83_p3)  ;;  %v227_v4 = vld [vmem:[%s3559_s6 + $0x40] sm:$0xff] (%p83_p3) }
  0x11   : > { %224 = vst [vmem:[%s3564_s7 + $0x10] sm:$0xff] %v223_v2  ;;  %v229_v5 = vld [vmem:[%s3559_s6 + $0x48] sm:$0xff]  ;;  %226 = vst [vmem:[%s3564_s7 + $0x18] sm:$0xff] %v225_v3  ;;  %v231_v6 = vld [vmem:[%s3559_s6 + $0x50] sm:$0xff] }
  0x12   : > { %228 = vst [vmem:[%s3564_s7 + $0x20] sm:$0xff] %v227_v4  ;;  %230 = vst [vmem:[%s3564_s7 + $0x28] sm:$0xff] %v229_v5  ;;  %v233_v7 = vld [vmem:[%s3559_s6 + $0x58] sm:$0xff]  ;;  %v235_v8 = vld [vmem:[%s3559_s6 + $0x80] sm:$0xff] }
  0x13   : > { %232 = vst [vmem:[%s3564_s7 + $0x30] sm:$0xff] %v231_v6  ;;  %234 = vst [vmem:[%s3564_s7 + $0x38] sm:$0xff] %v233_v7  ;;  %v237_v9 = vld [vmem:[%s3559_s6 + $0x88] sm:$0xff]  ;;  %v239_v10 = vld [vmem:[%s3559_s6 + $0x90] sm:$0xff] }
  0x14   : > { %236 = vst [vmem:[%s3564_s7 + $0x40] sm:$0xff] %v235_v8  ;;  %v241_v11 = vld [vmem:[%s3559_s6 + $0x98] sm:$0xff]  ;;  %238 = vst [vmem:[%s3564_s7 + $0x48] sm:$0xff] %v237_v9  ;;  %v243_v12 = vld [vmem:[%s3559_s6 + $0xc0] sm:$0xff] }
  0x15   : > { %240 = vst [vmem:[%s3564_s7 + $0x50] sm:$0xff] %v239_v10  ;;  %242 = vst [vmem:[%s3564_s7 + $0x58] sm:$0xff] %v241_v11  ;;  %v245_v13 = vld [vmem:[%s3559_s6 + $0xc8] sm:$0xff]  ;;  %v247_v14 = vld [vmem:[%s3559_s6 + $0xd0] sm:$0xff] }
  0x16   : > { %244 = vst [vmem:[%s3564_s7 + $0x60] sm:$0xff] %v243_v12  ;;  %246 = vst [vmem:[%s3564_s7 + $0x68] sm:$0xff] %v245_v13  ;;  %v249_v15 = vld [vmem:[%s3559_s6 + $0xd8] sm:$0xff]  ;;  %v251_v16 = vld [vmem:[%s3559_s6 + $0x100] sm:$0xff] }
  0x17   : > { %248 = vst [vmem:[%s3564_s7 + $0x70] sm:$0xff] %v247_v14  ;;  %v253_v17 = vld [vmem:[%s3559_s6 + $0x108] sm:$0xff]  ;;  %250 = vst [vmem:[%s3564_s7 + $0x78] sm:$0xff] %v249_v15  ;;  %v255_v18 = vld [vmem:[%s3559_s6 + $0x110] sm:$0xff] }
  0x18   : > { %252 = vst [vmem:[%s3564_s7 + $0x80] sm:$0xff] %v251_v16  ;;  %254 = vst [vmem:[%s3564_s7 + $0x88] sm:$0xff] %v253_v17  ;;  %v257_v19 = vld [vmem:[%s3559_s6 + $0x118] sm:$0xff]  ;;  %v259_v20 = vld [vmem:[%s3559_s6 + $0x140] sm:$0xff] }
  0x19   : > { %256 = vst [vmem:[%s3564_s7 + $0x90] sm:$0xff] %v255_v18  ;;  %258 = vst [vmem:[%s3564_s7 + $0x98] sm:$0xff] %v257_v19  ;;  %v261_v21 = vld [vmem:[%s3559_s6 + $0x148] sm:$0xff]  ;;  %v263_v22 = vld [vmem:[%s3559_s6 + $0x150] sm:$0xff] }
  0x1a   : > { %260 = vst [vmem:[%s3564_s7 + $0xa0] sm:$0xff] %v259_v20  ;;  %v265_v23 = vld [vmem:[%s3559_s6 + $0x158] sm:$0xff]  ;;  %262 = vst [vmem:[%s3564_s7 + $0xa8] sm:$0xff] %v261_v21  ;;  %v267_v24 = vld [vmem:[%s3559_s6 + $0x180] sm:$0xff] }
  0x1b   : > { %264 = vst [vmem:[%s3564_s7 + $0xb0] sm:$0xff] %v263_v22  ;;  %266 = vst [vmem:[%s3564_s7 + $0xb8] sm:$0xff] %v265_v23  ;;  %v269_v25 = vld [vmem:[%s3559_s6 + $0x188] sm:$0xff]  ;;  %v271_v26 = vld [vmem:[%s3559_s6 + $0x190] sm:$0xff] }
  0x1c   : > { %268 = vst [vmem:[%s3564_s7 + $0xc0] sm:$0xff] %v267_v24  ;;  %270 = vst [vmem:[%s3564_s7 + $0xc8] sm:$0xff] %v269_v25  ;;  %v273_v27 = vld [vmem:[%s3559_s6 + $0x198] sm:$0xff]  ;;  %v275_v28 = vld [vmem:[%s3559_s6 + $0x1c0] sm:$0xff] }
  0x1d   : > { %272 = vst [vmem:[%s3564_s7 + $0xd0] sm:$0xff] %v271_v26  ;;  %v277_v29 = vld [vmem:[%s3559_s6 + $0x1c8] sm:$0xff]  ;;  %274 = vst [vmem:[%s3564_s7 + $0xd8] sm:$0xff] %v273_v27  ;;  %v279_v30 = vld [vmem:[%s3559_s6 + $0x1d0] sm:$0xff] }
  0x1e   : > { %276 = vst [vmem:[%s3564_s7 + $0xe0] sm:$0xff] %v275_v28  ;;  %278 = vst [vmem:[%s3564_s7 + $0xe8] sm:$0xff] %v277_v29  ;;  %v281_v31 = vld [vmem:[%s3559_s6 + $0x1d8] sm:$0xff]  ;;  %v283_v32 = vld [vmem:[%s3559_s6 + $0x200] sm:$0xff] }
  0x1f   : > { %280 = vst [vmem:[%s3564_s7 + $0xf0] sm:$0xff] %v279_v30  ;;  %282 = vst [vmem:[%s3564_s7 + $0xf8] sm:$0xff] %v281_v31  ;;  %v285_v33 = vld [vmem:[%s3559_s6 + $0x208] sm:$0xff]  ;;  %v287_v34 = vld [vmem:[%s3559_s6 + $0x210] sm:$0xff] }
  0x20   : > { %284 = vst [vmem:[%s3564_s7 + $0x100] sm:$0xff] %v283_v32  ;;  %v289_v35 = vld [vmem:[%s3559_s6 + $0x218] sm:$0xff]  ;;  %286 = vst [vmem:[%s3564_s7 + $0x108] sm:$0xff] %v285_v33  ;;  %v291_v36 = vld [vmem:[%s3559_s6 + $0x240] sm:$0xff] }
  0x21   : > { %288 = vst [vmem:[%s3564_s7 + $0x110] sm:$0xff] %v287_v34  ;;  %290 = vst [vmem:[%s3564_s7 + $0x118] sm:$0xff] %v289_v35  ;;  %v293_v37 = vld [vmem:[%s3559_s6 + $0x248] sm:$0xff]  ;;  %v295_v38 = vld [vmem:[%s3559_s6 + $0x250] sm:$0xff] }
  0x22   : > { %292 = vst [vmem:[%s3564_s7 + $0x120] sm:$0xff] %v291_v36  ;;  %294 = vst [vmem:[%s3564_s7 + $0x128] sm:$0xff] %v293_v37  ;;  %v297_v39 = vld [vmem:[%s3559_s6 + $0x258] sm:$0xff]  ;;  %v299_v40 = vld [vmem:[%s3559_s6 + $0x280] sm:$0xff] }
  0x23   : > { %296 = vst [vmem:[%s3564_s7 + $0x130] sm:$0xff] %v295_v38  ;;  %v301_v41 = vld [vmem:[%s3559_s6 + $0x288] sm:$0xff]  ;;  %298 = vst [vmem:[%s3564_s7 + $0x138] sm:$0xff] %v297_v39  ;;  %v303_v42 = vld [vmem:[%s3559_s6 + $0x290] sm:$0xff] }
  0x24   : > { %300 = vst [vmem:[%s3564_s7 + $0x140] sm:$0xff] %v299_v40  ;;  %302 = vst [vmem:[%s3564_s7 + $0x148] sm:$0xff] %v301_v41  ;;  %v305_v43 = vld [vmem:[%s3559_s6 + $0x298] sm:$0xff]  ;;  %v307_v44 = vld [vmem:[%s3559_s6 + $0x2c0] sm:$0xff] }
  0x25   : > { %304 = vst [vmem:[%s3564_s7 + $0x150] sm:$0xff] %v303_v42  ;;  %306 = vst [vmem:[%s3564_s7 + $0x158] sm:$0xff] %v305_v43  ;;  %v309_v45 = vld [vmem:[%s3559_s6 + $0x2c8] sm:$0xff]  ;;  %v311_v46 = vld [vmem:[%s3559_s6 + $0x2d0] sm:$0xff] }
  0x26   : > { %308 = vst [vmem:[%s3564_s7 + $0x160] sm:$0xff] %v307_v44  ;;  %v313_v47 = vld [vmem:[%s3559_s6 + $0x2d8] sm:$0xff]  ;;  %310 = vst [vmem:[%s3564_s7 + $0x168] sm:$0xff] %v309_v45  ;;  %v315_v48 = vld [vmem:[%s3559_s6 + $0x300] sm:$0xff] }
  0x27   : > { %312 = vst [vmem:[%s3564_s7 + $0x170] sm:$0xff] %v311_v46  ;;  %314 = vst [vmem:[%s3564_s7 + $0x178] sm:$0xff] %v313_v47  ;;  %v317_v49 = vld [vmem:[%s3559_s6 + $0x308] sm:$0xff]  ;;  %v319_v50 = vld [vmem:[%s3559_s6 + $0x310] sm:$0xff] }
  0x28   : > { %316 = vst [vmem:[%s3564_s7 + $0x180] sm:$0xff] %v315_v48  ;;  %318 = vst [vmem:[%s3564_s7 + $0x188] sm:$0xff] %v317_v49  ;;  %v321_v51 = vld [vmem:[%s3559_s6 + $0x318] sm:$0xff]  ;;  %v323_v52 = vld [vmem:[%s3559_s6 + $0x340] sm:$0xff] }
  0x29   : > { %320 = vst [vmem:[%s3564_s7 + $0x190] sm:$0xff] %v319_v50  ;;  %v325_v53 = vld [vmem:[%s3559_s6 + $0x348] sm:$0xff]  ;;  %322 = vst [vmem:[%s3564_s7 + $0x198] sm:$0xff] %v321_v51  ;;  %v327_v54 = vld [vmem:[%s3559_s6 + $0x350] sm:$0xff] }
  0x2a   : > { %324 = vst [vmem:[%s3564_s7 + $0x1a0] sm:$0xff] %v323_v52  ;;  %326 = vst [vmem:[%s3564_s7 + $0x1a8] sm:$0xff] %v325_v53  ;;  %v329_v55 = vld [vmem:[%s3559_s6 + $0x358] sm:$0xff]  ;;  %v331_v56 = vld [vmem:[%s3559_s6 + $0x380] sm:$0xff] }
  0x2b   : > { %328 = vst [vmem:[%s3564_s7 + $0x1b0] sm:$0xff] %v327_v54  ;;  %330 = vst [vmem:[%s3564_s7 + $0x1b8] sm:$0xff] %v329_v55  ;;  %v333_v57 = vld [vmem:[%s3559_s6 + $0x388] sm:$0xff]  ;;  %v335_v58 = vld [vmem:[%s3559_s6 + $0x390] sm:$0xff] }
  0x2c   : > { %332 = vst [vmem:[%s3564_s7 + $0x1c0] sm:$0xff] %v331_v56  ;;  %v337_v59 = vld [vmem:[%s3559_s6 + $0x398] sm:$0xff]  ;;  %334 = vst [vmem:[%s3564_s7 + $0x1c8] sm:$0xff] %v333_v57  ;;  %v339_v60 = vld [vmem:[%s3559_s6 + $0x3c0] sm:$0xff] }
  0x2d   : > { %336 = vst [vmem:[%s3564_s7 + $0x1d0] sm:$0xff] %v335_v58  ;;  %338 = vst [vmem:[%s3564_s7 + $0x1d8] sm:$0xff] %v337_v59  ;;  %v341_v61 = vld [vmem:[%s3559_s6 + $0x3c8] sm:$0xff]  ;;  %v343_v62 = vld [vmem:[%s3559_s6 + $0x3d0] sm:$0xff] }
  0x2e   : > { %340 = vst [vmem:[%s3564_s7 + $0x1e0] sm:$0xff] %v339_v60  ;;  %342 = vst [vmem:[%s3564_s7 + $0x1e8] sm:$0xff] %v341_v61  ;;  %v345_v63 = vld [vmem:[%s3559_s6 + $0x3d8] sm:$0xff]  ;;  %v347_v0 = vld [vmem:[%s3559_s6 + $0x400] sm:$0xff] }
  0x2f   : > { %344 = vst [vmem:[%s3564_s7 + $0x1f0] sm:$0xff] %v343_v62  ;;  %v349_v1 = vld [vmem:[%s3559_s6 + $0x408] sm:$0xff]  ;;  %346 = vst [vmem:[%s3564_s7 + $0x1f8] sm:$0xff] %v345_v63  ;;  %v351_v2 = vld [vmem:[%s3559_s6 + $0x410] sm:$0xff] }
  0x30   : > { %348 = vst [vmem:[%s3564_s7 + $0x200] sm:$0xff] %v347_v0  ;;  %350 = vst [vmem:[%s3564_s7 + $0x208] sm:$0xff] %v349_v1  ;;  %v353_v3 = vld [vmem:[%s3559_s6 + $0x418] sm:$0xff]  ;;  %v355_v4 = vld [vmem:[%s3559_s6 + $0x440] sm:$0xff] }
  0x31   : > { %352 = vst [vmem:[%s3564_s7 + $0x210] sm:$0xff] %v351_v2  ;;  %354 = vst [vmem:[%s3564_s7 + $0x218] sm:$0xff] %v353_v3  ;;  %v357_v5 = vld [vmem:[%s3559_s6 + $0x448] sm:$0xff]  ;;  %v359_v6 = vld [vmem:[%s3559_s6 + $0x450] sm:$0xff] }
  0x32   : > { %356 = vst [vmem:[%s3564_s7 + $0x220] sm:$0xff] %v355_v4  ;;  %v361_v7 = vld [vmem:[%s3559_s6 + $0x458] sm:$0xff]  ;;  %358 = vst [vmem:[%s3564_s7 + $0x228] sm:$0xff] %v357_v5  ;;  %v363_v8 = vld [vmem:[%s3559_s6 + $0x480] sm:$0xff] }
  0x33   : > { %360 = vst [vmem:[%s3564_s7 + $0x230] sm:$0xff] %v359_v6  ;;  %362 = vst [vmem:[%s3564_s7 + $0x238] sm:$0xff] %v361_v7  ;;  %v365_v9 = vld [vmem:[%s3559_s6 + $0x488] sm:$0xff]  ;;  %v367_v10 = vld [vmem:[%s3559_s6 + $0x490] sm:$0xff] }
  0x34   : > { %364 = vst [vmem:[%s3564_s7 + $0x240] sm:$0xff] %v363_v8  ;;  %366 = vst [vmem:[%s3564_s7 + $0x248] sm:$0xff] %v365_v9  ;;  %v369_v11 = vld [vmem:[%s3559_s6 + $0x498] sm:$0xff]  ;;  %v371_v12 = vld [vmem:[%s3559_s6 + $0x4c0] sm:$0xff] }
  0x35   : > { %368 = vst [vmem:[%s3564_s7 + $0x250] sm:$0xff] %v367_v10  ;;  %v373_v13 = vld [vmem:[%s3559_s6 + $0x4c8] sm:$0xff]  ;;  %370 = vst [vmem:[%s3564_s7 + $0x258] sm:$0xff] %v369_v11  ;;  %v375_v14 = vld [vmem:[%s3559_s6 + $0x4d0] sm:$0xff] }
  0x36   : > { %372 = vst [vmem:[%s3564_s7 + $0x260] sm:$0xff] %v371_v12  ;;  %374 = vst [vmem:[%s3564_s7 + $0x268] sm:$0xff] %v373_v13  ;;  %v377_v15 = vld [vmem:[%s3559_s6 + $0x4d8] sm:$0xff]  ;;  %v379_v16 = vld [vmem:[%s3559_s6 + $0x500] sm:$0xff] }
  0x37   : > { %376 = vst [vmem:[%s3564_s7 + $0x270] sm:$0xff] %v375_v14  ;;  %378 = vst [vmem:[%s3564_s7 + $0x278] sm:$0xff] %v377_v15  ;;  %v381_v17 = vld [vmem:[%s3559_s6 + $0x508] sm:$0xff]  ;;  %v383_v18 = vld [vmem:[%s3559_s6 + $0x510] sm:$0xff] }
  0x38   : > { %380 = vst [vmem:[%s3564_s7 + $0x280] sm:$0xff] %v379_v16  ;;  %v385_v19 = vld [vmem:[%s3559_s6 + $0x518] sm:$0xff]  ;;  %382 = vst [vmem:[%s3564_s7 + $0x288] sm:$0xff] %v381_v17  ;;  %v387_v20 = vld [vmem:[%s3559_s6 + $0x540] sm:$0xff] }
  0x39   : > { %384 = vst [vmem:[%s3564_s7 + $0x290] sm:$0xff] %v383_v18  ;;  %386 = vst [vmem:[%s3564_s7 + $0x298] sm:$0xff] %v385_v19  ;;  %v389_v21 = vld [vmem:[%s3559_s6 + $0x548] sm:$0xff]  ;;  %v391_v22 = vld [vmem:[%s3559_s6 + $0x550] sm:$0xff] }
  0x3a   : > { %388 = vst [vmem:[%s3564_s7 + $0x2a0] sm:$0xff] %v387_v20  ;;  %390 = vst [vmem:[%s3564_s7 + $0x2a8] sm:$0xff] %v389_v21  ;;  %v393_v23 = vld [vmem:[%s3559_s6 + $0x558] sm:$0xff]  ;;  %v395_v24 = vld [vmem:[%s3559_s6 + $0x580] sm:$0xff] }
  0x3b   : > { %392 = vst [vmem:[%s3564_s7 + $0x2b0] sm:$0xff] %v391_v22  ;;  %v397_v25 = vld [vmem:[%s3559_s6 + $0x588] sm:$0xff]  ;;  %394 = vst [vmem:[%s3564_s7 + $0x2b8] sm:$0xff] %v393_v23  ;;  %v399_v26 = vld [vmem:[%s3559_s6 + $0x590] sm:$0xff] }
  0x3c   : > { %396 = vst [vmem:[%s3564_s7 + $0x2c0] sm:$0xff] %v395_v24  ;;  %398 = vst [vmem:[%s3564_s7 + $0x2c8] sm:$0xff] %v397_v25  ;;  %v401_v27 = vld [vmem:[%s3559_s6 + $0x598] sm:$0xff]  ;;  %v403_v28 = vld [vmem:[%s3559_s6 + $0x5c0] sm:$0xff] }
  0x3d   : > { %400 = vst [vmem:[%s3564_s7 + $0x2d0] sm:$0xff] %v399_v26  ;;  %402 = vst [vmem:[%s3564_s7 + $0x2d8] sm:$0xff] %v401_v27  ;;  %v405_v29 = vld [vmem:[%s3559_s6 + $0x5c8] sm:$0xff]  ;;  %v407_v30 = vld [vmem:[%s3559_s6 + $0x5d0] sm:$0xff] }
  0x3e   : > { %404 = vst [vmem:[%s3564_s7 + $0x2e0] sm:$0xff] %v403_v28  ;;  %v409_v31 = vld [vmem:[%s3559_s6 + $0x5d8] sm:$0xff]  ;;  %406 = vst [vmem:[%s3564_s7 + $0x2e8] sm:$0xff] %v405_v29  ;;  %v411_v32 = vld [vmem:[%s3559_s6 + $0x600] sm:$0xff] }
  0x3f   : > { %408 = vst [vmem:[%s3564_s7 + $0x2f0] sm:$0xff] %v407_v30  ;;  %410 = vst [vmem:[%s3564_s7 + $0x2f8] sm:$0xff] %v409_v31  ;;  %v413_v33 = vld [vmem:[%s3559_s6 + $0x608] sm:$0xff]  ;;  %v415_v34 = vld [vmem:[%s3559_s6 + $0x610] sm:$0xff] }
  0x40   : > { %412 = vst [vmem:[%s3564_s7 + $0x300] sm:$0xff] %v411_v32  ;;  %414 = vst [vmem:[%s3564_s7 + $0x308] sm:$0xff] %v413_v33  ;;  %v417_v35 = vld [vmem:[%s3559_s6 + $0x618] sm:$0xff]  ;;  %v419_v36 = vld [vmem:[%s3559_s6 + $0x640] sm:$0xff] }
  0x41   : > { %416 = vst [vmem:[%s3564_s7 + $0x310] sm:$0xff] %v415_v34  ;;  %v421_v37 = vld [vmem:[%s3559_s6 + $0x648] sm:$0xff]  ;;  %418 = vst [vmem:[%s3564_s7 + $0x318] sm:$0xff] %v417_v35  ;;  %v423_v38 = vld [vmem:[%s3559_s6 + $0x650] sm:$0xff] }
  0x42   : > { %420 = vst [vmem:[%s3564_s7 + $0x320] sm:$0xff] %v419_v36  ;;  %422 = vst [vmem:[%s3564_s7 + $0x328] sm:$0xff] %v421_v37  ;;  %v425_v39 = vld [vmem:[%s3559_s6 + $0x658] sm:$0xff]  ;;  %v427_v40 = vld [vmem:[%s3559_s6 + $0x680] sm:$0xff] }
  0x43   : > { %424 = vst [vmem:[%s3564_s7 + $0x330] sm:$0xff] %v423_v38  ;;  %426 = vst [vmem:[%s3564_s7 + $0x338] sm:$0xff] %v425_v39  ;;  %v429_v41 = vld [vmem:[%s3559_s6 + $0x688] sm:$0xff]  ;;  %v431_v42 = vld [vmem:[%s3559_s6 + $0x690] sm:$0xff] }
  0x44   : > { %428 = vst [vmem:[%s3564_s7 + $0x340] sm:$0xff] %v427_v40  ;;  %v433_v43 = vld [vmem:[%s3559_s6 + $0x698] sm:$0xff]  ;;  %430 = vst [vmem:[%s3564_s7 + $0x348] sm:$0xff] %v429_v41  ;;  %v435_v44 = vld [vmem:[%s3559_s6 + $0x6c0] sm:$0xff] }
  0x45   : > { %432 = vst [vmem:[%s3564_s7 + $0x350] sm:$0xff] %v431_v42  ;;  %434 = vst [vmem:[%s3564_s7 + $0x358] sm:$0xff] %v433_v43  ;;  %v437_v45 = vld [vmem:[%s3559_s6 + $0x6c8] sm:$0xff]  ;;  %v439_v46 = vld [vmem:[%s3559_s6 + $0x6d0] sm:$0xff] }
  0x46   : > { %436 = vst [vmem:[%s3564_s7 + $0x360] sm:$0xff] %v435_v44  ;;  %438 = vst [vmem:[%s3564_s7 + $0x368] sm:$0xff] %v437_v45  ;;  %v441_v47 = vld [vmem:[%s3559_s6 + $0x6d8] sm:$0xff]  ;;  %v443_v48 = vld [vmem:[%s3559_s6 + $0x700] sm:$0xff] }
  0x47   : > { %440 = vst [vmem:[%s3564_s7 + $0x370] sm:$0xff] %v439_v46  ;;  %v445_v49 = vld [vmem:[%s3559_s6 + $0x708] sm:$0xff]  ;;  %442 = vst [vmem:[%s3564_s7 + $0x378] sm:$0xff] %v441_v47  ;;  %v447_v50 = vld [vmem:[%s3559_s6 + $0x710] sm:$0xff] }
  0x48   : > { %444 = vst [vmem:[%s3564_s7 + $0x380] sm:$0xff] %v443_v48  ;;  %446 = vst [vmem:[%s3564_s7 + $0x388] sm:$0xff] %v445_v49  ;;  %v449_v51 = vld [vmem:[%s3559_s6 + $0x718] sm:$0xff]  ;;  %v451_v52 = vld [vmem:[%s3559_s6 + $0x740] sm:$0xff] }
  0x49   : > { %448 = vst [vmem:[%s3564_s7 + $0x390] sm:$0xff] %v447_v50  ;;  %450 = vst [vmem:[%s3564_s7 + $0x398] sm:$0xff] %v449_v51  ;;  %v453_v53 = vld [vmem:[%s3559_s6 + $0x748] sm:$0xff]  ;;  %v455_v54 = vld [vmem:[%s3559_s6 + $0x750] sm:$0xff] }
  0x4a   : > { %452 = vst [vmem:[%s3564_s7 + $0x3a0] sm:$0xff] %v451_v52  ;;  %v457_v55 = vld [vmem:[%s3559_s6 + $0x758] sm:$0xff]  ;;  %454 = vst [vmem:[%s3564_s7 + $0x3a8] sm:$0xff] %v453_v53  ;;  %v459_v56 = vld [vmem:[%s3559_s6 + $0x780] sm:$0xff] }
  0x4b   : > { %456 = vst [vmem:[%s3564_s7 + $0x3b0] sm:$0xff] %v455_v54  ;;  %458 = vst [vmem:[%s3564_s7 + $0x3b8] sm:$0xff] %v457_v55  ;;  %v461_v57 = vld [vmem:[%s3559_s6 + $0x788] sm:$0xff]  ;;  %v463_v58 = vld [vmem:[%s3559_s6 + $0x790] sm:$0xff] }
  0x4c   : > { %460 = vst [vmem:[%s3564_s7 + $0x3c0] sm:$0xff] %v459_v56  ;;  %462 = vst [vmem:[%s3564_s7 + $0x3c8] sm:$0xff] %v461_v57  ;;  %v465_v59 = vld [vmem:[%s3559_s6 + $0x798] sm:$0xff]  ;;  %v467_v60 = vld [vmem:[%s3559_s6 + $0x7c0] sm:$0xff] }
  0x4d   : > { %464 = vst [vmem:[%s3564_s7 + $0x3d0] sm:$0xff] %v463_v58  ;;  %v469_v61 = vld [vmem:[%s3559_s6 + $0x7c8] sm:$0xff]  ;;  %466 = vst [vmem:[%s3564_s7 + $0x3d8] sm:$0xff] %v465_v59  ;;  %v471_v62 = vld [vmem:[%s3559_s6 + $0x7d0] sm:$0xff] }
  0x4e   : > { %468 = vst [vmem:[%s3564_s7 + $0x3e0] sm:$0xff] %v467_v60  ;;  %470 = vst [vmem:[%s3564_s7 + $0x3e8] sm:$0xff] %v469_v61  ;;  %v473_v63 = vld [vmem:[%s3559_s6 + $0x7d8] sm:$0xff] }
  0x4f   : > { %472 = vst [vmem:[%s3564_s7 + $0x3f0] sm:$0xff] %v471_v62  ;;  %474 = vst [vmem:[%s3564_s7 + $0x3f8] sm:$0xff] %v473_v63 }
  0x50 PF: > { %p3305_p5 = scmp.ge.s32.totalorder %s3490_s20, 1  ;;  %p479_p6 = scmp.lt.s32.totalorder %s3490_s20, 3 }
  0x52   : > { %p480_p7 = pnand %p3305_p5, %p479_p6 }
  0x54   : > { %483 = sbr.rel (%p480_p7) target bundleno = 1004 (0x3ec), region = 59 }
  0x59   : > { %s3307_s8 = sshll.u32 %s3539_s21, 6  ;;  %s486_s9 = sand.u32 1, %s3482_s18  }
  0x5a   : > { %p521_p8 = scmp.lt.s32.totalorder %s3307_s8, 127  ;;  %s3306_s10 = sshll.u32 %s486_s9, 10 }
  0x5b   : > { %s3823_s11 = scalar_lea.vmem [#allocation2], %s3306_s10  ;;  %p3313_p9 = scmp.ne.s32.totalorder %s3539_s21, 0 }
  0x5c   : > { %s7353_s8 = smov (!%p521_p8, %s3307_s8), 127  ;;  %v1048_v0 = vld [vmem:[%s3823_s11 + $0x8] sm:$0xff]  ;;  %v1050_v1 = vld [vmem:[%s3823_s11 + $0x18] sm:$0xff] }
  0x5d   : > { %1239 = vmatprep.mubr.f32.mxu0 %v1048_v0  ;;  %1496 = vmatprep.mubr.f32.mxu1 %v1050_v1  ;;  %s3319_s12 = sshll.u32 %s7353_s8, 4 }
  0x5e   : > { %s3830_s15 = scalar_lea.vmem %s7059_s0, %s3319_s12  ;;  %s3835_s18 = scalar_lea.vmem %s7060_s1, %s3319_s12 }
  0x5f   : > { %v566_v2 = vld [vmem:[%s3830_s15 + $0xf8] sm:$0xff]  ;;  %v565_v7 = vld [vmem:[%s3830_s15 + $0xf0] sm:$0xff]  ;;  %v564_v13 = vld [vmem:[%s3830_s15 + $0xe8] sm:$0xff] }
  0x60   : > { %v694_v3 = vld [vmem:[%s3835_s18 + $0xf8] sm:$0xff]  ;;  %v693_v8 = vld [vmem:[%s3835_s18 + $0xf0] sm:$0xff]  ;;  %v692_v16 = vld [vmem:[%s3835_s18 + $0xe8] sm:$0xff] }
  0x61   : > { %v630_v4 = vld [vmem:[%s3830_s15 + $0x2f8] sm:$0xff]  ;;  %v822_v5 = vadd.f32 %v694_v3, %v566_v2  ;;  %v821_v10 = vadd.f32 %v693_v8, %v565_v7  ;;  %v629_v11 = vld [vmem:[%s3830_s15 + $0x2f0] sm:$0xff]  ;;  %v628_v17 = vld [vmem:[%s3830_s15 + $0x2e8] sm:$0xff]  ;;  %v820_v21 = vadd.f32 %v692_v16, %v564_v13 }
  0x62   : > { %v758_v6 = vld [vmem:[%s3835_s18 + $0x2f8] sm:$0xff]  ;;  %v757_v12 = vld [vmem:[%s3835_s18 + $0x2f0] sm:$0xff]  ;;  %v756_v18 = vld [vmem:[%s3835_s18 + $0x2e8] sm:$0xff] }
  0x63   : > { %v886_v9 = vadd.f32 %v758_v6, %v630_v4  ;;  %v950_v14 = vmax.f32 %v822_v5, 0.0  ;;  %v885_v15 = vadd.f32 %v757_v12, %v629_v11  ;;  %v949_v20 = vmax.f32 %v821_v10, 0.0  ;;  %v563_v23 = vld [vmem:[%s3830_s15 + $0xe0] sm:$0xff]  ;;  %v562_v29 = vld [vmem:[%s3830_s15 + $0xd8] sm:$0xff]  ;;  %v561_v37 = vld [vmem:[%s3830_s15 + $0xd0] sm:$0xff] }
  0x64   : > { %v884_v22 = vadd.f32 %v756_v18, %v628_v17  ;;  %v691_v24 = vld [vmem:[%s3835_s18 + $0xe0] sm:$0xff]  ;;  %v690_v30 = vld [vmem:[%s3835_s18 + $0xd8] sm:$0xff]  ;;  %v948_v31 = vmax.f32 %v820_v21, 0.0  ;;  %v689_v40 = vld [vmem:[%s3835_s18 + $0xd0] sm:$0xff] }
  0x65   : > { %v1014_v19 = vmax.f32 %v886_v9, 0.0  ;;  %v627_v25 = vld [vmem:[%s3830_s15 + $0x2e0] sm:$0xff]  ;;  %1175 = vmatprep.subr.mxu0 %v950_v14  ;;  %v1013_v26 = vmax.f32 %v885_v15, 0.0  ;;  %v819_v27 = vadd.f32 %v691_v24, %v563_v23  ;;  %v818_v34 = vadd.f32 %v690_v30, %v562_v29  ;;  %v626_v35 = vld [vmem:[%s3830_s15 + $0x2d8] sm:$0xff]  ;;  %v625_v41 = vld [vmem:[%s3830_s15 + $0x2d0] sm:$0xff] }
  0x66   : > { %v755_v28 = vld [vmem:[%s3835_s18 + $0x2e0] sm:$0xff]  ;;  %1176 = vmatpush1.msra.mxu0 %v949_v20  ;;  %v1012_v32 = vmax.f32 %v884_v22, 0.0  ;;  %v754_v36 = vld [vmem:[%s3835_s18 + $0x2d8] sm:$0xff]  ;;  %v753_v42 = vld [vmem:[%s3835_s18 + $0x2d0] sm:$0xff]  ;;  %v817_v45 = vadd.f32 %v689_v40, %v561_v37 }
  0x67   : > { %1432 = vmatprep.subr.mxu1 %v1014_v19  ;;  %v883_v33 = vadd.f32 %v755_v28, %v627_v25  ;;  %v947_v38 = vmax.f32 %v819_v27, 0.0  ;;  %v882_v39 = vadd.f32 %v754_v36, %v626_v35  ;;  %1177 = vmatprep.subr.mxu0 %v948_v31  ;;  %v946_v44 = vmax.f32 %v818_v34, 0.0  ;;  %v560_v47 = vld [vmem:[%s3830_s15 + $0xc8] sm:$0xff]  ;;  %v559_v53 = vld [vmem:[%s3830_s15 + $0xc0] sm:$0xff]  ;;  %v558_v61 = vld [vmem:[%s3830_s15 + $0xb8] sm:$0xff] }
  0x68   : > { %1433 = vmatpush1.msra.mxu1 %v1013_v26  ;;  %v881_v46 = vadd.f32 %v753_v42, %v625_v41  ;;  %v688_v48 = vld [vmem:[%s3835_s18 + $0xc8] sm:$0xff]  ;;  %v687_v54 = vld [vmem:[%s3835_s18 + $0xc0] sm:$0xff]  ;;  %v945_v55 = vmax.f32 %v817_v45, 0.0  ;;  %v686_v0 = vld [vmem:[%s3835_s18 + $0xb8] sm:$0xff] }
  0x69   : > { %1434 = vmatprep.subr.mxu1 %v1012_v32  ;;  %v1011_v43 = vmax.f32 %v883_v33, 0.0  ;;  %v624_v49 = vld [vmem:[%s3830_s15 + $0x2c8] sm:$0xff]  ;;  %1178 = vmatpush1.msra.mxu0 %v947_v38  ;;  %v1010_v50 = vmax.f32 %v882_v39, 0.0  ;;  %v816_v51 = vadd.f32 %v688_v48, %v560_v47  ;;  %v815_v58 = vadd.f32 %v687_v54, %v559_v53  ;;  %v623_v59 = vld [vmem:[%s3830_s15 + $0x2c0] sm:$0xff]  ;;  %v622_v1 = vld [vmem:[%s3830_s15 + $0x2b8] sm:$0xff] }
  0x6a   : > { %v752_v52 = vld [vmem:[%s3835_s18 + $0x2c8] sm:$0xff]  ;;  %1179 = vmatprep.subr.mxu0 %v946_v44  ;;  %v1009_v56 = vmax.f32 %v881_v46, 0.0  ;;  %v751_v60 = vld [vmem:[%s3835_s18 + $0x2c0] sm:$0xff]  ;;  %v750_v2 = vld [vmem:[%s3835_s18 + $0x2b8] sm:$0xff]  ;;  %v814_v5 = vadd.f32 %v686_v0, %v558_v61 }
  0x6b   : > { %1435 = vmatpush1.msra.mxu1 %v1011_v43  ;;  %v880_v57 = vadd.f32 %v752_v52, %v624_v49  ;;  %v944_v62 = vmax.f32 %v816_v51, 0.0  ;;  %v879_v63 = vadd.f32 %v751_v60, %v623_v59  ;;  %1180 = vmatpush1.msra.mxu0 %v945_v55  ;;  %v943_v4 = vmax.f32 %v815_v58, 0.0  ;;  %v557_v7 = vld [vmem:[%s3830_s15 + $0xb0] sm:$0xff]  ;;  %v556_v13 = vld [vmem:[%s3830_s15 + $0xa8] sm:$0xff]  ;;  %v555_v21 = vld [vmem:[%s3830_s15 + $0xa0] sm:$0xff] }
  0x6c   : > { %1436 = vmatprep.subr.mxu1 %v1010_v50  ;;  %v878_v6 = vadd.f32 %v750_v2, %v622_v1  ;;  %v685_v8 = vld [vmem:[%s3835_s18 + $0xb0] sm:$0xff]  ;;  %v684_v14 = vld [vmem:[%s3835_s18 + $0xa8] sm:$0xff]  ;;  %v942_v15 = vmax.f32 %v814_v5, 0.0  ;;  %v683_v24 = vld [vmem:[%s3835_s18 + $0xa0] sm:$0xff] }
  0x6d   : > { %1437 = vmatpush1.msra.mxu1 %v1009_v56  ;;  %v1008_v3 = vmax.f32 %v880_v57, 0.0  ;;  %v621_v9 = vld [vmem:[%s3830_s15 + $0x2b0] sm:$0xff]  ;;  %1181 = vmatprep.subr.mxu0 %v944_v62  ;;  %v1007_v10 = vmax.f32 %v879_v63, 0.0  ;;  %v813_v11 = vadd.f32 %v685_v8, %v557_v7  ;;  %v812_v18 = vadd.f32 %v684_v14, %v556_v13  ;;  %v620_v19 = vld [vmem:[%s3830_s15 + $0x2a8] sm:$0xff]  ;;  %v619_v25 = vld [vmem:[%s3830_s15 + $0x2a0] sm:$0xff] }
  0x6e   : > { %v749_v12 = vld [vmem:[%s3835_s18 + $0x2b0] sm:$0xff]  ;;  %1182 = vmatpush1.msra.mxu0 %v943_v4  ;;  %v1006_v16 = vmax.f32 %v878_v6, 0.0  ;;  %v748_v20 = vld [vmem:[%s3835_s18 + $0x2a8] sm:$0xff]  ;;  %v747_v26 = vld [vmem:[%s3835_s18 + $0x2a0] sm:$0xff]  ;;  %v811_v29 = vadd.f32 %v683_v24, %v555_v21 }
  0x6f   : > { %1438 = vmatprep.subr.mxu1 %v1008_v3  ;;  %v877_v17 = vadd.f32 %v749_v12, %v621_v9  ;;  %v941_v22 = vmax.f32 %v813_v11, 0.0  ;;  %v876_v23 = vadd.f32 %v748_v20, %v620_v19  ;;  %1183 = vmatprep.subr.mxu0 %v942_v15  ;;  %v940_v28 = vmax.f32 %v812_v18, 0.0  ;;  %v554_v31 = vld [vmem:[%s3830_s15 + $0x98] sm:$0xff]  ;;  %v553_v37 = vld [vmem:[%s3830_s15 + $0x90] sm:$0xff]  ;;  %v552_v45 = vld [vmem:[%s3830_s15 + $0x88] sm:$0xff] }
  0x70   : > { %1439 = vmatpush1.msra.mxu1 %v1007_v10  ;;  %v875_v30 = vadd.f32 %v747_v26, %v619_v25  ;;  %v682_v32 = vld [vmem:[%s3835_s18 + $0x98] sm:$0xff]  ;;  %v681_v38 = vld [vmem:[%s3835_s18 + $0x90] sm:$0xff]  ;;  %v939_v39 = vmax.f32 %v811_v29, 0.0  ;;  %v680_v48 = vld [vmem:[%s3835_s18 + $0x88] sm:$0xff] }
  0x71   : > { %1440 = vmatprep.subr.mxu1 %v1006_v16  ;;  %v1005_v27 = vmax.f32 %v877_v17, 0.0  ;;  %v618_v33 = vld [vmem:[%s3830_s15 + $0x298] sm:$0xff]  ;;  %1184 = vmatpush1.msra.mxu0 %v941_v22  ;;  %v1004_v34 = vmax.f32 %v876_v23, 0.0  ;;  %v810_v35 = vadd.f32 %v682_v32, %v554_v31  ;;  %v809_v42 = vadd.f32 %v681_v38, %v553_v37  ;;  %v617_v43 = vld [vmem:[%s3830_s15 + $0x290] sm:$0xff]  ;;  %v616_v49 = vld [vmem:[%s3830_s15 + $0x288] sm:$0xff] }
  0x72   : > { %v746_v36 = vld [vmem:[%s3835_s18 + $0x298] sm:$0xff]  ;;  %1185 = vmatprep.subr.mxu0 %v940_v28  ;;  %v1003_v40 = vmax.f32 %v875_v30, 0.0  ;;  %v745_v44 = vld [vmem:[%s3835_s18 + $0x290] sm:$0xff]  ;;  %v744_v50 = vld [vmem:[%s3835_s18 + $0x288] sm:$0xff]  ;;  %v808_v53 = vadd.f32 %v680_v48, %v552_v45 }
  0x73   : > { %1441 = vmatpush1.msra.mxu1 %v1005_v27  ;;  %v874_v41 = vadd.f32 %v746_v36, %v618_v33  ;;  %v938_v46 = vmax.f32 %v810_v35, 0.0  ;;  %v873_v47 = vadd.f32 %v745_v44, %v617_v43  ;;  %1186 = vmatpush1.msra.mxu0 %v939_v39  ;;  %v937_v52 = vmax.f32 %v809_v42, 0.0  ;;  %v551_v55 = vld [vmem:[%s3830_s15 + $0x80] sm:$0xff]  ;;  %v550_v61 = vld [vmem:[%s3830_s15 + $0x78] sm:$0xff]  ;;  %v549_v5 = vld [vmem:[%s3830_s15 + $0x70] sm:$0xff] }
  0x74   : > { %1442 = vmatprep.subr.mxu1 %v1004_v34  ;;  %v872_v54 = vadd.f32 %v744_v50, %v616_v49  ;;  %v679_v56 = vld [vmem:[%s3835_s18 + $0x80] sm:$0xff]  ;;  %v678_v62 = vld [vmem:[%s3835_s18 + $0x78] sm:$0xff]  ;;  %v936_v63 = vmax.f32 %v808_v53, 0.0  ;;  %v677_v8 = vld [vmem:[%s3835_s18 + $0x70] sm:$0xff] }
  0x75   : > { %1443 = vmatpush1.msra.mxu1 %v1003_v40  ;;  %v1002_v51 = vmax.f32 %v874_v41, 0.0  ;;  %v615_v57 = vld [vmem:[%s3830_s15 + $0x280] sm:$0xff]  ;;  %1187 = vmatprep.subr.mxu0 %v938_v46  ;;  %v1001_v58 = vmax.f32 %v873_v47, 0.0  ;;  %v807_v59 = vadd.f32 %v679_v56, %v551_v55  ;;  %v806_v2 = vadd.f32 %v678_v62, %v550_v61  ;;  %v614_v3 = vld [vmem:[%s3830_s15 + $0x278] sm:$0xff]  ;;  %v613_v9 = vld [vmem:[%s3830_s15 + $0x270] sm:$0xff] }
  0x76   : > { %v743_v60 = vld [vmem:[%s3835_s18 + $0x280] sm:$0xff]  ;;  %1188 = vmatpush1.msra.mxu0 %v937_v52  ;;  %v1000_v0 = vmax.f32 %v872_v54, 0.0  ;;  %v742_v4 = vld [vmem:[%s3835_s18 + $0x278] sm:$0xff]  ;;  %v741_v10 = vld [vmem:[%s3835_s18 + $0x270] sm:$0xff]  ;;  %v805_v13 = vadd.f32 %v677_v8, %v549_v5 }
  0x77   : > { %1444 = vmatprep.subr.mxu1 %v1002_v51  ;;  %v871_v1 = vadd.f32 %v743_v60, %v615_v57  ;;  %v935_v6 = vmax.f32 %v807_v59, 0.0  ;;  %v870_v7 = vadd.f32 %v742_v4, %v614_v3  ;;  %1189 = vmatprep.subr.mxu0 %v936_v63  ;;  %v934_v12 = vmax.f32 %v806_v2, 0.0  ;;  %v548_v15 = vld [vmem:[%s3830_s15 + $0x68] sm:$0xff]  ;;  %v547_v21 = vld [vmem:[%s3830_s15 + $0x60] sm:$0xff]  ;;  %v546_v29 = vld [vmem:[%s3830_s15 + $0x58] sm:$0xff] }
  0x78   : > { %1445 = vmatpush1.msra.mxu1 %v1001_v58  ;;  %v869_v14 = vadd.f32 %v741_v10, %v613_v9  ;;  %v676_v16 = vld [vmem:[%s3835_s18 + $0x68] sm:$0xff]  ;;  %v675_v22 = vld [vmem:[%s3835_s18 + $0x60] sm:$0xff]  ;;  %v933_v23 = vmax.f32 %v805_v13, 0.0  ;;  %v674_v32 = vld [vmem:[%s3835_s18 + $0x58] sm:$0xff] }
  0x79   : > { %1446 = vmatprep.subr.mxu1 %v1000_v0  ;;  %v999_v11 = vmax.f32 %v871_v1, 0.0  ;;  %v612_v17 = vld [vmem:[%s3830_s15 + $0x268] sm:$0xff]  ;;  %1190 = vmatpush1.msra.mxu0 %v935_v6  ;;  %v998_v18 = vmax.f32 %v870_v7, 0.0  ;;  %v804_v19 = vadd.f32 %v676_v16, %v548_v15  ;;  %v803_v26 = vadd.f32 %v675_v22, %v547_v21  ;;  %v611_v27 = vld [vmem:[%s3830_s15 + $0x260] sm:$0xff]  ;;  %v610_v33 = vld [vmem:[%s3830_s15 + $0x258] sm:$0xff] }
  0x7a   : > { %v740_v20 = vld [vmem:[%s3835_s18 + $0x268] sm:$0xff]  ;;  %1191 = vmatprep.subr.mxu0 %v934_v12  ;;  %v997_v24 = vmax.f32 %v869_v14, 0.0  ;;  %v739_v28 = vld [vmem:[%s3835_s18 + $0x260] sm:$0xff]  ;;  %v738_v34 = vld [vmem:[%s3835_s18 + $0x258] sm:$0xff]  ;;  %v802_v37 = vadd.f32 %v674_v32, %v546_v29 }
  0x7b   : > { %1447 = vmatpush1.msra.mxu1 %v999_v11  ;;  %v868_v25 = vadd.f32 %v740_v20, %v612_v17  ;;  %v932_v30 = vmax.f32 %v804_v19, 0.0  ;;  %v867_v31 = vadd.f32 %v739_v28, %v611_v27  ;;  %1192 = vmatpush1.msra.mxu0 %v933_v23  ;;  %v931_v36 = vmax.f32 %v803_v26, 0.0  ;;  %v545_v39 = vld [vmem:[%s3830_s15 + $0x50] sm:$0xff]  ;;  %v544_v45 = vld [vmem:[%s3830_s15 + $0x48] sm:$0xff]  ;;  %v543_v53 = vld [vmem:[%s3830_s15 + $0x40] sm:$0xff] }
  0x7c   : > { %1448 = vmatprep.subr.mxu1 %v998_v18  ;;  %v866_v38 = vadd.f32 %v738_v34, %v610_v33  ;;  %v673_v40 = vld [vmem:[%s3835_s18 + $0x50] sm:$0xff]  ;;  %v672_v46 = vld [vmem:[%s3835_s18 + $0x48] sm:$0xff]  ;;  %v930_v47 = vmax.f32 %v802_v37, 0.0  ;;  %v671_v56 = vld [vmem:[%s3835_s18 + $0x40] sm:$0xff] }
  0x7d   : > { %1449 = vmatpush1.msra.mxu1 %v997_v24  ;;  %v996_v35 = vmax.f32 %v868_v25, 0.0  ;;  %v609_v41 = vld [vmem:[%s3830_s15 + $0x250] sm:$0xff]  ;;  %1193 = vmatprep.subr.mxu0 %v932_v30  ;;  %v995_v42 = vmax.f32 %v867_v31, 0.0  ;;  %v801_v43 = vadd.f32 %v673_v40, %v545_v39  ;;  %v800_v50 = vadd.f32 %v672_v46, %v544_v45  ;;  %v608_v51 = vld [vmem:[%s3830_s15 + $0x248] sm:$0xff]  ;;  %v607_v57 = vld [vmem:[%s3830_s15 + $0x240] sm:$0xff] }
  0x7e   : > { %v737_v44 = vld [vmem:[%s3835_s18 + $0x250] sm:$0xff]  ;;  %1194 = vmatpush1.msra.mxu0 %v931_v36  ;;  %v994_v48 = vmax.f32 %v866_v38, 0.0  ;;  %v736_v52 = vld [vmem:[%s3835_s18 + $0x248] sm:$0xff]  ;;  %v735_v58 = vld [vmem:[%s3835_s18 + $0x240] sm:$0xff]  ;;  %v799_v61 = vadd.f32 %v671_v56, %v543_v53 }
  0x7f   : > { %1450 = vmatprep.subr.mxu1 %v996_v35  ;;  %v865_v49 = vadd.f32 %v737_v44, %v609_v41  ;;  %v929_v54 = vmax.f32 %v801_v43, 0.0  ;;  %v864_v55 = vadd.f32 %v736_v52, %v608_v51  ;;  %1195 = vmatprep.subr.mxu0 %v930_v47  ;;  %v928_v60 = vmax.f32 %v800_v50, 0.0  ;;  %v542_v63 = vld [vmem:[%s3830_s15 + $0x38] sm:$0xff]  ;;  %v541_v5 = vld [vmem:[%s3830_s15 + $0x30] sm:$0xff]  ;;  %v540_v13 = vld [vmem:[%s3830_s15 + $0x28] sm:$0xff] }
  0x80   : > { %1451 = vmatpush1.msra.mxu1 %v995_v42  ;;  %v863_v62 = vadd.f32 %v735_v58, %v607_v57  ;;  %v670_v0 = vld [vmem:[%s3835_s18 + $0x38] sm:$0xff]  ;;  %v669_v6 = vld [vmem:[%s3835_s18 + $0x30] sm:$0xff]  ;;  %v927_v7 = vmax.f32 %v799_v61, 0.0  ;;  %v668_v16 = vld [vmem:[%s3835_s18 + $0x28] sm:$0xff] }
  0x81   : > { %1452 = vmatprep.subr.mxu1 %v994_v48  ;;  %v993_v59 = vmax.f32 %v865_v49, 0.0  ;;  %v606_v1 = vld [vmem:[%s3830_s15 + $0x238] sm:$0xff]  ;;  %1196 = vmatpush1.msra.mxu0 %v929_v54  ;;  %v992_v2 = vmax.f32 %v864_v55, 0.0  ;;  %v798_v3 = vadd.f32 %v670_v0, %v542_v63  ;;  %v797_v10 = vadd.f32 %v669_v6, %v541_v5  ;;  %v605_v11 = vld [vmem:[%s3830_s15 + $0x230] sm:$0xff]  ;;  %v604_v17 = vld [vmem:[%s3830_s15 + $0x228] sm:$0xff] }
  0x82   : > { %v734_v4 = vld [vmem:[%s3835_s18 + $0x238] sm:$0xff]  ;;  %1197 = vmatprep.subr.mxu0 %v928_v60  ;;  %v991_v8 = vmax.f32 %v863_v62, 0.0  ;;  %v733_v12 = vld [vmem:[%s3835_s18 + $0x230] sm:$0xff]  ;;  %v732_v18 = vld [vmem:[%s3835_s18 + $0x228] sm:$0xff]  ;;  %v796_v21 = vadd.f32 %v668_v16, %v540_v13 }
  0x83   : > { %1453 = vmatpush1.msra.mxu1 %v993_v59  ;;  %v862_v9 = vadd.f32 %v734_v4, %v606_v1  ;;  %v926_v14 = vmax.f32 %v798_v3, 0.0  ;;  %v861_v15 = vadd.f32 %v733_v12, %v605_v11  ;;  %1198 = vmatpush1.msra.mxu0 %v927_v7  ;;  %v925_v20 = vmax.f32 %v797_v10, 0.0  ;;  %v539_v23 = vld [vmem:[%s3830_s15 + $0x20] sm:$0xff]  ;;  %v538_v29 = vld [vmem:[%s3830_s15 + $0x18] sm:$0xff]  ;;  %v537_v37 = vld [vmem:[%s3830_s15 + $0x10] sm:$0xff] }
  0x84   : > { %1454 = vmatprep.subr.mxu1 %v992_v2  ;;  %v860_v22 = vadd.f32 %v732_v18, %v604_v17  ;;  %v667_v24 = vld [vmem:[%s3835_s18 + $0x20] sm:$0xff]  ;;  %v666_v30 = vld [vmem:[%s3835_s18 + $0x18] sm:$0xff]  ;;  %v924_v31 = vmax.f32 %v796_v21, 0.0  ;;  %v665_v40 = vld [vmem:[%s3835_s18 + $0x10] sm:$0xff] }
  0x85   : > { %1455 = vmatpush1.msra.mxu1 %v991_v8  ;;  %v990_v19 = vmax.f32 %v862_v9, 0.0  ;;  %v603_v25 = vld [vmem:[%s3830_s15 + $0x220] sm:$0xff]  ;;  %1199 = vmatprep.subr.mxu0 %v926_v14  ;;  %v989_v26 = vmax.f32 %v861_v15, 0.0  ;;  %v795_v27 = vadd.f32 %v667_v24, %v539_v23  ;;  %v794_v34 = vadd.f32 %v666_v30, %v538_v29  ;;  %v602_v35 = vld [vmem:[%s3830_s15 + $0x218] sm:$0xff]  ;;  %v601_v41 = vld [vmem:[%s3830_s15 + $0x210] sm:$0xff] }
  0x86   : > { %v731_v28 = vld [vmem:[%s3835_s18 + $0x220] sm:$0xff]  ;;  %1200 = vmatpush1.msra.mxu0 %v925_v20  ;;  %v988_v32 = vmax.f32 %v860_v22, 0.0  ;;  %v730_v36 = vld [vmem:[%s3835_s18 + $0x218] sm:$0xff]  ;;  %v729_v42 = vld [vmem:[%s3835_s18 + $0x210] sm:$0xff]  ;;  %v793_v45 = vadd.f32 %v665_v40, %v537_v37 }
  0x87   : > { %1456 = vmatprep.subr.mxu1 %v990_v19  ;;  %v859_v33 = vadd.f32 %v731_v28, %v603_v25  ;;  %v923_v38 = vmax.f32 %v795_v27, 0.0  ;;  %v858_v39 = vadd.f32 %v730_v36, %v602_v35  ;;  %1201 = vmatprep.subr.mxu0 %v924_v31  ;;  %v922_v44 = vmax.f32 %v794_v34, 0.0  ;;  %v536_v47 = vld [vmem:[%s3830_s15 + $0x8] sm:$0xff]  ;;  %v535_v53 = vld [vmem:[%s3830_s15] sm:$0xff]  ;;  %v598_v61 = vld [vmem:[%s3830_s15 + $0x1f8] sm:$0xff] }
  0x88   : > { %1457 = vmatpush1.msra.mxu1 %v989_v26  ;;  %v857_v46 = vadd.f32 %v729_v42, %v601_v41  ;;  %v664_v48 = vld [vmem:[%s3835_s18 + $0x8] sm:$0xff]  ;;  %v663_v54 = vld [vmem:[%s3835_s18] sm:$0xff]  ;;  %v921_v55 = vmax.f32 %v793_v45, 0.0  ;;  %v726_v0 = vld [vmem:[%s3835_s18 + $0x1f8] sm:$0xff] }
  0x89   : > { %1458 = vmatprep.subr.mxu1 %v988_v32  ;;  %v987_v43 = vmax.f32 %v859_v33, 0.0  ;;  %v600_v49 = vld [vmem:[%s3830_s15 + $0x208] sm:$0xff]  ;;  %1202 = vmatpush1.msra.mxu0 %v923_v38  ;;  %v986_v50 = vmax.f32 %v858_v39, 0.0  ;;  %v792_v51 = vadd.f32 %v664_v48, %v536_v47  ;;  %v791_v58 = vadd.f32 %v663_v54, %v535_v53  ;;  %v599_v59 = vld [vmem:[%s3830_s15 + $0x200] sm:$0xff]  ;;  %v662_v1 = vld [vmem:[%s3830_s15 + $0x3f8] sm:$0xff] }
  0x8a   : > { %v728_v52 = vld [vmem:[%s3835_s18 + $0x208] sm:$0xff]  ;;  %1203 = vmatprep.subr.mxu0 %v922_v44  ;;  %v985_v56 = vmax.f32 %v857_v46, 0.0  ;;  %v727_v60 = vld [vmem:[%s3835_s18 + $0x200] sm:$0xff]  ;;  %v790_v2 = vld [vmem:[%s3835_s18 + $0x3f8] sm:$0xff]  ;;  %v854_v5 = vadd.f32 %v726_v0, %v598_v61 }
  0x8b   : > { %1459 = vmatpush1.msra.mxu1 %v987_v43  ;;  %v856_v57 = vadd.f32 %v728_v52, %v600_v49  ;;  %v920_v62 = vmax.f32 %v792_v51, 0.0  ;;  %v855_v63 = vadd.f32 %v727_v60, %v599_v59  ;;  %1204 = vmatpush1.msra.mxu0 %v921_v55  ;;  %v919_v4 = vmax.f32 %v791_v58, 0.0  ;;  %v597_v7 = vld [vmem:[%s3830_s15 + $0x1f0] sm:$0xff]  ;;  %v596_v13 = vld [vmem:[%s3830_s15 + $0x1e8] sm:$0xff]  ;;  %v595_v21 = vld [vmem:[%s3830_s15 + $0x1e0] sm:$0xff] }
  0x8c   : > { %1460 = vmatprep.subr.mxu1 %v986_v50  ;;  %v918_v6 = vadd.f32 %v790_v2, %v662_v1  ;;  %v725_v8 = vld [vmem:[%s3835_s18 + $0x1f0] sm:$0xff]  ;;  %v724_v14 = vld [vmem:[%s3835_s18 + $0x1e8] sm:$0xff]  ;;  %v982_v15 = vmax.f32 %v854_v5, 0.0  ;;  %v723_v24 = vld [vmem:[%s3835_s18 + $0x1e0] sm:$0xff] }
  0x8d   : > { %1461 = vmatpush1.msra.mxu1 %v985_v56  ;;  %v984_v3 = vmax.f32 %v856_v57, 0.0  ;;  %v661_v9 = vld [vmem:[%s3830_s15 + $0x3f0] sm:$0xff]  ;;  %1205 = vmatprep.subr.mxu0 %v920_v62  ;;  %v983_v10 = vmax.f32 %v855_v63, 0.0  ;;  %v853_v11 = vadd.f32 %v725_v8, %v597_v7  ;;  %v852_v18 = vadd.f32 %v724_v14, %v596_v13  ;;  %v660_v19 = vld [vmem:[%s3830_s15 + $0x3e8] sm:$0xff]  ;;  %v659_v25 = vld [vmem:[%s3830_s15 + $0x3e0] sm:$0xff] }
  0x8e   : > { %v789_v12 = vld [vmem:[%s3835_s18 + $0x3f0] sm:$0xff]  ;;  %1206 = vmatpush1.msra.mxu0 %v919_v4  ;;  %v1046_v16 = vmax.f32 %v918_v6, 0.0  ;;  %v788_v20 = vld [vmem:[%s3835_s18 + $0x3e8] sm:$0xff]  ;;  %v787_v26 = vld [vmem:[%s3835_s18 + $0x3e0] sm:$0xff]  ;;  %v851_v29 = vadd.f32 %v723_v24, %v595_v21 }
  0x8f   : > { %1462 = vmatprep.subr.mxu1 %v984_v3  ;;  %v917_v17 = vadd.f32 %v789_v12, %v661_v9  ;;  %v981_v22 = vmax.f32 %v853_v11, 0.0  ;;  %v916_v23 = vadd.f32 %v788_v20, %v660_v19  ;;  %1207 = vmatprep.subr.mxu0 %v982_v15  ;;  %v980_v28 = vmax.f32 %v852_v18, 0.0  ;;  %v594_v31 = vld [vmem:[%s3830_s15 + $0x1d8] sm:$0xff]  ;;  %v593_v37 = vld [vmem:[%s3830_s15 + $0x1d0] sm:$0xff]  ;;  %v592_v45 = vld [vmem:[%s3830_s15 + $0x1c8] sm:$0xff] }
  0x90   : > { %1463 = vmatpush1.msra.mxu1 %v983_v10  ;;  %v915_v30 = vadd.f32 %v787_v26, %v659_v25  ;;  %v722_v32 = vld [vmem:[%s3835_s18 + $0x1d8] sm:$0xff]  ;;  %v721_v38 = vld [vmem:[%s3835_s18 + $0x1d0] sm:$0xff]  ;;  %v979_v39 = vmax.f32 %v851_v29, 0.0  ;;  %v720_v48 = vld [vmem:[%s3835_s18 + $0x1c8] sm:$0xff] }
  0x91   : > { %1464 = vmatprep.subr.mxu1 %v1046_v16  ;;  %v1045_v27 = vmax.f32 %v917_v17, 0.0  ;;  %v658_v33 = vld [vmem:[%s3830_s15 + $0x3d8] sm:$0xff]  ;;  %1208 = vmatpush2.msra.mxu0 %v981_v22  ;;  %v1044_v34 = vmax.f32 %v916_v23, 0.0  ;;  %v850_v35 = vadd.f32 %v722_v32, %v594_v31  ;;  %v849_v42 = vadd.f32 %v721_v38, %v593_v37  ;;  %v657_v43 = vld [vmem:[%s3830_s15 + $0x3d0] sm:$0xff]  ;;  %v656_v49 = vld [vmem:[%s3830_s15 + $0x3c8] sm:$0xff] }
  0x92   : > { %v786_v36 = vld [vmem:[%s3835_s18 + $0x3d8] sm:$0xff]  ;;  %1209 = vmatprep.subr.mxu0 %v980_v28  ;;  %v1043_v40 = vmax.f32 %v915_v30, 0.0  ;;  %v785_v44 = vld [vmem:[%s3835_s18 + $0x3d0] sm:$0xff]  ;;  %v784_v50 = vld [vmem:[%s3835_s18 + $0x3c8] sm:$0xff]  ;;  %v848_v53 = vadd.f32 %v720_v48, %v592_v45 }
  0x93   : > { %1465 = vmatpush2.msra.mxu1 %v1045_v27  ;;  %v914_v41 = vadd.f32 %v786_v36, %v658_v33  ;;  %v978_v46 = vmax.f32 %v850_v35, 0.0  ;;  %v913_v47 = vadd.f32 %v785_v44, %v657_v43  ;;  %1210 = vmatpush2.msra.mxu0 %v979_v39  ;;  %v977_v52 = vmax.f32 %v849_v42, 0.0  ;;  %v591_v55 = vld [vmem:[%s3830_s15 + $0x1c0] sm:$0xff]  ;;  %v590_v61 = vld [vmem:[%s3830_s15 + $0x1b8] sm:$0xff]  ;;  %v589_v5 = vld [vmem:[%s3830_s15 + $0x1b0] sm:$0xff] }
  0x94   : > { %1466 = vmatprep.subr.mxu1 %v1044_v34  ;;  %v912_v54 = vadd.f32 %v784_v50, %v656_v49  ;;  %v719_v56 = vld [vmem:[%s3835_s18 + $0x1c0] sm:$0xff]  ;;  %v718_v62 = vld [vmem:[%s3835_s18 + $0x1b8] sm:$0xff]  ;;  %v976_v63 = vmax.f32 %v848_v53, 0.0  ;;  %v717_v8 = vld [vmem:[%s3835_s18 + $0x1b0] sm:$0xff] }
  0x95   : > { %1467 = vmatpush2.msra.mxu1 %v1043_v40  ;;  %v1042_v51 = vmax.f32 %v914_v41, 0.0  ;;  %v655_v57 = vld [vmem:[%s3830_s15 + $0x3c0] sm:$0xff]  ;;  %1211 = vmatprep.subr.mxu0 %v978_v46  ;;  %v1041_v58 = vmax.f32 %v913_v47, 0.0  ;;  %v847_v59 = vadd.f32 %v719_v56, %v591_v55  ;;  %v846_v2 = vadd.f32 %v718_v62, %v590_v61  ;;  %v654_v3 = vld [vmem:[%s3830_s15 + $0x3b8] sm:$0xff]  ;;  %v653_v9 = vld [vmem:[%s3830_s15 + $0x3b0] sm:$0xff] }
  0x96   : > { %v783_v60 = vld [vmem:[%s3835_s18 + $0x3c0] sm:$0xff]  ;;  %1212 = vmatpush2.msra.mxu0 %v977_v52  ;;  %v1040_v0 = vmax.f32 %v912_v54, 0.0  ;;  %v782_v4 = vld [vmem:[%s3835_s18 + $0x3b8] sm:$0xff]  ;;  %v781_v10 = vld [vmem:[%s3835_s18 + $0x3b0] sm:$0xff]  ;;  %v845_v13 = vadd.f32 %v717_v8, %v589_v5 }
  0x97   : > { %1468 = vmatprep.subr.mxu1 %v1042_v51  ;;  %v911_v1 = vadd.f32 %v783_v60, %v655_v57  ;;  %v975_v6 = vmax.f32 %v847_v59, 0.0  ;;  %v910_v7 = vadd.f32 %v782_v4, %v654_v3  ;;  %1213 = vmatprep.subr.mxu0 %v976_v63  ;;  %v974_v12 = vmax.f32 %v846_v2, 0.0  ;;  %v588_v15 = vld [vmem:[%s3830_s15 + $0x1a8] sm:$0xff]  ;;  %v587_v21 = vld [vmem:[%s3830_s15 + $0x1a0] sm:$0xff]  ;;  %v586_v29 = vld [vmem:[%s3830_s15 + $0x198] sm:$0xff] }
  0x98   : > { %1469 = vmatpush2.msra.mxu1 %v1041_v58  ;;  %v909_v14 = vadd.f32 %v781_v10, %v653_v9  ;;  %v716_v16 = vld [vmem:[%s3835_s18 + $0x1a8] sm:$0xff]  ;;  %v715_v22 = vld [vmem:[%s3835_s18 + $0x1a0] sm:$0xff]  ;;  %v973_v23 = vmax.f32 %v845_v13, 0.0  ;;  %v714_v32 = vld [vmem:[%s3835_s18 + $0x198] sm:$0xff] }
  0x99   : > { %1470 = vmatprep.subr.mxu1 %v1040_v0  ;;  %v1039_v11 = vmax.f32 %v911_v1, 0.0  ;;  %v652_v17 = vld [vmem:[%s3830_s15 + $0x3a8] sm:$0xff]  ;;  %1214 = vmatpush2.msra.mxu0 %v975_v6  ;;  %v1038_v18 = vmax.f32 %v910_v7, 0.0  ;;  %v844_v19 = vadd.f32 %v716_v16, %v588_v15  ;;  %v843_v26 = vadd.f32 %v715_v22, %v587_v21  ;;  %v651_v27 = vld [vmem:[%s3830_s15 + $0x3a0] sm:$0xff]  ;;  %v650_v33 = vld [vmem:[%s3830_s15 + $0x398] sm:$0xff] }
  0x9a   : > { %v780_v20 = vld [vmem:[%s3835_s18 + $0x3a8] sm:$0xff]  ;;  %1215 = vmatprep.subr.mxu0 %v974_v12  ;;  %v1037_v24 = vmax.f32 %v909_v14, 0.0  ;;  %v779_v28 = vld [vmem:[%s3835_s18 + $0x3a0] sm:$0xff]  ;;  %v778_v34 = vld [vmem:[%s3835_s18 + $0x398] sm:$0xff]  ;;  %v842_v37 = vadd.f32 %v714_v32, %v586_v29 }
  0x9b   : > { %1471 = vmatpush2.msra.mxu1 %v1039_v11  ;;  %v908_v25 = vadd.f32 %v780_v20, %v652_v17  ;;  %v972_v30 = vmax.f32 %v844_v19, 0.0  ;;  %v907_v31 = vadd.f32 %v779_v28, %v651_v27  ;;  %1216 = vmatpush2.msra.mxu0 %v973_v23  ;;  %v971_v36 = vmax.f32 %v843_v26, 0.0  ;;  %v585_v39 = vld [vmem:[%s3830_s15 + $0x190] sm:$0xff]  ;;  %v584_v45 = vld [vmem:[%s3830_s15 + $0x188] sm:$0xff]  ;;  %v583_v53 = vld [vmem:[%s3830_s15 + $0x180] sm:$0xff] }
  0x9c   : > { %1472 = vmatprep.subr.mxu1 %v1038_v18  ;;  %v906_v38 = vadd.f32 %v778_v34, %v650_v33  ;;  %v713_v40 = vld [vmem:[%s3835_s18 + $0x190] sm:$0xff]  ;;  %v712_v46 = vld [vmem:[%s3835_s18 + $0x188] sm:$0xff]  ;;  %v970_v47 = vmax.f32 %v842_v37, 0.0  ;;  %v711_v56 = vld [vmem:[%s3835_s18 + $0x180] sm:$0xff] }
  0x9d   : > { %1473 = vmatpush2.msra.mxu1 %v1037_v24  ;;  %v1036_v35 = vmax.f32 %v908_v25, 0.0  ;;  %v649_v41 = vld [vmem:[%s3830_s15 + $0x390] sm:$0xff]  ;;  %1217 = vmatprep.subr.mxu0 %v972_v30  ;;  %v1035_v42 = vmax.f32 %v907_v31, 0.0  ;;  %v841_v43 = vadd.f32 %v713_v40, %v585_v39  ;;  %v840_v50 = vadd.f32 %v712_v46, %v584_v45  ;;  %v648_v51 = vld [vmem:[%s3830_s15 + $0x388] sm:$0xff]  ;;  %v647_v57 = vld [vmem:[%s3830_s15 + $0x380] sm:$0xff] }
  0x9e   : > { %v777_v44 = vld [vmem:[%s3835_s18 + $0x390] sm:$0xff]  ;;  %1218 = vmatpush2.msra.mxu0 %v971_v36  ;;  %v1034_v48 = vmax.f32 %v906_v38, 0.0  ;;  %v776_v52 = vld [vmem:[%s3835_s18 + $0x388] sm:$0xff]  ;;  %v775_v58 = vld [vmem:[%s3835_s18 + $0x380] sm:$0xff]  ;;  %v839_v61 = vadd.f32 %v711_v56, %v583_v53 }
  0x9f   : > { %1474 = vmatprep.subr.mxu1 %v1036_v35  ;;  %v905_v49 = vadd.f32 %v777_v44, %v649_v41  ;;  %v969_v54 = vmax.f32 %v841_v43, 0.0  ;;  %v904_v55 = vadd.f32 %v776_v52, %v648_v51  ;;  %1219 = vmatprep.subr.mxu0 %v970_v47  ;;  %v968_v60 = vmax.f32 %v840_v50, 0.0  ;;  %v582_v63 = vld [vmem:[%s3830_s15 + $0x178] sm:$0xff]  ;;  %v581_v5 = vld [vmem:[%s3830_s15 + $0x170] sm:$0xff]  ;;  %v580_v13 = vld [vmem:[%s3830_s15 + $0x168] sm:$0xff] }
  0xa0   : > { %1475 = vmatpush2.msra.mxu1 %v1035_v42  ;;  %v903_v62 = vadd.f32 %v775_v58, %v647_v57  ;;  %v710_v0 = vld [vmem:[%s3835_s18 + $0x178] sm:$0xff]  ;;  %v709_v6 = vld [vmem:[%s3835_s18 + $0x170] sm:$0xff]  ;;  %v967_v7 = vmax.f32 %v839_v61, 0.0  ;;  %v708_v16 = vld [vmem:[%s3835_s18 + $0x168] sm:$0xff] }
  0xa1   : > { %1476 = vmatprep.subr.mxu1 %v1034_v48  ;;  %v1033_v59 = vmax.f32 %v905_v49, 0.0  ;;  %v646_v1 = vld [vmem:[%s3830_s15 + $0x378] sm:$0xff]  ;;  %1220 = vmatpush2.msra.mxu0 %v969_v54  ;;  %v1032_v2 = vmax.f32 %v904_v55, 0.0  ;;  %v838_v3 = vadd.f32 %v710_v0, %v582_v63  ;;  %v837_v10 = vadd.f32 %v709_v6, %v581_v5  ;;  %v645_v11 = vld [vmem:[%s3830_s15 + $0x370] sm:$0xff]  ;;  %v644_v17 = vld [vmem:[%s3830_s15 + $0x368] sm:$0xff] }
  0xa2   : > { %v774_v4 = vld [vmem:[%s3835_s18 + $0x378] sm:$0xff]  ;;  %1221 = vmatprep.subr.mxu0 %v968_v60  ;;  %v1031_v8 = vmax.f32 %v903_v62, 0.0  ;;  %v773_v12 = vld [vmem:[%s3835_s18 + $0x370] sm:$0xff]  ;;  %v772_v18 = vld [vmem:[%s3835_s18 + $0x368] sm:$0xff]  ;;  %v836_v21 = vadd.f32 %v708_v16, %v580_v13 }
  0xa3   : > { %1477 = vmatpush2.msra.mxu1 %v1033_v59  ;;  %v902_v9 = vadd.f32 %v774_v4, %v646_v1  ;;  %v966_v14 = vmax.f32 %v838_v3, 0.0  ;;  %v901_v15 = vadd.f32 %v773_v12, %v645_v11  ;;  %1222 = vmatpush2.msra.mxu0 %v967_v7  ;;  %v965_v20 = vmax.f32 %v837_v10, 0.0  ;;  %v579_v23 = vld [vmem:[%s3830_s15 + $0x160] sm:$0xff]  ;;  %v578_v29 = vld [vmem:[%s3830_s15 + $0x158] sm:$0xff]  ;;  %v577_v37 = vld [vmem:[%s3830_s15 + $0x150] sm:$0xff] }
  0xa4   : > { %1478 = vmatprep.subr.mxu1 %v1032_v2  ;;  %v900_v22 = vadd.f32 %v772_v18, %v644_v17  ;;  %v707_v24 = vld [vmem:[%s3835_s18 + $0x160] sm:$0xff]  ;;  %v706_v30 = vld [vmem:[%s3835_s18 + $0x158] sm:$0xff]  ;;  %v964_v31 = vmax.f32 %v836_v21, 0.0  ;;  %v705_v40 = vld [vmem:[%s3835_s18 + $0x150] sm:$0xff] }
  0xa5   : > { %1479 = vmatpush2.msra.mxu1 %v1031_v8  ;;  %v1030_v19 = vmax.f32 %v902_v9, 0.0  ;;  %v643_v25 = vld [vmem:[%s3830_s15 + $0x360] sm:$0xff]  ;;  %1223 = vmatprep.subr.mxu0 %v966_v14  ;;  %v1029_v26 = vmax.f32 %v901_v15, 0.0  ;;  %v835_v27 = vadd.f32 %v707_v24, %v579_v23  ;;  %v834_v34 = vadd.f32 %v706_v30, %v578_v29  ;;  %v642_v35 = vld [vmem:[%s3830_s15 + $0x358] sm:$0xff]  ;;  %v641_v41 = vld [vmem:[%s3830_s15 + $0x350] sm:$0xff] }
  0xa6   : > { %v771_v28 = vld [vmem:[%s3835_s18 + $0x360] sm:$0xff]  ;;  %1224 = vmatpush2.msra.mxu0 %v965_v20  ;;  %v1028_v32 = vmax.f32 %v900_v22, 0.0  ;;  %v770_v36 = vld [vmem:[%s3835_s18 + $0x358] sm:$0xff]  ;;  %v769_v42 = vld [vmem:[%s3835_s18 + $0x350] sm:$0xff]  ;;  %v833_v45 = vadd.f32 %v705_v40, %v577_v37 }
  0xa7   : > { %1480 = vmatprep.subr.mxu1 %v1030_v19  ;;  %v899_v33 = vadd.f32 %v771_v28, %v643_v25  ;;  %v963_v38 = vmax.f32 %v835_v27, 0.0  ;;  %v898_v39 = vadd.f32 %v770_v36, %v642_v35  ;;  %1225 = vmatprep.subr.mxu0 %v964_v31  ;;  %v962_v44 = vmax.f32 %v834_v34, 0.0  ;;  %v576_v47 = vld [vmem:[%s3830_s15 + $0x148] sm:$0xff]  ;;  %v575_v53 = vld [vmem:[%s3830_s15 + $0x140] sm:$0xff]  ;;  %v574_v61 = vld [vmem:[%s3830_s15 + $0x138] sm:$0xff] }
  0xa8   : > { %1481 = vmatpush2.msra.mxu1 %v1029_v26  ;;  %v897_v46 = vadd.f32 %v769_v42, %v641_v41  ;;  %v704_v48 = vld [vmem:[%s3835_s18 + $0x148] sm:$0xff]  ;;  %v703_v54 = vld [vmem:[%s3835_s18 + $0x140] sm:$0xff]  ;;  %v961_v55 = vmax.f32 %v833_v45, 0.0  ;;  %v702_v0 = vld [vmem:[%s3835_s18 + $0x138] sm:$0xff] }
  0xa9   : > { %1482 = vmatprep.subr.mxu1 %v1028_v32  ;;  %v1027_v43 = vmax.f32 %v899_v33, 0.0  ;;  %v640_v49 = vld [vmem:[%s3830_s15 + $0x348] sm:$0xff]  ;;  %1226 = vmatpush2.msra.mxu0 %v963_v38  ;;  %v1026_v50 = vmax.f32 %v898_v39, 0.0  ;;  %v832_v51 = vadd.f32 %v704_v48, %v576_v47  ;;  %v831_v58 = vadd.f32 %v703_v54, %v575_v53  ;;  %v639_v59 = vld [vmem:[%s3830_s15 + $0x340] sm:$0xff]  ;;  %v638_v1 = vld [vmem:[%s3830_s15 + $0x338] sm:$0xff] }
  0xaa   : > { %v768_v52 = vld [vmem:[%s3835_s18 + $0x348] sm:$0xff]  ;;  %1227 = vmatprep.subr.mxu0 %v962_v44  ;;  %v1025_v56 = vmax.f32 %v897_v46, 0.0  ;;  %v767_v60 = vld [vmem:[%s3835_s18 + $0x340] sm:$0xff]  ;;  %v766_v2 = vld [vmem:[%s3835_s18 + $0x338] sm:$0xff]  ;;  %v830_v5 = vadd.f32 %v702_v0, %v574_v61 }
  0xab   : > { %1483 = vmatpush2.msra.mxu1 %v1027_v43  ;;  %v896_v57 = vadd.f32 %v768_v52, %v640_v49  ;;  %v960_v62 = vmax.f32 %v832_v51, 0.0  ;;  %v895_v63 = vadd.f32 %v767_v60, %v639_v59  ;;  %1228 = vmatpush2.msra.mxu0 %v961_v55  ;;  %v959_v4 = vmax.f32 %v831_v58, 0.0  ;;  %v573_v7 = vld [vmem:[%s3830_s15 + $0x130] sm:$0xff]  ;;  %v572_v13 = vld [vmem:[%s3830_s15 + $0x128] sm:$0xff]  ;;  %v571_v21 = vld [vmem:[%s3830_s15 + $0x120] sm:$0xff] }
  0xac   : > { %1484 = vmatprep.subr.mxu1 %v1026_v50  ;;  %v894_v6 = vadd.f32 %v766_v2, %v638_v1  ;;  %v701_v8 = vld [vmem:[%s3835_s18 + $0x130] sm:$0xff]  ;;  %v700_v14 = vld [vmem:[%s3835_s18 + $0x128] sm:$0xff]  ;;  %v958_v15 = vmax.f32 %v830_v5, 0.0  ;;  %v699_v24 = vld [vmem:[%s3835_s18 + $0x120] sm:$0xff] }
  0xad   : > { %1485 = vmatpush2.msra.mxu1 %v1025_v56  ;;  %v1024_v3 = vmax.f32 %v896_v57, 0.0  ;;  %v637_v9 = vld [vmem:[%s3830_s15 + $0x330] sm:$0xff]  ;;  %1229 = vmatprep.subr.mxu0 %v960_v62  ;;  %v1023_v10 = vmax.f32 %v895_v63, 0.0  ;;  %v829_v11 = vadd.f32 %v701_v8, %v573_v7  ;;  %v828_v18 = vadd.f32 %v700_v14, %v572_v13  ;;  %v636_v19 = vld [vmem:[%s3830_s15 + $0x328] sm:$0xff]  ;;  %v635_v25 = vld [vmem:[%s3830_s15 + $0x320] sm:$0xff] }
  0xae   : > { %v765_v12 = vld [vmem:[%s3835_s18 + $0x330] sm:$0xff]  ;;  %1230 = vmatpush2.msra.mxu0 %v959_v4  ;;  %v1022_v16 = vmax.f32 %v894_v6, 0.0  ;;  %v764_v20 = vld [vmem:[%s3835_s18 + $0x328] sm:$0xff]  ;;  %v763_v26 = vld [vmem:[%s3835_s18 + $0x320] sm:$0xff]  ;;  %v827_v29 = vadd.f32 %v699_v24, %v571_v21 }
  0xaf   : > { %1486 = vmatprep.subr.mxu1 %v1024_v3  ;;  %v893_v17 = vadd.f32 %v765_v12, %v637_v9  ;;  %v957_v22 = vmax.f32 %v829_v11, 0.0  ;;  %v892_v23 = vadd.f32 %v764_v20, %v636_v19  ;;  %1231 = vmatprep.subr.mxu0 %v958_v15  ;;  %v956_v28 = vmax.f32 %v828_v18, 0.0  ;;  %v570_v31 = vld [vmem:[%s3830_s15 + $0x118] sm:$0xff]  ;;  %v569_v37 = vld [vmem:[%s3830_s15 + $0x110] sm:$0xff]  ;;  %v568_v45 = vld [vmem:[%s3830_s15 + $0x108] sm:$0xff] }
  0xb0   : > { %1487 = vmatpush2.msra.mxu1 %v1023_v10  ;;  %v891_v30 = vadd.f32 %v763_v26, %v635_v25  ;;  %v698_v32 = vld [vmem:[%s3835_s18 + $0x118] sm:$0xff]  ;;  %v697_v38 = vld [vmem:[%s3835_s18 + $0x110] sm:$0xff]  ;;  %v955_v39 = vmax.f32 %v827_v29, 0.0  ;;  %v696_v48 = vld [vmem:[%s3835_s18 + $0x108] sm:$0xff] }
  0xb1   : > { %1488 = vmatprep.subr.mxu1 %v1022_v16  ;;  %v1021_v27 = vmax.f32 %v893_v17, 0.0  ;;  %v634_v33 = vld [vmem:[%s3830_s15 + $0x318] sm:$0xff]  ;;  %1232 = vmatpush2.msra.mxu0 %v957_v22  ;;  %v1020_v34 = vmax.f32 %v892_v23, 0.0  ;;  %v826_v35 = vadd.f32 %v698_v32, %v570_v31  ;;  %v825_v42 = vadd.f32 %v697_v38, %v569_v37  ;;  %v633_v43 = vld [vmem:[%s3830_s15 + $0x310] sm:$0xff]  ;;  %v632_v49 = vld [vmem:[%s3830_s15 + $0x308] sm:$0xff] }
  0xb2   : > { %v762_v36 = vld [vmem:[%s3835_s18 + $0x318] sm:$0xff]  ;;  %1233 = vmatprep.subr.mxu0 %v956_v28  ;;  %v1019_v40 = vmax.f32 %v891_v30, 0.0  ;;  %v761_v44 = vld [vmem:[%s3835_s18 + $0x310] sm:$0xff]  ;;  %v760_v50 = vld [vmem:[%s3835_s18 + $0x308] sm:$0xff]  ;;  %v824_v53 = vadd.f32 %v696_v48, %v568_v45 }
  0xb3   : > { %1489 = vmatpush2.msra.mxu1 %v1021_v27  ;;  %v890_v41 = vadd.f32 %v762_v36, %v634_v33  ;;  %v954_v46 = vmax.f32 %v826_v35, 0.0  ;;  %v889_v47 = vadd.f32 %v761_v44, %v633_v43  ;;  %1234 = vmatpush2.msra.mxu0 %v955_v39  ;;  %v953_v52 = vmax.f32 %v825_v42, 0.0  ;;  %v567_v55 = vld [vmem:[%s3830_s15 + $0x100] sm:$0xff]  ;;  %v1049_v3 = vld [vmem:[%s3823_s11 + $0x10] sm:$0xff]  ;;  %v1052_v4 = vld [vmem:[%s3823_s11 + $0x28] sm:$0xff] }
  0xb4   : > { %1490 = vmatprep.subr.mxu1 %v1020_v34  ;;  %v888_v54 = vadd.f32 %v760_v50, %v632_v49  ;;  %v695_v56 = vld [vmem:[%s3835_s18 + $0x100] sm:$0xff]  ;;  %v952_v61 = vmax.f32 %v824_v53, 0.0  ;;  %v1054_v5 = vld [vmem:[%s3823_s11 + $0x38] sm:$0xff]  ;;  %v1053_v7 = vld [vmem:[%s3823_s11 + $0x30] sm:$0xff] }
  0xb5   : > { %1491 = vmatpush2.msra.mxu1 %v1019_v40  ;;  %v1018_v51 = vmax.f32 %v890_v41, 0.0  ;;  %v631_v57 = vld [vmem:[%s3830_s15 + $0x300] sm:$0xff]  ;;  %1235 = vmatprep.subr.mxu0 %v954_v46  ;;  %v1017_v58 = vmax.f32 %v889_v47, 0.0  ;;  %v823_v59 = vadd.f32 %v695_v56, %v567_v55  ;;  %v1056_v8 = vld [vmem:[%s3823_s11 + $0x48] sm:$0xff]  ;;  %v1058_v9 = vld [vmem:[%s3823_s11 + $0x58] sm:$0xff] }
  0xb6   : > { %v759_v60 = vld [vmem:[%s3835_s18 + $0x300] sm:$0xff]  ;;  %1236 = vmatpush2.msra.mxu0 %v953_v52  ;;  %v1016_v62 = vmax.f32 %v888_v54, 0.0  ;;  %v1057_v11 = vld [vmem:[%s3823_s11 + $0x50] sm:$0xff]  ;;  %v1060_v12 = vld [vmem:[%s3823_s11 + $0x68] sm:$0xff] }
  0xb7   : > { %1492 = vmatprep.subr.mxu1 %v1018_v51  ;;  %v887_v63 = vadd.f32 %v759_v60, %v631_v57  ;;  %v951_v0 = vmax.f32 %v823_v59, 0.0  ;;  %v1047_v1 = vld [vmem:[%s3823_s11] sm:$0xff]  ;;  %1237 = vmatprep.subr.mxu0 %v952_v61  ;;  %v1062_v13 = vld [vmem:[%s3823_s11 + $0x78] sm:$0xff]  ;;  %v1061_v15 = vld [vmem:[%s3823_s11 + $0x70] sm:$0xff] }
  0xb8   : > { %1493 = vmatpush2.msra.mxu1 %v1017_v58  ;;  %v1051_v6 = vld [vmem:[%s3823_s11 + $0x20] sm:$0xff]  ;;  %v1064_v16 = vld [vmem:[%s3823_s11 + $0x88] sm:$0xff]  ;;  %v1066_v17 = vld [vmem:[%s3823_s11 + $0x98] sm:$0xff] }
  0xb9   : > { %1494 = vmatprep.subr.mxu1 %v1016_v62  ;;  %v1015_v2 = vmax.f32 %v887_v63, 0.0  ;;  %1238 = vmatpush2.msra.mxu0 %v951_v0  ;;  %v1055_v10 = vld [vmem:[%s3823_s11 + $0x40] sm:$0xff]  ;;  %v1065_v19 = vld [vmem:[%s3823_s11 + $0x90] sm:$0xff]  ;;  %v1068_v20 = vld [vmem:[%s3823_s11 + $0xa8] sm:$0xff] }
  0xba   : > { %1240 = vmatmul.mubr.f32.vlgmr.msra.gmra.mxu0 %v1047_v1  ;;  %v1059_v14 = vld [vmem:[%s3823_s11 + $0x60] sm:$0xff]  ;;  %v1070_v21 = vld [vmem:[%s3823_s11 + $0xb8] sm:$0xff]  ;;  %v1069_v23 = vld [vmem:[%s3823_s11 + $0xb0] sm:$0xff] }
  0xbb   : > { %1495 = vmatpush2.msra.mxu1 %v1015_v2  ;;  %1245 = vmatprep.mubr.f32.mxu0 %v1052_v4  ;;  %v1063_v18 = vld [vmem:[%s3823_s11 + $0x80] sm:$0xff]  ;;  %v1072_v24 = vld [vmem:[%s3823_s11 + $0xc8] sm:$0xff]  ;;  %v1074_v25 = vld [vmem:[%s3823_s11 + $0xd8] sm:$0xff] }
  0xbc   : > { %1497 = vmatmul.mubr.f32.vlgmr.msra.gmra.mxu1 %v1049_v3  ;;  %v1067_v22 = vld [vmem:[%s3823_s11 + $0xa0] sm:$0xff]  ;;  %v1073_v27 = vld [vmem:[%s3823_s11 + $0xd0] sm:$0xff]  ;;  %v1076_v28 = vld [vmem:[%s3823_s11 + $0xe8] sm:$0xff] }
  0xbd   : > { %1502 = vmatprep.mubr.f32.mxu1 %v1054_v5  ;;  %v1071_v26 = vld [vmem:[%s3823_s11 + $0xc0] sm:$0xff]  ;;  %v1078_v29 = vld [vmem:[%s3823_s11 + $0xf8] sm:$0xff]  ;;  %v1077_v31 = vld [vmem:[%s3823_s11 + $0xf0] sm:$0xff] }
  0xbe   : > { %1246 = vmatmul.mubr.f32.gmra.mxu0 %v1051_v6  ;;  %v1075_v30 = vld [vmem:[%s3823_s11 + $0xe0] sm:$0xff]  ;;  %v1080_v32 = vld [vmem:[%s3823_s11 + $0x108] sm:$0xff]  ;;  %v1082_v33 = vld [vmem:[%s3823_s11 + $0x118] sm:$0xff] }
  0xbf   : > { %1251 = vmatprep.mubr.f32.mxu0 %v1056_v8  ;;  %v1079_v34 = vld [vmem:[%s3823_s11 + $0x100] sm:$0xff]  ;;  %v1081_v35 = vld [vmem:[%s3823_s11 + $0x110] sm:$0xff]  ;;  %v1084_v36 = vld [vmem:[%s3823_s11 + $0x128] sm:$0xff] }
  0xc0   : > { %1503 = vmatmul.mubr.f32.gmra.mxu1 %v1053_v7  ;;  %v1086_v37 = vld [vmem:[%s3823_s11 + $0x138] sm:$0xff]  ;;  %v1083_v38 = vld [vmem:[%s3823_s11 + $0x120] sm:$0xff]  ;;  %v1085_v39 = vld [vmem:[%s3823_s11 + $0x130] sm:$0xff] }
  0xc1   : > { %1508 = vmatprep.mubr.f32.mxu1 %v1058_v9  ;;  %v1088_v40 = vld [vmem:[%s3823_s11 + $0x148] sm:$0xff]  ;;  %v1090_v41 = vld [vmem:[%s3823_s11 + $0x158] sm:$0xff]  ;;  %v1087_v42 = vld [vmem:[%s3823_s11 + $0x140] sm:$0xff] }
  0xc2   : > { %1252 = vmatmul.mubr.f32.gmra.mxu0 %v1055_v10  ;;  %v1089_v43 = vld [vmem:[%s3823_s11 + $0x150] sm:$0xff]  ;;  %v1092_v44 = vld [vmem:[%s3823_s11 + $0x168] sm:$0xff]  ;;  %v1094_v45 = vld [vmem:[%s3823_s11 + $0x178] sm:$0xff] }
  0xc3   : > { %1257 = vmatprep.mubr.f32.mxu0 %v1060_v12  ;;  %v1091_v46 = vld [vmem:[%s3823_s11 + $0x160] sm:$0xff]  ;;  %v1093_v47 = vld [vmem:[%s3823_s11 + $0x170] sm:$0xff]  ;;  %v1096_v48 = vld [vmem:[%s3823_s11 + $0x188] sm:$0xff] }
  0xc4   : > { %1509 = vmatmul.mubr.f32.gmra.mxu1 %v1057_v11  ;;  %v1098_v49 = vld [vmem:[%s3823_s11 + $0x198] sm:$0xff]  ;;  %v1095_v50 = vld [vmem:[%s3823_s11 + $0x180] sm:$0xff]  ;;  %v1097_v51 = vld [vmem:[%s3823_s11 + $0x190] sm:$0xff] }
  0xc5   : > { %1514 = vmatprep.mubr.f32.mxu1 %v1062_v13  ;;  %v1100_v52 = vld [vmem:[%s3823_s11 + $0x1a8] sm:$0xff]  ;;  %v1102_v53 = vld [vmem:[%s3823_s11 + $0x1b8] sm:$0xff]  ;;  %v1099_v54 = vld [vmem:[%s3823_s11 + $0x1a0] sm:$0xff] }
  0xc6   : > { %1258 = vmatmul.mubr.f32.gmra.mxu0 %v1059_v14  ;;  %v1101_v55 = vld [vmem:[%s3823_s11 + $0x1b0] sm:$0xff]  ;;  %v1104_v56 = vld [vmem:[%s3823_s11 + $0x1c8] sm:$0xff]  ;;  %v1106_v57 = vld [vmem:[%s3823_s11 + $0x1d8] sm:$0xff] }
  0xc7   : > { %1263 = vmatprep.mubr.f32.mxu0 %v1064_v16  ;;  %v1103_v58 = vld [vmem:[%s3823_s11 + $0x1c0] sm:$0xff]  ;;  %v1105_v59 = vld [vmem:[%s3823_s11 + $0x1d0] sm:$0xff]  ;;  %v1108_v60 = vld [vmem:[%s3823_s11 + $0x1e8] sm:$0xff] }
  0xc8   : > { %1515 = vmatmul.mubr.f32.gmra.mxu1 %v1061_v15  ;;  %v1110_v61 = vld [vmem:[%s3823_s11 + $0x1f8] sm:$0xff]  ;;  %v1107_v62 = vld [vmem:[%s3823_s11 + $0x1e0] sm:$0xff]  ;;  %v1109_v63 = vld [vmem:[%s3823_s11 + $0x1f0] sm:$0xff] }
  0xc9   : > { %1520 = vmatprep.mubr.f32.mxu1 %v1066_v17  ;;  %v1112_v0 = vld [vmem:[%s3823_s11 + $0x208] sm:$0xff]  ;;  %v1114_v1 = vld [vmem:[%s3823_s11 + $0x218] sm:$0xff]  ;;  %v1111_v2 = vld [vmem:[%s3823_s11 + $0x200] sm:$0xff] }
  0xca   : > { %1264 = vmatmul.mubr.f32.gmra.mxu0 %v1063_v18  ;;  %v1113_v3 = vld [vmem:[%s3823_s11 + $0x210] sm:$0xff]  ;;  %v1116_v4 = vld [vmem:[%s3823_s11 + $0x228] sm:$0xff]  ;;  %v1118_v5 = vld [vmem:[%s3823_s11 + $0x238] sm:$0xff] }
  0xcb   : > { %1269 = vmatprep.mubr.f32.mxu0 %v1068_v20  ;;  %v1115_v6 = vld [vmem:[%s3823_s11 + $0x220] sm:$0xff]  ;;  %v1117_v7 = vld [vmem:[%s3823_s11 + $0x230] sm:$0xff]  ;;  %v1120_v8 = vld [vmem:[%s3823_s11 + $0x248] sm:$0xff] }
  0xcc   : > { %1521 = vmatmul.mubr.f32.gmra.mxu1 %v1065_v19  ;;  %v1122_v9 = vld [vmem:[%s3823_s11 + $0x258] sm:$0xff]  ;;  %v1119_v10 = vld [vmem:[%s3823_s11 + $0x240] sm:$0xff]  ;;  %v1121_v11 = vld [vmem:[%s3823_s11 + $0x250] sm:$0xff] }
  0xcd   : > { %1526 = vmatprep.mubr.f32.mxu1 %v1070_v21  ;;  %v1124_v12 = vld [vmem:[%s3823_s11 + $0x268] sm:$0xff]  ;;  %v1126_v13 = vld [vmem:[%s3823_s11 + $0x278] sm:$0xff]  ;;  %v1123_v14 = vld [vmem:[%s3823_s11 + $0x260] sm:$0xff] }
  0xce   : > { %1270 = vmatmul.mubr.f32.gmra.mxu0 %v1067_v22  ;;  %v1125_v15 = vld [vmem:[%s3823_s11 + $0x270] sm:$0xff]  ;;  %v1128_v16 = vld [vmem:[%s3823_s11 + $0x288] sm:$0xff]  ;;  %v1130_v17 = vld [vmem:[%s3823_s11 + $0x298] sm:$0xff] }
  0xcf   : > { %1275 = vmatprep.mubr.f32.mxu0 %v1072_v24  ;;  %v1127_v18 = vld [vmem:[%s3823_s11 + $0x280] sm:$0xff]  ;;  %v1129_v19 = vld [vmem:[%s3823_s11 + $0x290] sm:$0xff]  ;;  %v1132_v20 = vld [vmem:[%s3823_s11 + $0x2a8] sm:$0xff] }
  0xd0   : > { %1527 = vmatmul.mubr.f32.gmra.mxu1 %v1069_v23  ;;  %v1134_v21 = vld [vmem:[%s3823_s11 + $0x2b8] sm:$0xff]  ;;  %v1131_v22 = vld [vmem:[%s3823_s11 + $0x2a0] sm:$0xff]  ;;  %v1133_v23 = vld [vmem:[%s3823_s11 + $0x2b0] sm:$0xff] }
  0xd1   : > { %1532 = vmatprep.mubr.f32.mxu1 %v1074_v25  ;;  %v1136_v24 = vld [vmem:[%s3823_s11 + $0x2c8] sm:$0xff]  ;;  %v1138_v25 = vld [vmem:[%s3823_s11 + $0x2d8] sm:$0xff] }
  0xd2   : > { %1276 = vmatmul.mubr.f32.gmra.mxu0 %v1071_v26  ;;  %v1135_v26 = vld [vmem:[%s3823_s11 + $0x2c0] sm:$0xff] }
  0xd3   : > { %1281 = vmatprep.mubr.f32.mxu0 %v1076_v28  ;;  %v1140_v28 = vld [vmem:[%s3823_s11 + $0x2e8] sm:$0xff] }
  0xd4   : > { %1533 = vmatmul.mubr.f32.gmra.mxu1 %v1073_v27  ;;  %v1137_v27 = vld [vmem:[%s3823_s11 + $0x2d0] sm:$0xff] }
  0xd5   : > { %1538 = vmatprep.mubr.f32.mxu1 %v1078_v29  ;;  %v1142_v29 = vld [vmem:[%s3823_s11 + $0x2f8] sm:$0xff] }
  0xd6   : > { %1282 = vmatmul.mubr.f32.gmra.mxu0 %v1075_v30  ;;  %v1139_v30 = vld [vmem:[%s3823_s11 + $0x2e0] sm:$0xff] }
  0xd7   : > { %1287 = vmatprep.mubr.f32.mxu0 %v1080_v32  ;;  %v1144_v32 = vld [vmem:[%s3823_s11 + $0x308] sm:$0xff] }
  0xd8   : > { %1539 = vmatmul.mubr.f32.gmra.mxu1 %v1077_v31  ;;  %v1141_v31 = vld [vmem:[%s3823_s11 + $0x2f0] sm:$0xff] }
  0xd9   : > { %1544 = vmatprep.mubr.f32.mxu1 %v1082_v33  ;;  %v1146_v33 = vld [vmem:[%s3823_s11 + $0x318] sm:$0xff] }
  0xda   : > { %1288 = vmatmul.mubr.f32.gmra.mxu0 %v1079_v34  ;;  %v1143_v34 = vld [vmem:[%s3823_s11 + $0x300] sm:$0xff] }
  0xdb   : > { %1293 = vmatprep.mubr.f32.mxu0 %v1084_v36  ;;  %v1148_v36 = vld [vmem:[%s3823_s11 + $0x328] sm:$0xff] }
  0xdc   : > { %1545 = vmatmul.mubr.f32.gmra.mxu1 %v1081_v35  ;;  %v1145_v35 = vld [vmem:[%s3823_s11 + $0x310] sm:$0xff] }
  0xdd   : > { %1550 = vmatprep.mubr.f32.mxu1 %v1086_v37  ;;  %v1150_v37 = vld [vmem:[%s3823_s11 + $0x338] sm:$0xff] }
  0xde   : > { %1294 = vmatmul.mubr.f32.gmra.mxu0 %v1083_v38  ;;  %v1147_v38 = vld [vmem:[%s3823_s11 + $0x320] sm:$0xff] }
  0xdf   : > { %1299 = vmatprep.mubr.f32.mxu0 %v1088_v40  ;;  %v1152_v40 = vld [vmem:[%s3823_s11 + $0x348] sm:$0xff] }
  0xe0   : > { %1551 = vmatmul.mubr.f32.gmra.mxu1 %v1085_v39  ;;  %v1149_v39 = vld [vmem:[%s3823_s11 + $0x330] sm:$0xff] }
  0xe1   : > { %1556 = vmatprep.mubr.f32.mxu1 %v1090_v41  ;;  %v1154_v41 = vld [vmem:[%s3823_s11 + $0x358] sm:$0xff] }
  0xe2   : > { %1300 = vmatmul.mubr.f32.gmra.mxu0 %v1087_v42  ;;  %v1151_v42 = vld [vmem:[%s3823_s11 + $0x340] sm:$0xff] }
  0xe3   : > { %1305 = vmatprep.mubr.f32.mxu0 %v1092_v44  ;;  %v1156_v44 = vld [vmem:[%s3823_s11 + $0x368] sm:$0xff] }
  0xe4   : > { %1557 = vmatmul.mubr.f32.gmra.mxu1 %v1089_v43  ;;  %v1153_v43 = vld [vmem:[%s3823_s11 + $0x350] sm:$0xff] }
  0xe5   : > { %1562 = vmatprep.mubr.f32.mxu1 %v1094_v45  ;;  %v1158_v45 = vld [vmem:[%s3823_s11 + $0x378] sm:$0xff] }
  0xe6   : > { %1306 = vmatmul.mubr.f32.gmra.mxu0 %v1091_v46  ;;  %v1155_v46 = vld [vmem:[%s3823_s11 + $0x360] sm:$0xff] }
  0xe7   : > { %1311 = vmatprep.mubr.f32.mxu0 %v1096_v48  ;;  %v1160_v48 = vld [vmem:[%s3823_s11 + $0x388] sm:$0xff] }
  0xe8   : > { %1563 = vmatmul.mubr.f32.gmra.mxu1 %v1093_v47  ;;  %v1157_v47 = vld [vmem:[%s3823_s11 + $0x370] sm:$0xff] }
  0xe9   : > { %1568 = vmatprep.mubr.f32.mxu1 %v1098_v49  ;;  %v1162_v49 = vld [vmem:[%s3823_s11 + $0x398] sm:$0xff] }
  0xea   : > { %1312 = vmatmul.mubr.f32.gmra.mxu0 %v1095_v50  ;;  %v1159_v50 = vld [vmem:[%s3823_s11 + $0x380] sm:$0xff] }
  0xeb   : > { %1317 = vmatprep.mubr.f32.mxu0 %v1100_v52  ;;  %v1164_v52 = vld [vmem:[%s3823_s11 + $0x3a8] sm:$0xff] }
  0xec   : > { %1569 = vmatmul.mubr.f32.gmra.mxu1 %v1097_v51  ;;  %v1161_v51 = vld [vmem:[%s3823_s11 + $0x390] sm:$0xff] }
  0xed   : > { %1574 = vmatprep.mubr.f32.mxu1 %v1102_v53  ;;  %v1166_v53 = vld [vmem:[%s3823_s11 + $0x3b8] sm:$0xff] }
  0xee   : > { %1318 = vmatmul.mubr.f32.gmra.mxu0 %v1099_v54  ;;  %v1163_v54 = vld [vmem:[%s3823_s11 + $0x3a0] sm:$0xff] }
  0xef   : > { %1323 = vmatprep.mubr.f32.mxu0 %v1104_v56  ;;  %v1168_v56 = vld [vmem:[%s3823_s11 + $0x3c8] sm:$0xff] }
  0xf0   : > { %1575 = vmatmul.mubr.f32.gmra.mxu1 %v1101_v55  ;;  %v1165_v55 = vld [vmem:[%s3823_s11 + $0x3b0] sm:$0xff] }
  0xf1   : > { %1580 = vmatprep.mubr.f32.mxu1 %v1106_v57  ;;  %v1170_v57 = vld [vmem:[%s3823_s11 + $0x3d8] sm:$0xff] }
  0xf2   : > { %1324 = vmatmul.mubr.f32.gmra.mxu0 %v1103_v58  ;;  %v1167_v58 = vld [vmem:[%s3823_s11 + $0x3c0] sm:$0xff] }
  0xf3   : > { %1329 = vmatprep.mubr.f32.mxu0 %v1108_v60  ;;  %v1172_v60 = vld [vmem:[%s3823_s11 + $0x3e8] sm:$0xff] }
  0xf4   : > { %1581 = vmatmul.mubr.f32.gmra.mxu1 %v1105_v59  ;;  %v1169_v59 = vld [vmem:[%s3823_s11 + $0x3d0] sm:$0xff] }
  0xf5   : > { %1586 = vmatprep.mubr.f32.mxu1 %v1110_v61  ;;  %v1174_v61 = vld [vmem:[%s3823_s11 + $0x3f8] sm:$0xff] }
  0xf6   : > { %1330 = vmatmul.mubr.f32.gmra.mxu0 %v1107_v62  ;;  %v1171_v62 = vld [vmem:[%s3823_s11 + $0x3e0] sm:$0xff] }
  0xf7   : > { %1335 = vmatprep.mubr.f32.mxu0 %v1112_v0 }
  0xf8   : > { %1587 = vmatmul.mubr.f32.gmra.mxu1 %v1109_v63  ;;  %v1173_v63 = vld [vmem:[%s3823_s11 + $0x3f0] sm:$0xff] }
  0xf9   : > { %1592 = vmatprep.mubr.f32.mxu1 %v1114_v1 }
  0xfa   : > { %1336 = vmatmul.mubr.f32.gmra.mxu0 %v1111_v2 }
  0xfb   : > { %1341 = vmatprep.mubr.f32.mxu0 %v1116_v4 }
  0xfc   : > { %1593 = vmatmul.mubr.f32.gmra.mxu1 %v1113_v3 }
  0xfd   : > { %1598 = vmatprep.mubr.f32.mxu1 %v1118_v5 }
  0xfe   : > { %1342 = vmatmul.mubr.f32.gmra.mxu0 %v1115_v6 }
  0xff   : > { %1347 = vmatprep.mubr.f32.mxu0 %v1120_v8 }
 0x100   : > { %1599 = vmatmul.mubr.f32.gmra.mxu1 %v1117_v7 }
 0x101   : > { %1604 = vmatprep.mubr.f32.mxu1 %v1122_v9 }
 0x102   : > { %1348 = vmatmul.mubr.f32.gmra.mxu0 %v1119_v10 }
 0x103   : > { %1353 = vmatprep.mubr.f32.mxu0 %v1124_v12 }
 0x104   : > { %1605 = vmatmul.mubr.f32.gmra.mxu1 %v1121_v11 }
 0x105   : > { %1610 = vmatprep.mubr.f32.mxu1 %v1126_v13 }
 0x106   : > { %1354 = vmatmul.mubr.f32.gmra.mxu0 %v1123_v14 }
 0x107   : > { %1359 = vmatprep.mubr.f32.mxu0 %v1128_v16 }
 0x108   : > { %1611 = vmatmul.mubr.f32.gmra.mxu1 %v1125_v15 }
 0x109   : > { %1616 = vmatprep.mubr.f32.mxu1 %v1130_v17 }
 0x10a   : > { %1360 = vmatmul.mubr.f32.gmra.mxu0 %v1127_v18 }
 0x10b   : > { %1365 = vmatprep.mubr.f32.mxu0 %v1132_v20 }
 0x10c   : > { %1617 = vmatmul.mubr.f32.gmra.mxu1 %v1129_v19 }
 0x10d   : > { %1622 = vmatprep.mubr.f32.mxu1 %v1134_v21 }
 0x10e   : > { %1366 = vmatmul.mubr.f32.gmra.mxu0 %v1131_v22 }
 0x10f   : > { %1371 = vmatprep.mubr.f32.mxu0 %v1136_v24 }
 0x110   : > { %1623 = vmatmul.mubr.f32.gmra.mxu1 %v1133_v23 }
 0x111   : > { %1628 = vmatprep.mubr.f32.mxu1 %v1138_v25 }
 0x112   : > { %1372 = vmatmul.mubr.f32.gmra.mxu0 %v1135_v26 }
 0x113   : > { %1377 = vmatprep.mubr.f32.mxu0 %v1140_v28 }
 0x114   : > { %1629 = vmatmul.mubr.f32.gmra.mxu1 %v1137_v27 }
 0x115   : > { %1634 = vmatprep.mubr.f32.mxu1 %v1142_v29 }
 0x116   : > { %1378 = vmatmul.mubr.f32.gmra.mxu0 %v1139_v30 }
 0x117   : > { %1383 = vmatprep.mubr.f32.mxu0 %v1144_v32 }
 0x118   : > { %1635 = vmatmul.mubr.f32.gmra.mxu1 %v1141_v31 }
 0x119   : > { %1640 = vmatprep.mubr.f32.mxu1 %v1146_v33 }
 0x11a   : > { %1384 = vmatmul.mubr.f32.gmra.mxu0 %v1143_v34 }
 0x11b   : > { %1389 = vmatprep.mubr.f32.mxu0 %v1148_v36 }
 0x11c   : > { %1641 = vmatmul.mubr.f32.gmra.mxu1 %v1145_v35 }
 0x11d   : > { %1646 = vmatprep.mubr.f32.mxu1 %v1150_v37 }
 0x11e   : > { %1390 = vmatmul.mubr.f32.gmra.mxu0 %v1147_v38 }
 0x11f   : > { %1395 = vmatprep.mubr.f32.mxu0 %v1152_v40 }
 0x120   : > { %1647 = vmatmul.mubr.f32.gmra.mxu1 %v1149_v39 }
 0x121   : > { %1652 = vmatprep.mubr.f32.mxu1 %v1154_v41 }
 0x122   : > { %1396 = vmatmul.mubr.f32.gmra.mxu0 %v1151_v42 }
 0x123   : > { %1401 = vmatprep.mubr.f32.mxu0 %v1156_v44 }
 0x124   : > { %1653 = vmatmul.mubr.f32.gmra.mxu1 %v1153_v43 }
 0x125   : > { %1658 = vmatprep.mubr.f32.mxu1 %v1158_v45 }
 0x126   : > { %1402 = vmatmul.mubr.f32.gmra.mxu0 %v1155_v46 }
 0x127   : > { %1407 = vmatprep.mubr.f32.mxu0 %v1160_v48 }
 0x128   : > { %1659 = vmatmul.mubr.f32.gmra.mxu1 %v1157_v47 }
 0x129   : > { %1664 = vmatprep.mubr.f32.mxu1 %v1162_v49 }
 0x12a   : > { %1408 = vmatmul.mubr.f32.gmra.mxu0 %v1159_v50 }
 0x12b   : > { %1413 = vmatprep.mubr.f32.mxu0 %v1164_v52 }
 0x12c   : > { %1665 = vmatmul.mubr.f32.gmra.mxu1 %v1161_v51 }
 0x12d   : > { %1670 = vmatprep.mubr.f32.mxu1 %v1166_v53 }
 0x12e   : > { %1414 = vmatmul.mubr.f32.gmra.mxu0 %v1163_v54 }
 0x12f   : > { %1419 = vmatprep.mubr.f32.mxu0 %v1168_v56 }
 0x130   : > { %1671 = vmatmul.mubr.f32.gmra.mxu1 %v1165_v55 }
 0x131   : > { %1676 = vmatprep.mubr.f32.mxu1 %v1170_v57 }
 0x132   : > { %1420 = vmatmul.mubr.f32.gmra.mxu0 %v1167_v58 }
 0x133   : > { %1425 = vmatprep.mubr.f32.mxu0 %v1172_v60 }
 0x134   : > { %1677 = vmatmul.mubr.f32.gmra.mxu1 %v1169_v59 }
 0x135   : > { %1682 = vmatprep.mubr.f32.mxu1 %v1174_v61 }
 0x136   : > { %1426 = vmatmul.mubr.f32.gmra.mxu0 %v1171_v62 }
 0x138   : > { %1683 = vmatmul.mubr.f32.gmra.mxu1 %v1173_v63 }
 0x17a   : > { %v1241_v0 = vpop.f32.mrf.mxu0 }
 0x17c   : > { %v1498_v1 = vpop.f32.mrf.mxu1  ;;  %v1243_v3 = vpop.f32.mrf.mxu0 }
 0x17d   : > { %v4219_v2 = vadd.f32 %v1498_v1, %v1241_v0 }
 0x17e   : > { %v1500_v4 = vpop.f32.mrf.mxu1  ;;  %v1247_v6 = vpop.f32.mrf.mxu0 }
 0x17f   : > { %v4221_v5 = vadd.f32 %v1500_v4, %v1243_v3 }
 0x180   : > { %v1504_v7 = vpop.f32.mrf.mxu1  ;;  %v1249_v9 = vpop.f32.mrf.mxu0 }
 0x181   : > { %v4223_v8 = vadd.f32 %v1504_v7, %v1247_v6 }
 0x182   : > { %v1506_v10 = vpop.f32.mrf.mxu1  ;;  %v1253_v12 = vpop.f32.mrf.mxu0 }
 0x183   : > { %v4225_v11 = vadd.f32 %v1506_v10, %v1249_v9 }
 0x184   : > { %v1510_v13 = vpop.f32.mrf.mxu1  ;;  %v1255_v15 = vpop.f32.mrf.mxu0 }
 0x185   : > { %v4227_v14 = vadd.f32 %v1510_v13, %v1253_v12 }
 0x186   : > { %v1512_v16 = vpop.f32.mrf.mxu1  ;;  %v1259_v18 = vpop.f32.mrf.mxu0 }
 0x187   : > { %v4229_v17 = vadd.f32 %v1512_v16, %v1255_v15 }
 0x188   : > { %v1516_v19 = vpop.f32.mrf.mxu1  ;;  %v1261_v21 = vpop.f32.mrf.mxu0 }
 0x189   : > { %v4231_v20 = vadd.f32 %v1516_v19, %v1259_v18 }
 0x18a   : > { %v1518_v22 = vpop.f32.mrf.mxu1  ;;  %v1265_v24 = vpop.f32.mrf.mxu0 }
 0x18b   : > { %v4233_v23 = vadd.f32 %v1518_v22, %v1261_v21 }
 0x18c   : > { %v1522_v25 = vpop.f32.mrf.mxu1  ;;  %v1267_v27 = vpop.f32.mrf.mxu0 }
 0x18d   : > { %v4235_v26 = vadd.f32 %v1522_v25, %v1265_v24 }
 0x18e   : > { %v1524_v28 = vpop.f32.mrf.mxu1  ;;  %v1271_v30 = vpop.f32.mrf.mxu0 }
 0x18f   : > { %v4237_v29 = vadd.f32 %v1524_v28, %v1267_v27 }
 0x190   : > { %v1528_v31 = vpop.f32.mrf.mxu1  ;;  %v1273_v33 = vpop.f32.mrf.mxu0 }
 0x191   : > { %v4239_v32 = vadd.f32 %v1528_v31, %v1271_v30 }
 0x192   : > { %v1530_v34 = vpop.f32.mrf.mxu1  ;;  %v1277_v36 = vpop.f32.mrf.mxu0 }
 0x193   : > { %v4241_v35 = vadd.f32 %v1530_v34, %v1273_v33 }
 0x194   : > { %v1534_v37 = vpop.f32.mrf.mxu1  ;;  %v1279_v39 = vpop.f32.mrf.mxu0 }
 0x195   : > { %v4243_v38 = vadd.f32 %v1534_v37, %v1277_v36 }
 0x196   : > { %v1536_v40 = vpop.f32.mrf.mxu1  ;;  %v1283_v42 = vpop.f32.mrf.mxu0 }
 0x197   : > { %v4245_v41 = vadd.f32 %v1536_v40, %v1279_v39 }
 0x198   : > { %v1540_v43 = vpop.f32.mrf.mxu1  ;;  %v1285_v45 = vpop.f32.mrf.mxu0 }
 0x199   : > { %v4247_v44 = vadd.f32 %v1540_v43, %v1283_v42 }
 0x19a   : > { %v1542_v46 = vpop.f32.mrf.mxu1  ;;  %v1289_v48 = vpop.f32.mrf.mxu0 }
 0x19b   : > { %v4249_v47 = vadd.f32 %v1542_v46, %v1285_v45 }
 0x19c   : > { %v1546_v49 = vpop.f32.mrf.mxu1  ;;  %v1291_v51 = vpop.f32.mrf.mxu0 }
 0x19d   : > { %v4251_v50 = vadd.f32 %v1546_v49, %v1289_v48 }
 0x19e   : > { %v1548_v52 = vpop.f32.mrf.mxu1  ;;  %v1295_v54 = vpop.f32.mrf.mxu0 }
 0x19f   : > { %v4253_v53 = vadd.f32 %v1548_v52, %v1291_v51 }
 0x1a0   : > { %v1552_v55 = vpop.f32.mrf.mxu1  ;;  %v1297_v57 = vpop.f32.mrf.mxu0 }
 0x1a1   : > { %v4255_v56 = vadd.f32 %v1552_v55, %v1295_v54 }
 0x1a2   : > { %v1554_v58 = vpop.f32.mrf.mxu1  ;;  %v1301_v60 = vpop.f32.mrf.mxu0 }
 0x1a3   : > { %v4257_v59 = vadd.f32 %v1554_v58, %v1297_v57 }
 0x1a4   : > { %v1558_v61 = vpop.f32.mrf.mxu1  ;;  %v1303_v63 = vpop.f32.mrf.mxu0 }
 0x1a5   : > { %v4259_v62 = vadd.f32 %v1558_v61, %v1301_v60 }
 0x1a6   : > { %v1560_v0 = vpop.f32.mrf.mxu1  ;;  %v1307_v3 = vpop.f32.mrf.mxu0 }
 0x1a7   : > { %v4261_v1 = vadd.f32 %v1560_v0, %v1303_v63 }
 0x1a8   : > { %v1564_v4 = vpop.f32.mrf.mxu1  ;;  %v1309_v7 = vpop.f32.mrf.mxu0 }
 0x1a9   : > { %v4263_v6 = vadd.f32 %v1564_v4, %v1307_v3 }
 0x1aa   : > { %v1566_v9 = vpop.f32.mrf.mxu1  ;;  %v1313_v12 = vpop.f32.mrf.mxu0 }
 0x1ab   : > { %v4265_v10 = vadd.f32 %v1566_v9, %v1309_v7 }
 0x1ac   : > { %v1570_v13 = vpop.f32.mrf.mxu1  ;;  %v1315_v16 = vpop.f32.mrf.mxu0 }
 0x1ad   : > { %v4267_v15 = vadd.f32 %v1570_v13, %v1313_v12 }
 0x1ae   : > { %v1572_v18 = vpop.f32.mrf.mxu1  ;;  %v1319_v21 = vpop.f32.mrf.mxu0 }
 0x1af   : > { %v4269_v19 = vadd.f32 %v1572_v18, %v1315_v16 }
 0x1b0   : > { %v1576_v22 = vpop.f32.mrf.mxu1  ;;  %v1321_v25 = vpop.f32.mrf.mxu0 }
 0x1b1   : > { %v4271_v24 = vadd.f32 %v1576_v22, %v1319_v21 }
 0x1b2   : > { %v1578_v27 = vpop.f32.mrf.mxu1  ;;  %v1325_v30 = vpop.f32.mrf.mxu0 }
 0x1b3   : > { %v4273_v28 = vadd.f32 %v1578_v27, %v1321_v25 }
 0x1b4   : > { %v1582_v31 = vpop.f32.mrf.mxu1  ;;  %v1327_v34 = vpop.f32.mrf.mxu0 }
 0x1b5   : > { %v4275_v33 = vadd.f32 %v1582_v31, %v1325_v30 }
 0x1b6   : > { %v1584_v36 = vpop.f32.mrf.mxu1  ;;  %v1331_v39 = vpop.f32.mrf.mxu0 }
 0x1b7   : > { %v4277_v37 = vadd.f32 %v1584_v36, %v1327_v34 }
 0x1b8   : > { %v1588_v40 = vpop.f32.mrf.mxu1  ;;  %v1333_v43 = vpop.f32.mrf.mxu0 }
 0x1b9   : > { %v4279_v42 = vadd.f32 %v1588_v40, %v1331_v39 }
 0x1ba   : > { %v1590_v45 = vpop.f32.mrf.mxu1  ;;  %v1337_v48 = vpop.f32.mrf.mxu0 }
 0x1bb   : > { %v4281_v46 = vadd.f32 %v1590_v45, %v1333_v43 }
 0x1bc   : > { %v1594_v49 = vpop.f32.mrf.mxu1  ;;  %v1339_v52 = vpop.f32.mrf.mxu0 }
 0x1bd   : > { %v4283_v51 = vadd.f32 %v1594_v49, %v1337_v48 }
 0x1be   : > { %v1596_v54 = vpop.f32.mrf.mxu1  ;;  %v1343_v57 = vpop.f32.mrf.mxu0 }
 0x1bf   : > { %v4285_v55 = vadd.f32 %v1596_v54, %v1339_v52 }
 0x1c0   : > { %v1600_v58 = vpop.f32.mrf.mxu1  ;;  %v1345_v61 = vpop.f32.mrf.mxu0 }
 0x1c1   : > { %v4287_v60 = vadd.f32 %v1600_v58, %v1343_v57 }
 0x1c2   : > { %v1602_v63 = vpop.f32.mrf.mxu1  ;;  %v1349_v3 = vpop.f32.mrf.mxu0 }
 0x1c3   : > { %v4289_v0 = vadd.f32 %v1602_v63, %v1345_v61 }
 0x1c4   : > { %v1606_v4 = vpop.f32.mrf.mxu1  ;;  %v1351_v9 = vpop.f32.mrf.mxu0 }
 0x1c5   : > { %v4291_v7 = vadd.f32 %v1606_v4, %v1349_v3 }
 0x1c6   : > { %v1608_v12 = vpop.f32.mrf.mxu1  ;;  %v1355_v16 = vpop.f32.mrf.mxu0 }
 0x1c7   : > { %v4293_v13 = vadd.f32 %v1608_v12, %v1351_v9 }
 0x1c8   : > { %v1612_v18 = vpop.f32.mrf.mxu1  ;;  %v1357_v22 = vpop.f32.mrf.mxu0 }
 0x1c9   : > { %7126 = vst [vmem:[#allocation3_spill] sm:$0xff] %v4293_v13  ;;  %v4295_v21 = vadd.f32 %v1612_v18, %v1355_v16 }
 0x1ca   : > { %v1614_v25 = vpop.f32.mrf.mxu1  ;;  %v1361_v30 = vpop.f32.mrf.mxu0 }
 0x1cb   : > { %v4297_v27 = vadd.f32 %v1614_v25, %v1357_v22 }
 0x1cc   : > { %v1618_v31 = vpop.f32.mrf.mxu1  ;;  %v1363_v36 = vpop.f32.mrf.mxu0 }
 0x1cd   : > { %7127 = vst [vmem:[#allocation4_spill] sm:$0xff] %v4297_v27  ;;  %v4299_v34 = vadd.f32 %v1618_v31, %v1361_v30 }
 0x1ce   : > { %v1620_v39 = vpop.f32.mrf.mxu1  ;;  %v1367_v43 = vpop.f32.mrf.mxu0 }
 0x1cf   : > { %v4301_v40 = vadd.f32 %v1620_v39, %v1363_v36 }
 0x1d0   : > { %v1624_v45 = vpop.f32.mrf.mxu1  ;;  %v1369_v49 = vpop.f32.mrf.mxu0 }
 0x1d1   : > { %7128 = vst [vmem:[#allocation5_spill] sm:$0xff] %v4301_v40  ;;  %v4303_v48 = vadd.f32 %v1624_v45, %v1367_v43 }
 0x1d2   : > { %v1626_v52 = vpop.f32.mrf.mxu1  ;;  %v1373_v57 = vpop.f32.mrf.mxu0 }
 0x1d3   : > { %v4305_v54 = vadd.f32 %v1626_v52, %v1369_v49 }
 0x1d4   : > { %v1630_v58 = vpop.f32.mrf.mxu1  ;;  %v1375_v63 = vpop.f32.mrf.mxu0 }
 0x1d5   : > { %7129 = vst [vmem:[#allocation6_spill] sm:$0xff] %v4305_v54  ;;  %v4307_v61 = vadd.f32 %v1630_v58, %v1373_v57 }
 0x1d6   : > { %v1632_v3 = vpop.f32.mrf.mxu1  ;;  %v1379_v9 = vpop.f32.mrf.mxu0 }
 0x1d7   : > { %v4309_v4 = vadd.f32 %v1632_v3, %v1375_v63 }
 0x1d8   : > { %v1636_v12 = vpop.f32.mrf.mxu1  ;;  %v1381_v18 = vpop.f32.mrf.mxu0 }
 0x1d9   : > { %7130 = vst [vmem:[#allocation7_spill] sm:$0xff] %v4309_v4  ;;  %v4311_v16 = vadd.f32 %v1636_v12, %v1379_v9 }
 0x1da   : > { %v1638_v22 = vpop.f32.mrf.mxu1  ;;  %v1385_v30 = vpop.f32.mrf.mxu0 }
 0x1db   : > { %v4313_v25 = vadd.f32 %v1638_v22, %v1381_v18 }
 0x1dc   : > { %v1642_v31 = vpop.f32.mrf.mxu1  ;;  %v1387_v39 = vpop.f32.mrf.mxu0 }
 0x1dd   : > { %7131 = vst [vmem:[#allocation8_spill] sm:$0xff] %v4313_v25  ;;  %v4315_v36 = vadd.f32 %v1642_v31, %v1385_v30 }
 0x1de   : > { %v1644_v43 = vpop.f32.mrf.mxu1  ;;  %v1391_v49 = vpop.f32.mrf.mxu0 }
 0x1df   : > { %v4317_v45 = vadd.f32 %v1644_v43, %v1387_v39 }
 0x1e0   : > { %v1648_v52 = vpop.f32.mrf.mxu1  ;;  %v1393_v58 = vpop.f32.mrf.mxu0 }
 0x1e1   : > { %7132 = vst [vmem:[#allocation9_spill] sm:$0xff] %v4317_v45  ;;  %v4319_v57 = vadd.f32 %v1648_v52, %v1391_v49 }
 0x1e2   : > { %v1650_v63 = vpop.f32.mrf.mxu1  ;;  %v1397_v9 = vpop.f32.mrf.mxu0 }
 0x1e3   : > { %v4321_v3 = vadd.f32 %v1650_v63, %v1393_v58 }
 0x1e4   : > { %v1654_v12 = vpop.f32.mrf.mxu1  ;;  %v1399_v22 = vpop.f32.mrf.mxu0 }
 0x1e5   : > { %7133 = vst [vmem:[#allocation10_spill] sm:$0xff] %v4321_v3  ;;  %v4323_v18 = vadd.f32 %v1654_v12, %v1397_v9 }
 0x1e6   : > { %v1656_v25 = vpop.f32.mrf.mxu1  ;;  %v1403_v31 = vpop.f32.mrf.mxu0 }
 0x1e7   : > { %v4325_v30 = vadd.f32 %v1656_v25, %v1399_v22 }
 0x1e8   : > { %v1660_v4 = vpop.f32.mrf.mxu1  ;;  %v1405_v43 = vpop.f32.mrf.mxu0 }
 0x1e9   : > { %7134 = vst [vmem:[#allocation11_spill] sm:$0xff] %v4325_v30  ;;  %v4327_v39 = vadd.f32 %v1660_v4, %v1403_v31 }
 0x1ea   : > { %v1662_v45 = vpop.f32.mrf.mxu1  ;;  %v1409_v52 = vpop.f32.mrf.mxu0 }
 0x1eb   : > { %v4329_v49 = vadd.f32 %v1662_v45, %v1405_v43 }
 0x1ec   : > { %v1666_v54 = vpop.f32.mrf.mxu1  ;;  %v1411_v63 = vpop.f32.mrf.mxu0 }
 0x1ed   : > { %7135 = vst [vmem:[#allocation12_spill] sm:$0xff] %v4329_v49  ;;  %v4331_v58 = vadd.f32 %v1666_v54, %v1409_v52 }
 0x1ee   : > { %v1668_v3 = vpop.f32.mrf.mxu1  ;;  %v1415_v12 = vpop.f32.mrf.mxu0 }
 0x1ef   : > { %v4333_v9 = vadd.f32 %v1668_v3, %v1411_v63 }
 0x1f0   : > { %v1672_v40 = vpop.f32.mrf.mxu1  ;;  %v1417_v22 = vpop.f32.mrf.mxu0 }
 0x1f1   : > { %7136 = vst [vmem:[#allocation13_spill] sm:$0xff] %v4333_v9  ;;  %v4335_v25 = vadd.f32 %v1672_v40, %v1415_v12 }
 0x1f2   : > { %v1674_v30 = vpop.f32.mrf.mxu1  ;;  %v1421_v31 = vpop.f32.mrf.mxu0 }
 0x1f3   : > { %v4337_v4 = vadd.f32 %v1674_v30, %v1417_v22 }
 0x1f4   : > { %v1678_v27 = vpop.f32.mrf.mxu1  ;;  %v1423_v43 = vpop.f32.mrf.mxu0 }
 0x1f5   : > { %v4339_v45 = vadd.f32 %v1678_v27, %v1421_v31 }
 0x1f6   : > { %v1680_v49 = vpop.f32.mrf.mxu1  ;;  %v1427_v52 = vpop.f32.mrf.mxu0 }
 0x1f7   : > { %v4341_v54 = vadd.f32 %v1680_v49, %v1423_v43  ;;  %1692 = sbr.rel (%p3313_p9) target bundleno = 540 (0x21c), region = 67 }
 0x1f8   : > { %v1684_v13 = vpop.f32.mrf.mxu1  ;;  %v1429_v63 = vpop.f32.mrf.mxu0 }
 0x1f9   : > { %v4343_v3 = vadd.f32 %v1684_v13, %v1427_v52 }
 0x1fa   : > { %v1686_v9 = vpop.f32.mrf.mxu1 }
 0x1fb   : > { %v4345_v40 = vadd.f32 %v1686_v9, %v1429_v63 }
 0x1fc   : > { %1693 = vst [vmem:[%s7064_s5] sm:$0xff] %v4219_v2  ;;  %vm1694_vm0 = vcmask 556032   ;;  %1696 = vst [vmem:[%s7064_s5 + $0x10] sm:$0xff] %v4223_v8  ;;  %v7137_v13 = vld [vmem:[#allocation3_spill] sm:$0xff]  ;;  %v7138_v27 = vld [vmem:[#allocation4_spill] sm:$0xff] }
 0x1fd   : > { %1698 = vst [vmem:[%s7064_s5 + $0x20] sm:$0xff] %v4227_v14  ;;  %1700 = vst [vmem:[%s7064_s5 + $0x30] sm:$0xff] %v4231_v20  ;;  %v7139_v30 = vld [vmem:[#allocation5_spill] sm:$0xff]  ;;  %v7140_v49 = vld [vmem:[#allocation6_spill] sm:$0xff] }
 0x1fe   : > { %1702 = vst [vmem:[%s7064_s5 + $0x40] sm:$0xff] %v4235_v26  ;;  %1704 = vst [vmem:[%s7064_s5 + $0x50] sm:$0xff] %v4239_v32  ;;  %v7141_v9 = vld [vmem:[#allocation7_spill] sm:$0xff]  ;;  %v7142_v12 = vld [vmem:[#allocation8_spill] sm:$0xff] }
 0x1ff   : > { %1706 = vst [vmem:[%s7064_s5 + $0x60] sm:$0xff] %v4243_v38  ;;  %1708 = vst [vmem:[%s7064_s5 + $0x70] sm:$0xff] %v4247_v44  ;;  %v7143_v22 = vld [vmem:[#allocation9_spill] sm:$0xff]  ;;  %v7144_v31 = vld [vmem:[#allocation10_spill] sm:$0xff] }
 0x200   : > { %1710 = vst [vmem:[%s7064_s5 + $0x80] sm:$0xff] %v4251_v50  ;;  %1712 = vst [vmem:[%s7064_s5 + $0x90] sm:$0xff] %v4255_v56  ;;  %v7145_v43 = vld [vmem:[#allocation11_spill] sm:$0xff]  ;;  %v7146_v52 = vld [vmem:[#allocation12_spill] sm:$0xff] }
 0x201   : > { %1714 = vst [vmem:[%s7064_s5 + $0xa0] sm:$0xff] %v4259_v62  ;;  %1716 = vst [vmem:[%s7064_s5 + $0xb0] sm:$0xff] %v4263_v6  ;;  %v7147_v63 = vld [vmem:[#allocation13_spill] sm:$0xff] }
 0x202   : > { %1718 = vst [vmem:[%s7064_s5 + $0xc0] sm:$0xff] %v4267_v15  ;;  %1720 = vst [vmem:[%s7064_s5 + $0xd0] sm:$0xff] %v4271_v24 }
 0x203   : > { %1722 = vst [vmem:[%s7064_s5 + $0xe0] sm:$0xff] %v4275_v33  ;;  %1724 = vst [vmem:[%s7064_s5 + $0xf0] sm:$0xff] %v4279_v42 }
 0x204   : > { %1726 = vst [vmem:[%s7064_s5 + $0x100] sm:$0xff] %v4283_v51  ;;  %1728 = vst [vmem:[%s7064_s5 + $0x110] sm:$0xff] %v4287_v60 }
 0x205   : > { %1730 = vst [vmem:[%s7064_s5 + $0x120] sm:$0xff] %v4291_v7  ;;  %1732 = vst [vmem:[%s7064_s5 + $0x130] sm:$0xff] %v4295_v21 }
 0x206   : > { %1734 = vst [vmem:[%s7064_s5 + $0x140] sm:$0xff] %v4299_v34  ;;  %1736 = vst [vmem:[%s7064_s5 + $0x150] sm:$0xff] %v4303_v48 }
 0x207   : > { %1738 = vst [vmem:[%s7064_s5 + $0x160] sm:$0xff] %v4307_v61  ;;  %1740 = vst [vmem:[%s7064_s5 + $0x170] sm:$0xff] %v4311_v16 }
 0x208   : > { %1742 = vst [vmem:[%s7064_s5 + $0x180] sm:$0xff] %v4315_v36  ;;  %1744 = vst [vmem:[%s7064_s5 + $0x190] sm:$0xff] %v4319_v57 }
 0x209   : > { %1746 = vst [vmem:[%s7064_s5 + $0x1a0] sm:$0xff] %v4323_v18  ;;  %1748 = vst [vmem:[%s7064_s5 + $0x1b0] sm:$0xff] %v4327_v39 }
 0x20a   : > { %1750 = vst [vmem:[%s7064_s5 + $0x1c0] sm:$0xff] %v4331_v58  ;;  %1752 = vst [vmem:[%s7064_s5 + $0x1d0] sm:$0xff] %v4335_v25 }
 0x20b   : > { %1754 = vst [vmem:[%s7064_s5 + $0x1e0] sm:$0xff] %v4339_v45  ;;  %1756 = vst [vmem:[%s7064_s5 + $0x1f0] sm:$0xff] %v4343_v3 }
 0x20c   : > { %1695 = vst.msk [vmem:[%s7064_s5 + $0x8] sm:$0xff] %vm1694_vm0, %v4221_v5  ;;  %1697 = vst.msk [vmem:[%s7064_s5 + $0x18] sm:$0xff] %vm1694_vm0, %v4225_v11 }
 0x20d   : > { %1699 = vst.msk [vmem:[%s7064_s5 + $0x28] sm:$0xff] %vm1694_vm0, %v4229_v17  ;;  %1701 = vst.msk [vmem:[%s7064_s5 + $0x38] sm:$0xff] %vm1694_vm0, %v4233_v23 }
 0x20e   : > { %1703 = vst.msk [vmem:[%s7064_s5 + $0x48] sm:$0xff] %vm1694_vm0, %v4237_v29  ;;  %1705 = vst.msk [vmem:[%s7064_s5 + $0x58] sm:$0xff] %vm1694_vm0, %v4241_v35 }
 0x20f   : > { %1707 = vst.msk [vmem:[%s7064_s5 + $0x68] sm:$0xff] %vm1694_vm0, %v4245_v41  ;;  %1709 = vst.msk [vmem:[%s7064_s5 + $0x78] sm:$0xff] %vm1694_vm0, %v4249_v47 }
 0x210   : > { %1711 = vst.msk [vmem:[%s7064_s5 + $0x88] sm:$0xff] %vm1694_vm0, %v4253_v53  ;;  %1713 = vst.msk [vmem:[%s7064_s5 + $0x98] sm:$0xff] %vm1694_vm0, %v4257_v59 }
 0x211   : > { %1715 = vst.msk [vmem:[%s7064_s5 + $0xa8] sm:$0xff] %vm1694_vm0, %v4261_v1  ;;  %1717 = vst.msk [vmem:[%s7064_s5 + $0xb8] sm:$0xff] %vm1694_vm0, %v4265_v10 }
 0x212   : > { %1719 = vst.msk [vmem:[%s7064_s5 + $0xc8] sm:$0xff] %vm1694_vm0, %v4269_v19  ;;  %1721 = vst.msk [vmem:[%s7064_s5 + $0xd8] sm:$0xff] %vm1694_vm0, %v4273_v28 }
 0x213   : > { %1723 = vst.msk [vmem:[%s7064_s5 + $0xe8] sm:$0xff] %vm1694_vm0, %v4277_v37  ;;  %1725 = vst.msk [vmem:[%s7064_s5 + $0xf8] sm:$0xff] %vm1694_vm0, %v4281_v46 }
 0x214   : > { %1727 = vst.msk [vmem:[%s7064_s5 + $0x108] sm:$0xff] %vm1694_vm0, %v4285_v55  ;;  %1729 = vst.msk [vmem:[%s7064_s5 + $0x118] sm:$0xff] %vm1694_vm0, %v4289_v0 }
 0x215   : > { %1731 = vst.msk [vmem:[%s7064_s5 + $0x128] sm:$0xff] %vm1694_vm0, %v7137_v13  ;;  %1733 = vst.msk [vmem:[%s7064_s5 + $0x138] sm:$0xff] %vm1694_vm0, %v7138_v27 }
 0x216   : > { %1735 = vst.msk [vmem:[%s7064_s5 + $0x148] sm:$0xff] %vm1694_vm0, %v7139_v30  ;;  %1737 = vst.msk [vmem:[%s7064_s5 + $0x158] sm:$0xff] %vm1694_vm0, %v7140_v49 }
 0x217   : > { %1739 = vst.msk [vmem:[%s7064_s5 + $0x168] sm:$0xff] %vm1694_vm0, %v7141_v9  ;;  %1741 = vst.msk [vmem:[%s7064_s5 + $0x178] sm:$0xff] %vm1694_vm0, %v7142_v12 }
 0x218   : > { %1743 = vst.msk [vmem:[%s7064_s5 + $0x188] sm:$0xff] %vm1694_vm0, %v7143_v22  ;;  %1745 = vst.msk [vmem:[%s7064_s5 + $0x198] sm:$0xff] %vm1694_vm0, %v7144_v31 }
 0x219   : > { %1747 = vst.msk [vmem:[%s7064_s5 + $0x1a8] sm:$0xff] %vm1694_vm0, %v7145_v43  ;;  %1749 = vst.msk [vmem:[%s7064_s5 + $0x1b8] sm:$0xff] %vm1694_vm0, %v7146_v52 }
 0x21a   : > { %1751 = vst.msk [vmem:[%s7064_s5 + $0x1c8] sm:$0xff] %vm1694_vm0, %v7147_v63  ;;  %1753 = vst.msk [vmem:[%s7064_s5 + $0x1d8] sm:$0xff] %vm1694_vm0, %v4337_v4 }
 0x21b   : > { %1755 = vst.msk [vmem:[%s7064_s5 + $0x1e8] sm:$0xff] %vm1694_vm0, %v4341_v54  ;;  %1757 = vst.msk [vmem:[%s7064_s5 + $0x1f8] sm:$0xff] %vm1694_vm0, %v4345_v40 }
 0x21c PF: > { %p3314_p10 = scmp.le.s32.totalorder %s3539_s21, 0 }
 0x21e   : > { %1761 = sbr.rel (%p3314_p10) target bundleno = 585 (0x249), region = 71 }
 0x223   : > { %v1762_v13 = vld [vmem:[%s7064_s5] sm:$0xff]  ;;  %v1763_v27 = vld [vmem:[%s7064_s5 + $0x8] sm:$0xff]  ;;  %vm1891_vm1 = vcmask 556032   ;;  %v1764_v30 = vld [vmem:[%s7064_s5 + $0x10] sm:$0xff] }
 0x224   : > { %v1826_v49 = vadd.f32 %v1762_v13, %v4219_v2  ;;  %v1827_v9 = vadd.f32 %v1763_v27, %v4221_v5  ;;  %v1828_v12 = vadd.f32 %v1764_v30, %v4223_v8  ;;  %v1765_v22 = vld [vmem:[%s7064_s5 + $0x18] sm:$0xff]  ;;  %v1766_v31 = vld [vmem:[%s7064_s5 + $0x20] sm:$0xff]  ;;  %v1767_v43 = vld [vmem:[%s7064_s5 + $0x28] sm:$0xff] }
 0x225   : > { %v1829_v52 = vadd.f32 %v1765_v22, %v4225_v11  ;;  %v1830_v2 = vadd.f32 %v1766_v31, %v4227_v14  ;;  %v1831_v5 = vadd.f32 %v1767_v43, %v4229_v17  ;;  %v1768_v8 = vld [vmem:[%s7064_s5 + $0x30] sm:$0xff]  ;;  %v1769_v63 = vld [vmem:[%s7064_s5 + $0x38] sm:$0xff]  ;;  %v1770_v13 = vld [vmem:[%s7064_s5 + $0x40] sm:$0xff] }
 0x226   : > { %1890 = vst [vmem:[%s7064_s5] sm:$0xff] %v1826_v49  ;;  %1892 = vst.msk [vmem:[%s7064_s5 + $0x8] sm:$0xff] %vm1891_vm1, %v1827_v9  ;;  %v1832_v11 = vadd.f32 %v1768_v8, %v4231_v20  ;;  %v1833_v14 = vadd.f32 %v1769_v63, %v4233_v23  ;;  %v1834_v17 = vadd.f32 %v1770_v13, %v4235_v26  ;;  %v1771_v27 = vld [vmem:[%s7064_s5 + $0x48] sm:$0xff]  ;;  %v1772_v30 = vld [vmem:[%s7064_s5 + $0x50] sm:$0xff] }
 0x227   : > { %1893 = vst [vmem:[%s7064_s5 + $0x10] sm:$0xff] %v1828_v12  ;;  %v1773_v49 = vld [vmem:[%s7064_s5 + $0x58] sm:$0xff]  ;;  %1894 = vst.msk [vmem:[%s7064_s5 + $0x18] sm:$0xff] %vm1891_vm1, %v1829_v52  ;;  %v1835_v20 = vadd.f32 %v1771_v27, %v4237_v29  ;;  %v1836_v23 = vadd.f32 %v1772_v30, %v4239_v32  ;;  %v1774_v9 = vld [vmem:[%s7064_s5 + $0x60] sm:$0xff] }
 0x228   : > { %1895 = vst [vmem:[%s7064_s5 + $0x20] sm:$0xff] %v1830_v2  ;;  %1896 = vst.msk [vmem:[%s7064_s5 + $0x28] sm:$0xff] %vm1891_vm1, %v1831_v5  ;;  %v1837_v26 = vadd.f32 %v1773_v49, %v4241_v35  ;;  %v1775_v12 = vld [vmem:[%s7064_s5 + $0x68] sm:$0xff]  ;;  %v1776_v22 = vld [vmem:[%s7064_s5 + $0x70] sm:$0xff]  ;;  %v1838_v29 = vadd.f32 %v1774_v9, %v4243_v38 }
 0x229   : > { %1897 = vst [vmem:[%s7064_s5 + $0x30] sm:$0xff] %v1832_v11  ;;  %1898 = vst.msk [vmem:[%s7064_s5 + $0x38] sm:$0xff] %vm1891_vm1, %v1833_v14  ;;  %v1839_v32 = vadd.f32 %v1775_v12, %v4245_v41  ;;  %v1840_v35 = vadd.f32 %v1776_v22, %v4247_v44  ;;  %v1777_v31 = vld [vmem:[%s7064_s5 + $0x78] sm:$0xff]  ;;  %v1778_v43 = vld [vmem:[%s7064_s5 + $0x80] sm:$0xff] }
 0x22a   : > { %1899 = vst [vmem:[%s7064_s5 + $0x40] sm:$0xff] %v1834_v17  ;;  %v1779_v52 = vld [vmem:[%s7064_s5 + $0x88] sm:$0xff]  ;;  %1900 = vst.msk [vmem:[%s7064_s5 + $0x48] sm:$0xff] %vm1891_vm1, %v1835_v20  ;;  %v1841_v38 = vadd.f32 %v1777_v31, %v4249_v47  ;;  %v1842_v41 = vadd.f32 %v1778_v43, %v4251_v50  ;;  %v1780_v2 = vld [vmem:[%s7064_s5 + $0x90] sm:$0xff] }
 0x22b   : > { %1901 = vst [vmem:[%s7064_s5 + $0x50] sm:$0xff] %v1836_v23  ;;  %1902 = vst.msk [vmem:[%s7064_s5 + $0x58] sm:$0xff] %vm1891_vm1, %v1837_v26  ;;  %v1843_v44 = vadd.f32 %v1779_v52, %v4253_v53  ;;  %v1781_v5 = vld [vmem:[%s7064_s5 + $0x98] sm:$0xff]  ;;  %v1782_v8 = vld [vmem:[%s7064_s5 + $0xa0] sm:$0xff]  ;;  %v1844_v47 = vadd.f32 %v1780_v2, %v4255_v56 }
 0x22c   : > { %1903 = vst [vmem:[%s7064_s5 + $0x60] sm:$0xff] %v1838_v29  ;;  %1904 = vst.msk [vmem:[%s7064_s5 + $0x68] sm:$0xff] %vm1891_vm1, %v1839_v32  ;;  %v1845_v50 = vadd.f32 %v1781_v5, %v4257_v59  ;;  %v1846_v53 = vadd.f32 %v1782_v8, %v4259_v62  ;;  %v1783_v63 = vld [vmem:[%s7064_s5 + $0xa8] sm:$0xff]  ;;  %v1784_v13 = vld [vmem:[%s7064_s5 + $0xb0] sm:$0xff] }
 0x22d   : > { %1905 = vst [vmem:[%s7064_s5 + $0x70] sm:$0xff] %v1840_v35  ;;  %v1785_v11 = vld [vmem:[%s7064_s5 + $0xb8] sm:$0xff]  ;;  %1906 = vst.msk [vmem:[%s7064_s5 + $0x78] sm:$0xff] %vm1891_vm1, %v1841_v38  ;;  %v1847_v56 = vadd.f32 %v1783_v63, %v4261_v1  ;;  %v1848_v59 = vadd.f32 %v1784_v13, %v4263_v6  ;;  %v1786_v14 = vld [vmem:[%s7064_s5 + $0xc0] sm:$0xff] }
 0x22e   : > { %1907 = vst [vmem:[%s7064_s5 + $0x80] sm:$0xff] %v1842_v41  ;;  %1908 = vst.msk [vmem:[%s7064_s5 + $0x88] sm:$0xff] %vm1891_vm1, %v1843_v44  ;;  %v1849_v62 = vadd.f32 %v1785_v11, %v4265_v10  ;;  %v1787_v17 = vld [vmem:[%s7064_s5 + $0xc8] sm:$0xff]  ;;  %v1788_v27 = vld [vmem:[%s7064_s5 + $0xd0] sm:$0xff]  ;;  %v1850_v1 = vadd.f32 %v1786_v14, %v4267_v15 }
 0x22f   : > { %1909 = vst [vmem:[%s7064_s5 + $0x90] sm:$0xff] %v1844_v47  ;;  %1910 = vst.msk [vmem:[%s7064_s5 + $0x98] sm:$0xff] %vm1891_vm1, %v1845_v50  ;;  %v1851_v6 = vadd.f32 %v1787_v17, %v4269_v19  ;;  %v1852_v10 = vadd.f32 %v1788_v27, %v4271_v24  ;;  %v1789_v30 = vld [vmem:[%s7064_s5 + $0xd8] sm:$0xff]  ;;  %v1790_v49 = vld [vmem:[%s7064_s5 + $0xe0] sm:$0xff] }
 0x230   : > { %1911 = vst [vmem:[%s7064_s5 + $0xa0] sm:$0xff] %v1846_v53  ;;  %v1791_v20 = vld [vmem:[%s7064_s5 + $0xe8] sm:$0xff]  ;;  %1912 = vst.msk [vmem:[%s7064_s5 + $0xa8] sm:$0xff] %vm1891_vm1, %v1847_v56  ;;  %v1853_v15 = vadd.f32 %v1789_v30, %v4273_v28  ;;  %v1854_v19 = vadd.f32 %v1790_v49, %v4275_v33  ;;  %v1792_v23 = vld [vmem:[%s7064_s5 + $0xf0] sm:$0xff] }
 0x231   : > { %1913 = vst [vmem:[%s7064_s5 + $0xb0] sm:$0xff] %v1848_v59  ;;  %1914 = vst.msk [vmem:[%s7064_s5 + $0xb8] sm:$0xff] %vm1891_vm1, %v1849_v62  ;;  %v1855_v24 = vadd.f32 %v1791_v20, %v4277_v37  ;;  %v1793_v26 = vld [vmem:[%s7064_s5 + $0xf8] sm:$0xff]  ;;  %v1794_v9 = vld [vmem:[%s7064_s5 + $0x100] sm:$0xff]  ;;  %v1856_v28 = vadd.f32 %v1792_v23, %v4279_v42 }
 0x232   : > { %1915 = vst [vmem:[%s7064_s5 + $0xc0] sm:$0xff] %v1850_v1  ;;  %1916 = vst.msk [vmem:[%s7064_s5 + $0xc8] sm:$0xff] %vm1891_vm1, %v1851_v6  ;;  %v1857_v33 = vadd.f32 %v1793_v26, %v4281_v46  ;;  %v1858_v37 = vadd.f32 %v1794_v9, %v4283_v51  ;;  %v1795_v12 = vld [vmem:[%s7064_s5 + $0x108] sm:$0xff]  ;;  %v1796_v22 = vld [vmem:[%s7064_s5 + $0x110] sm:$0xff] }
 0x233   : > { %1917 = vst [vmem:[%s7064_s5 + $0xd0] sm:$0xff] %v1852_v10  ;;  %v1797_v29 = vld [vmem:[%s7064_s5 + $0x118] sm:$0xff]  ;;  %1918 = vst.msk [vmem:[%s7064_s5 + $0xd8] sm:$0xff] %vm1891_vm1, %v1853_v15  ;;  %v1859_v42 = vadd.f32 %v1795_v12, %v4285_v55  ;;  %v1860_v46 = vadd.f32 %v1796_v22, %v4287_v60  ;;  %v1798_v32 = vld [vmem:[%s7064_s5 + $0x120] sm:$0xff] }
 0x234   : > { %1919 = vst [vmem:[%s7064_s5 + $0xe0] sm:$0xff] %v1854_v19  ;;  %1920 = vst.msk [vmem:[%s7064_s5 + $0xe8] sm:$0xff] %vm1891_vm1, %v1855_v24  ;;  %v1861_v51 = vadd.f32 %v1797_v29, %v4289_v0  ;;  %v1799_v35 = vld [vmem:[%s7064_s5 + $0x128] sm:$0xff]  ;;  %v1800_v31 = vld [vmem:[%s7064_s5 + $0x130] sm:$0xff]  ;;  %v1862_v55 = vadd.f32 %v1798_v32, %v4291_v7 }
 0x235   : > { %1921 = vst [vmem:[%s7064_s5 + $0xf0] sm:$0xff] %v1856_v28  ;;  %1922 = vst.msk [vmem:[%s7064_s5 + $0xf8] sm:$0xff] %vm1891_vm1, %v1857_v33  ;;  %v7148_v60 = vld [vmem:[#allocation3_spill] sm:$0xff]  ;;  %v1864_v43 = vadd.f32 %v1800_v31, %v4295_v21  ;;  %v1801_v52 = vld [vmem:[%s7064_s5 + $0x138] sm:$0xff] }
 0x236   : > { %1923 = vst [vmem:[%s7064_s5 + $0x100] sm:$0xff] %v1858_v37  ;;  %v1863_v0 = vadd.f32 %v1799_v35, %v7148_v60  ;;  %v1802_v38 = vld [vmem:[%s7064_s5 + $0x140] sm:$0xff]  ;;  %v1803_v41 = vld [vmem:[%s7064_s5 + $0x148] sm:$0xff]  ;;  %1924 = vst.msk [vmem:[%s7064_s5 + $0x108] sm:$0xff] %vm1891_vm1, %v1859_v42 }
 0x237   : > { %1925 = vst [vmem:[%s7064_s5 + $0x110] sm:$0xff] %v1860_v46  ;;  %1926 = vst.msk [vmem:[%s7064_s5 + $0x118] sm:$0xff] %vm1891_vm1, %v1861_v51  ;;  %v7149_v7 = vld [vmem:[#allocation4_spill] sm:$0xff]  ;;  %v1866_v44 = vadd.f32 %v1802_v38, %v4299_v34  ;;  %v7150_v2 = vld [vmem:[#allocation5_spill] sm:$0xff] }
 0x238   : > { %v1865_v21 = vadd.f32 %v1801_v52, %v7149_v7  ;;  %v1867_v5 = vadd.f32 %v1803_v41, %v7150_v2  ;;  %v1804_v8 = vld [vmem:[%s7064_s5 + $0x150] sm:$0xff]  ;;  %v1805_v47 = vld [vmem:[%s7064_s5 + $0x158] sm:$0xff]  ;;  %v1806_v50 = vld [vmem:[%s7064_s5 + $0x160] sm:$0xff]  ;;  %1927 = vst [vmem:[%s7064_s5 + $0x120] sm:$0xff] %v1862_v55 }
 0x239   : > { %1928 = vst.msk [vmem:[%s7064_s5 + $0x128] sm:$0xff] %vm1891_vm1, %v1863_v0  ;;  %1929 = vst [vmem:[%s7064_s5 + $0x130] sm:$0xff] %v1864_v43  ;;  %v1868_v34 = vadd.f32 %v1804_v8, %v4303_v48  ;;  %v7151_v53 = vld [vmem:[#allocation6_spill] sm:$0xff]  ;;  %v1870_v13 = vadd.f32 %v1806_v50, %v4307_v61  ;;  %v1807_v11 = vld [vmem:[%s7064_s5 + $0x168] sm:$0xff] }
 0x23a   : > { %v1869_v63 = vadd.f32 %v1805_v47, %v7151_v53  ;;  %v1808_v56 = vld [vmem:[%s7064_s5 + $0x170] sm:$0xff]  ;;  %v1809_v59 = vld [vmem:[%s7064_s5 + $0x178] sm:$0xff]  ;;  %1930 = vst.msk [vmem:[%s7064_s5 + $0x138] sm:$0xff] %vm1891_vm1, %v1865_v21  ;;  %1931 = vst [vmem:[%s7064_s5 + $0x140] sm:$0xff] %v1866_v44 }
 0x23b   : > { %1932 = vst.msk [vmem:[%s7064_s5 + $0x148] sm:$0xff] %vm1891_vm1, %v1867_v5  ;;  %v7152_v48 = vld [vmem:[#allocation7_spill] sm:$0xff]  ;;  %v1872_v62 = vadd.f32 %v1808_v56, %v4311_v16  ;;  %v7153_v14 = vld [vmem:[#allocation8_spill] sm:$0xff]  ;;  %v1812_v6 = vld [vmem:[%s7064_s5 + $0x190] sm:$0xff] }
 0x23c   : > { %v1871_v61 = vadd.f32 %v1807_v11, %v7152_v48  ;;  %v1873_v17 = vadd.f32 %v1809_v59, %v7153_v14  ;;  %v1810_v27 = vld [vmem:[%s7064_s5 + $0x180] sm:$0xff]  ;;  %v1811_v1 = vld [vmem:[%s7064_s5 + $0x188] sm:$0xff]  ;;  %1933 = vst [vmem:[%s7064_s5 + $0x150] sm:$0xff] %v1868_v34  ;;  %1934 = vst.msk [vmem:[%s7064_s5 + $0x158] sm:$0xff] %vm1891_vm1, %v1869_v63  ;;  %v1876_v49 = vadd.f32 %v1812_v6, %v4319_v57 }
 0x23d   : > { %1935 = vst [vmem:[%s7064_s5 + $0x160] sm:$0xff] %v1870_v13  ;;  %v1874_v16 = vadd.f32 %v1810_v27, %v4315_v36  ;;  %v7154_v10 = vld [vmem:[#allocation9_spill] sm:$0xff]  ;;  %v1813_v20 = vld [vmem:[%s7064_s5 + $0x198] sm:$0xff]  ;;  %v1814_v15 = vld [vmem:[%s7064_s5 + $0x1a0] sm:$0xff] }
 0x23e   : > { %v1875_v30 = vadd.f32 %v1811_v1, %v7154_v10  ;;  %v1815_v19 = vld [vmem:[%s7064_s5 + $0x1a8] sm:$0xff]  ;;  %1936 = vst.msk [vmem:[%s7064_s5 + $0x168] sm:$0xff] %vm1891_vm1, %v1871_v61  ;;  %1937 = vst [vmem:[%s7064_s5 + $0x170] sm:$0xff] %v1872_v62  ;;  %v7155_v36 = vld [vmem:[#allocation10_spill] sm:$0xff]  ;;  %v1878_v24 = vadd.f32 %v1814_v15, %v4323_v18 }
 0x23f   : > { %1938 = vst.msk [vmem:[%s7064_s5 + $0x178] sm:$0xff] %vm1891_vm1, %v1873_v17  ;;  %v1877_v57 = vadd.f32 %v1813_v20, %v7155_v36  ;;  %v7156_v23 = vld [vmem:[#allocation11_spill] sm:$0xff]  ;;  %v1816_v9 = vld [vmem:[%s7064_s5 + $0x1b0] sm:$0xff]  ;;  %v1817_v28 = vld [vmem:[%s7064_s5 + $0x1b8] sm:$0xff] }
 0x240   : > { %v1879_v26 = vadd.f32 %v1815_v19, %v7156_v23  ;;  %v1818_v33 = vld [vmem:[%s7064_s5 + $0x1c0] sm:$0xff]  ;;  %1939 = vst [vmem:[%s7064_s5 + $0x180] sm:$0xff] %v1874_v16  ;;  %1940 = vst.msk [vmem:[%s7064_s5 + $0x188] sm:$0xff] %vm1891_vm1, %v1875_v30  ;;  %v1880_v18 = vadd.f32 %v1816_v9, %v4327_v39  ;;  %v7157_v37 = vld [vmem:[#allocation12_spill] sm:$0xff] }
 0x241   : > { %1941 = vst [vmem:[%s7064_s5 + $0x190] sm:$0xff] %v1876_v49  ;;  %v1881_v12 = vadd.f32 %v1817_v28, %v7157_v37  ;;  %v1882_v22 = vadd.f32 %v1818_v33, %v4331_v58  ;;  %v1819_v29 = vld [vmem:[%s7064_s5 + $0x1c8] sm:$0xff]  ;;  %v1820_v42 = vld [vmem:[%s7064_s5 + $0x1d0] sm:$0xff]  ;;  %v1821_v46 = vld [vmem:[%s7064_s5 + $0x1d8] sm:$0xff] }
 0x242   : > { %1942 = vst.msk [vmem:[%s7064_s5 + $0x198] sm:$0xff] %vm1891_vm1, %v1877_v57  ;;  %1943 = vst [vmem:[%s7064_s5 + $0x1a0] sm:$0xff] %v1878_v24  ;;  %v7158_v39 = vld [vmem:[#allocation13_spill] sm:$0xff]  ;;  %v1884_v51 = vadd.f32 %v1820_v42, %v4335_v25  ;;  %v1885_v32 = vadd.f32 %v1821_v46, %v4337_v4  ;;  %v1822_v35 = vld [vmem:[%s7064_s5 + $0x1e0] sm:$0xff] }
 0x243   : > { %1944 = vst.msk [vmem:[%s7064_s5 + $0x1a8] sm:$0xff] %vm1891_vm1, %v1879_v26  ;;  %v1883_v58 = vadd.f32 %v1819_v29, %v7158_v39  ;;  %v1823_v31 = vld [vmem:[%s7064_s5 + $0x1e8] sm:$0xff]  ;;  %v1824_v55 = vld [vmem:[%s7064_s5 + $0x1f0] sm:$0xff]  ;;  %1945 = vst [vmem:[%s7064_s5 + $0x1b0] sm:$0xff] %v1880_v18  ;;  %v1886_v25 = vadd.f32 %v1822_v35, %v4339_v45 }
 0x244   : > { %1946 = vst.msk [vmem:[%s7064_s5 + $0x1b8] sm:$0xff] %vm1891_vm1, %v1881_v12  ;;  %1947 = vst [vmem:[%s7064_s5 + $0x1c0] sm:$0xff] %v1882_v22  ;;  %v1887_v4 = vadd.f32 %v1823_v31, %v4341_v54  ;;  %v1888_v60 = vadd.f32 %v1824_v55, %v4343_v3  ;;  %v1825_v0 = vld [vmem:[%s7064_s5 + $0x1f8] sm:$0xff] }
 0x245   : > { %1948 = vst.msk [vmem:[%s7064_s5 + $0x1c8] sm:$0xff] %vm1891_vm1, %v1883_v58  ;;  %1949 = vst [vmem:[%s7064_s5 + $0x1d0] sm:$0xff] %v1884_v51  ;;  %v1889_v45 = vadd.f32 %v1825_v0, %v4345_v40 }
 0x246   : > { %1950 = vst.msk [vmem:[%s7064_s5 + $0x1d8] sm:$0xff] %vm1891_vm1, %v1885_v32  ;;  %1951 = vst [vmem:[%s7064_s5 + $0x1e0] sm:$0xff] %v1886_v25 }
 0x247   : > { %1952 = vst.msk [vmem:[%s7064_s5 + $0x1e8] sm:$0xff] %vm1891_vm1, %v1887_v4  ;;  %1953 = vst [vmem:[%s7064_s5 + $0x1f0] sm:$0xff] %v1888_v60 }
 0x248   : > { %1954 = vst.msk [vmem:[%s7064_s5 + $0x1f8] sm:$0xff] %vm1891_vm1, %v1889_v45 }
 0x249 PF: > { %p3315_p11 = scmp.ne.s32.totalorder %s3539_s21, 1 }
 0x24b   : > { %1958 = sbr.rel (%p3315_p11) target bundleno = 1004 (0x3ec), region = 75 }
 0x250   : > { %v5121_v54 = vld [vmem:[%s7064_s5 + $0x20] sm:$0xff]  ;;  %v5126_v3 = vld [vmem:[%s7064_s5 + $0x28] sm:$0xff]  ;;  %vm2023_vm2 = vcmask 556032   ;;  %v5143_v38 = vld [vmem:[%s7064_s5 + $0x30] sm:$0xff] }
 0x251   : > { %v5131_v40 = vld [vmem:[%s7064_s5] sm:$0xff]  ;;  %v2032_v43 = vsel %vm2023_vm2, %v5126_v3, 0.0  ;;  %v5138_v52 = vld [vmem:[%s7064_s5 + $0x8] sm:$0xff]  ;;  %v5148_v41 = vld [vmem:[%s7064_s5 + $0x38] sm:$0xff] }
 0x252   : > { %v2033_v7 = vadd.f32 %v2032_v43, %v5121_v54  ;;  %v2024_v21 = vsel %vm2023_vm2, %v5138_v52, 0.0  ;;  %v2036_v44 = vsel %vm2023_vm2, %v5148_v41, 0.0  ;;  %v5158_v2 = vld [vmem:[%s7064_s5 + $0x10] sm:$0xff]  ;;  %v5163_v5 = vld [vmem:[%s7064_s5 + $0x18] sm:$0xff]  ;;  %v5176_v34 = vld [vmem:[%s7064_s5 + $0x48] sm:$0xff] }
 0x253   : > { %v2025_v8 = vadd.f32 %v2024_v21, %v5131_v40  ;;  %v2028_v47 = vsel %vm2023_vm2, %v5163_v5, 0.0  ;;  %v5171_v50 = vld [vmem:[%s7064_s5 + $0x58] sm:$0xff]  ;;  %v2037_v53 = vadd.f32 %v2036_v44, %v5143_v38  ;;  %v5183_v13 = vld [vmem:[%s7064_s5 + $0x50] sm:$0xff]  ;;  %v5190_v56 = vld [vmem:[%s7064_s5 + $0x40] sm:$0xff]  ;;  %v2040_v59 = vsel %vm2023_vm2, %v5176_v34, 0.0 }
 0x254   : > { %2034 = vadd.xlane.f32.xlu1 %v2033_v7  ;;  %v2029_v63 = vadd.f32 %v2028_v47, %v5158_v2  ;;  %v2044_v11 = vsel %vm2023_vm2, %v5171_v50, 0.0  ;;  %v5197_v48 = vld [vmem:[%s7064_s5 + $0x78] sm:$0xff]  ;;  %v5202_v61 = vld [vmem:[%s7064_s5 + $0x68] sm:$0xff]  ;;  %v2041_v14 = vadd.f32 %v2040_v59, %v5190_v56  ;;  %v5209_v17 = vld [vmem:[%s7064_s5 + $0x70] sm:$0xff] }
 0x255   : > { %2026 = vadd.xlane.f32.xlu0 %v2025_v8  ;;  %v2045_v62 = vadd.f32 %v2044_v11, %v5183_v13  ;;  %v2052_v27 = vsel %vm2023_vm2, %v5197_v48, 0.0  ;;  %v5216_v1 = vld [vmem:[%s7064_s5 + $0x60] sm:$0xff]  ;;  %v2048_v6 = vsel %vm2023_vm2, %v5202_v61, 0.0  ;;  %v5223_v16 = vld [vmem:[%s7064_s5 + $0x98] sm:$0xff]  ;;  %v5228_v10 = vld [vmem:[%s7064_s5 + $0x88] sm:$0xff] }
 0x256   : > { %v2053_v30 = vadd.f32 %v2052_v27, %v5209_v17  ;;  %v2049_v49 = vadd.f32 %v2048_v6, %v5216_v1  ;;  %v5235_v20 = vld [vmem:[%s7064_s5 + $0x90] sm:$0xff]  ;;  %v2060_v15 = vsel %vm2023_vm2, %v5223_v16, 0.0  ;;  %v5242_v19 = vld [vmem:[%s7064_s5 + $0x80] sm:$0xff]  ;;  %v2056_v36 = vsel %vm2023_vm2, %v5228_v10, 0.0  ;;  %v5249_v57 = vld [vmem:[%s7064_s5 + $0xb8] sm:$0xff] }
 0x257   : > { %v5254_v24 = vld [vmem:[%s7064_s5 + $0xa8] sm:$0xff]  ;;  %v2061_v23 = vadd.f32 %v2060_v15, %v5235_v20  ;;  %v2057_v26 = vadd.f32 %v2056_v36, %v5242_v19  ;;  %v5261_v9 = vld [vmem:[%s7064_s5 + $0xb0] sm:$0xff]  ;;  %v2068_v28 = vsel %vm2023_vm2, %v5249_v57, 0.0  ;;  %v5268_v33 = vld [vmem:[%s7064_s5 + $0xa0] sm:$0xff] }
 0x258   : > { %2038 = vadd.xlane.f32.xlu1 %v2037_v53  ;;  %v2064_v18 = vsel %vm2023_vm2, %v5254_v24, 0.0  ;;  %v5275_v37 = vld [vmem:[%s7064_s5 + $0xd8] sm:$0xff]  ;;  %v5280_v12 = vld [vmem:[%s7064_s5 + $0xc8] sm:$0xff]  ;;  %v2069_v22 = vadd.f32 %v2068_v28, %v5261_v9  ;;  %v5287_v42 = vld [vmem:[%s7064_s5 + $0xd0] sm:$0xff] }
 0x259   : > { %2030 = vadd.xlane.f32.xlu0 %v2029_v63  ;;  %v2065_v29 = vadd.f32 %v2064_v18, %v5268_v33  ;;  %v2076_v46 = vsel %vm2023_vm2, %v5275_v37, 0.0  ;;  %v5294_v39 = vld [vmem:[%s7064_s5 + $0xc0] sm:$0xff]  ;;  %v2072_v58 = vsel %vm2023_vm2, %v5280_v12, 0.0  ;;  %v5301_v51 = vld [vmem:[%s7064_s5 + $0xf8] sm:$0xff]  ;;  %v5306_v32 = vld [vmem:[%s7064_s5 + $0xe8] sm:$0xff] }
 0x25a   : > { %v2077_v35 = vadd.f32 %v2076_v46, %v5287_v42  ;;  %v2073_v31 = vadd.f32 %v2072_v58, %v5294_v39  ;;  %v5313_v55 = vld [vmem:[%s7064_s5 + $0xf0] sm:$0xff]  ;;  %v2084_v25 = vsel %vm2023_vm2, %v5301_v51, 0.0  ;;  %v5320_v4 = vld [vmem:[%s7064_s5 + $0xe0] sm:$0xff]  ;;  %v2080_v60 = vsel %vm2023_vm2, %v5306_v32, 0.0  ;;  %v5327_v0 = vld [vmem:[%s7064_s5 + $0x118] sm:$0xff] }
 0x25b   : > { %v5332_v45 = vld [vmem:[%s7064_s5 + $0x108] sm:$0xff]  ;;  %v2085_v43 = vadd.f32 %v2084_v25, %v5313_v55  ;;  %v2081_v7 = vadd.f32 %v2080_v60, %v5320_v4  ;;  %v5339_v21 = vld [vmem:[%s7064_s5 + $0x110] sm:$0xff]  ;;  %v2092_v44 = vsel %vm2023_vm2, %v5327_v0, 0.0  ;;  %v5346_v8 = vld [vmem:[%s7064_s5 + $0x100] sm:$0xff] }
 0x25c   : > { %2046 = vadd.xlane.f32.xlu1 %v2045_v62  ;;  %v2088_v47 = vsel %vm2023_vm2, %v5332_v45, 0.0  ;;  %v5353_v53 = vld [vmem:[%s7064_s5 + $0x138] sm:$0xff]  ;;  %v5358_v63 = vld [vmem:[%s7064_s5 + $0x128] sm:$0xff]  ;;  %v2093_v11 = vadd.f32 %v2092_v44, %v5339_v21  ;;  %v5365_v62 = vld [vmem:[%s7064_s5 + $0x130] sm:$0xff] }
 0x25d   : > { %2042 = vadd.xlane.f32.xlu0 %v2041_v14  ;;  %v2089_v59 = vadd.f32 %v2088_v47, %v5346_v8  ;;  %v2100_v14 = vsel %vm2023_vm2, %v5353_v53, 0.0  ;;  %v5372_v27 = vld [vmem:[%s7064_s5 + $0x120] sm:$0xff]  ;;  %v2096_v6 = vsel %vm2023_vm2, %v5358_v63, 0.0 }
 0x25e   : > { %v2101_v15 = vadd.f32 %v2100_v14, %v5365_v62  ;;  %v2097_v36 = vadd.f32 %v2096_v6, %v5372_v27  ;;  %v5398_v28 = vld [vmem:[%s7064_s5 + $0x140] sm:$0xff] }
 0x25f   : > { %v5424_v25 = vld [vmem:[%s7064_s5 + $0x160] sm:$0xff] }
 0x260   : > { %2054 = vadd.xlane.f32.xlu1 %v2053_v30  ;;  %v5379_v30 = vld [vmem:[%s7064_s5 + $0x158] sm:$0xff]  ;;  %v5450_v14 = vld [vmem:[%s7064_s5 + $0x180] sm:$0xff] }
 0x261   : > { %2050 = vadd.xlane.f32.xlu0 %v2049_v49  ;;  %v5384_v49 = vld [vmem:[%s7064_s5 + $0x148] sm:$0xff]  ;;  %7160 = vst [vmem:[#allocation15_spill] sm:$0xff] %v5450_v14 }
 0x262   : > { %v2104_v18 = vsel %vm2023_vm2, %v5384_v49, 0.0 }
 0x263   : > { %v2105_v58 = vadd.f32 %v2104_v18, %v5398_v28  ;;  %v3492_v18 = vmov 0  }
 0x264   : > { %2062 = vadd.xlane.f32.xlu1 %v2061_v23  ;;  %v5391_v23 = vld [vmem:[%s7064_s5 + $0x150] sm:$0xff]  ;;  %3346 = vset.pattern.permute.xlu0 %v3492_v18 }
 0x265   : > { %2058 = vadd.xlane.f32.xlu0 %v2057_v26  ;;  %v2108_v26 = vsel %vm2023_vm2, %v5379_v30, 0.0  ;;  %3347 = vset.pattern.permute.xlu1 %v3492_v18 }
 0x266   : > { %v2109_v46 = vadd.f32 %v2108_v26, %v5391_v23 }
 0x268   : > { %2070 = vadd.xlane.f32.xlu1 %v2069_v22  ;;  %v5405_v22 = vld [vmem:[%s7064_s5 + $0x178] sm:$0xff] }
 0x269   : > { %2066 = vadd.xlane.f32.xlu0 %v2065_v29  ;;  %v5410_v29 = vld [vmem:[%s7064_s5 + $0x168] sm:$0xff] }
 0x26a   : > { %v2112_v60 = vsel %vm2023_vm2, %v5410_v29, 0.0 }
 0x26b   : > { %v2113_v47 = vadd.f32 %v2112_v60, %v5424_v25  ;;  %v5476_v60 = vld [vmem:[%s7064_s5 + $0x1a0] sm:$0xff] }
 0x26c   : > { %2078 = vadd.xlane.f32.xlu1 %v2077_v35  ;;  %v5417_v35 = vld [vmem:[%s7064_s5 + $0x170] sm:$0xff]  ;;  %7164 = vst [vmem:[#allocation19_spill] sm:$0xff] %v5476_v60 }
 0x26d   : > { %2074 = vadd.xlane.f32.xlu0 %v2073_v31  ;;  %v2116_v31 = vsel %vm2023_vm2, %v5405_v22, 0.0 }
 0x26e   : > { %v2117_v44 = vadd.f32 %v2116_v31, %v5417_v35 }
 0x270   : > { %2086 = vadd.xlane.f32.xlu1 %v2085_v43  ;;  %v5431_v43 = vld [vmem:[%s7064_s5 + $0x198] sm:$0xff] }
 0x271   : > { %2082 = vadd.xlane.f32.xlu0 %v2081_v7  ;;  %v5436_v7 = vld [vmem:[%s7064_s5 + $0x188] sm:$0xff] }
 0x272   : > { %v2120_v6 = vsel %vm2023_vm2, %v5436_v7, 0.0 }
 0x274   : > { %2094 = vadd.xlane.f32.xlu1 %v2093_v11  ;;  %v5443_v11 = vld [vmem:[%s7064_s5 + $0x190] sm:$0xff] }
 0x275   : > { %2090 = vadd.xlane.f32.xlu0 %v2089_v59  ;;  %7159 = vst [vmem:[#allocation14_spill] sm:$0xff] %v5443_v11  ;;  %v2124_v59 = vsel %vm2023_vm2, %v5431_v43, 0.0 }
 0x276   : > { %v2125_v26 = vadd.f32 %v2124_v59, %v5443_v11  ;;  %v5488_v59 = vld [vmem:[%s7064_s5 + $0x1c8] sm:$0xff] }
 0x277   : > { %7166 = vst [vmem:[#allocation21_spill] sm:$0xff] %v5488_v59 }
 0x278   : > { %2102 = vadd.xlane.f32.xlu1 %v2101_v15  ;;  %v5457_v15 = vld [vmem:[%s7064_s5 + $0x1b8] sm:$0xff] }
 0x279   : > { %2098 = vadd.xlane.f32.xlu0 %v2097_v36  ;;  %7161 = vst [vmem:[#allocation16_spill] sm:$0xff] %v5457_v15  ;;  %v5462_v36 = vld [vmem:[%s7064_s5 + $0x1a8] sm:$0xff]  ;;  %v2132_v31 = vsel %vm2023_vm2, %v5457_v15, 0.0 }
 0x27a   : > { %7162 = vst [vmem:[#allocation17_spill] sm:$0xff] %v5462_v36 }
 0x27c   : > { %2110 = vadd.xlane.f32.xlu1 %v2109_v46  ;;  %v2121_v46 = vadd.f32 %v2120_v6, %v5450_v14  ;;  %v5502_v14 = vld [vmem:[%s7064_s5 + $0x1c0] sm:$0xff] }
 0x27d   : > { %2106 = vadd.xlane.f32.xlu0 %v2105_v58  ;;  %v5469_v58 = vld [vmem:[%s7064_s5 + $0x1b0] sm:$0xff]  ;;  %7168 = vst [vmem:[#allocation23_spill] sm:$0xff] %v5502_v14 }
 0x27e   : > { %7163 = vst [vmem:[#allocation18_spill] sm:$0xff] %v5469_v58  ;;  %v2133_v6 = vadd.f32 %v2132_v31, %v5469_v58  ;;  %v5514_v31 = vld [vmem:[%s7064_s5 + $0x1e8] sm:$0xff]  ;;  %v2155_v58 = vmul.f32 %v5163_v5, %v5163_v5 }
 0x27f   : > { %7170 = vst [vmem:[#allocation25_spill] sm:$0xff] %v5514_v31 }
 0x280   : > { %2118 = vadd.xlane.f32.xlu1 %v2117_v44  ;;  %v2128_v44 = vsel %vm2023_vm2, %v5462_v36, 0.0  ;;  %v5495_v36 = vld [vmem:[%s7064_s5 + $0x1d0] sm:$0xff] }
 0x281   : > { %2114 = vadd.xlane.f32.xlu0 %v2113_v47  ;;  %v5483_v47 = vld [vmem:[%s7064_s5 + $0x1d8] sm:$0xff]  ;;  %v2129_v18 = vadd.f32 %v2128_v44, %v5476_v60  ;;  %7167 = vst [vmem:[#allocation22_spill] sm:$0xff] %v5495_v36 }
 0x282   : > { %7165 = vst [vmem:[#allocation20_spill] sm:$0xff] %v5483_v47  ;;  %v2140_v15 = vsel %vm2023_vm2, %v5483_v47, 0.0 }
 0x283   : > { %v2141_v44 = vadd.f32 %v2140_v15, %v5495_v36  ;;  %v2144_v15 = vsel %vm2023_vm2, %v5514_v31, 0.0  ;;  %v2152_v36 = vmul.f32 %v5131_v40, %v5131_v40  ;;  %v2159_v31 = vmul.f32 %v5148_v41, %v5148_v41 }
 0x284   : > { %2126 = vadd.xlane.f32.xlu1 %v2125_v26  ;;  %v2136_v26 = vsel %vm2023_vm2, %v5488_v59, 0.0  ;;  %v5521_v59 = vld [vmem:[%s7064_s5 + $0x1f0] sm:$0xff]  ;;  %v2156_v40 = vmul.f32 %v5121_v54, %v5121_v54  ;;  %v2163_v41 = vmul.f32 %v5171_v50, %v5171_v50  ;;  %v2160_v54 = vmul.f32 %v5190_v56, %v5190_v56 }
 0x285   : > { %2122 = vadd.xlane.f32.xlu0 %v2121_v46  ;;  %v5509_v46 = vld [vmem:[%s7064_s5 + $0x1f8] sm:$0xff]  ;;  %v2137_v47 = vadd.f32 %v2136_v26, %v5502_v14  ;;  %v2220_v14 = vsel %vm2023_vm2, %v2155_v58, 0.0  ;;  %v2228_v58 = vsel %vm2023_vm2, %v2159_v31, 0.0  ;;  %v2167_v50 = vmul.f32 %v5197_v48, %v5197_v48 }
 0x286   : > { %7169 = vst [vmem:[#allocation24_spill] sm:$0xff] %v5509_v46  ;;  %v2148_v60 = vsel %vm2023_vm2, %v5509_v46, 0.0  ;;  %v2154_v46 = vmul.f32 %v5158_v2, %v5158_v2  ;;  %v2158_v2 = vmul.f32 %v5143_v38, %v5143_v38  ;;  %v2162_v38 = vmul.f32 %v5183_v13, %v5183_v13 }
 0x287   : > { %v2149_v26 = vadd.f32 %v2148_v60, %v5521_v59  ;;  %v2166_v13 = vmul.f32 %v5209_v17, %v5209_v17  ;;  %v2164_v56 = vmul.f32 %v5216_v1, %v5216_v1  ;;  %v2171_v48 = vmul.f32 %v5223_v16, %v5223_v16 }
 0x288   : > { %2134 = vadd.xlane.f32.xlu1 %v2133_v6  ;;  %v5530_v6 = vld [vmem:[%s7064_s5 + $0x1e0] sm:$0xff]  ;;  %v2221_v60 = vadd.f32 %v2220_v14, %v2154_v46  ;;  %v2229_v14 = vadd.f32 %v2228_v58, %v2158_v2  ;;  %v2170_v17 = vmul.f32 %v5235_v20, %v5235_v20  ;;  %v2168_v1 = vmul.f32 %v5242_v19, %v5242_v19 }
 0x289   : > { %2130 = vadd.xlane.f32.xlu0 %v2129_v18  ;;  %v2153_v18 = vmul.f32 %v5138_v52, %v5138_v52  ;;  %v2145_v5 = vadd.f32 %v2144_v15, %v5530_v6  ;;  %v2157_v52 = vmul.f32 %v5126_v3, %v5126_v3  ;;  %v2161_v3 = vmul.f32 %v5176_v34, %v5176_v34 }
 0x28a   : > { %v2165_v34 = vmul.f32 %v5202_v61, %v5202_v61  ;;  %v2169_v61 = vmul.f32 %v5228_v10, %v5228_v10  ;;  %v2175_v16 = vmul.f32 %v5249_v57, %v5249_v57  ;;  %v2173_v10 = vmul.f32 %v5254_v24, %v5254_v24 }
 0x28b   : > { %v2216_v11 = vsel %vm2023_vm2, %v2153_v18, 0.0  ;;  %v2232_v46 = vsel %vm2023_vm2, %v2161_v3, 0.0  ;;  %v2244_v18 = vsel %vm2023_vm2, %v2167_v50, 0.0  ;;  %v2174_v20 = vmul.f32 %v5261_v9, %v5261_v9 }
 0x28c   : > { %2142 = vadd.xlane.f32.xlu1 %v2141_v44  ;;  %v2224_v44 = vsel %vm2023_vm2, %v2157_v52, 0.0  ;;  %v2233_v15 = vadd.f32 %v2232_v46, %v2160_v54  ;;  %v2248_v2 = vsel %vm2023_vm2, %v2169_v61, 0.0  ;;  %v2172_v19 = vmul.f32 %v5268_v33, %v5268_v33 }
 0x28d   : > { %2138 = vadd.xlane.f32.xlu0 %v2137_v47  ;;  %v2217_v47 = vadd.f32 %v2216_v11, %v2152_v36  ;;  %v2225_v11 = vadd.f32 %v2224_v44, %v2156_v40  ;;  %v2236_v36 = vsel %vm2023_vm2, %v2163_v41, 0.0  ;;  %v2249_v58 = vadd.f32 %v2248_v2, %v2168_v1 }
 0x28e   : > { %v2237_v31 = vadd.f32 %v2236_v36, %v2162_v38  ;;  %v2260_v40 = vsel %vm2023_vm2, %v2175_v16, 0.0  ;;  %v2179_v57 = vmul.f32 %v5275_v37, %v5275_v37  ;;  %v2256_v41 = vsel %vm2023_vm2, %v2173_v10, 0.0  ;;  %v7171_v10 = vld [vmem:[#allocation14_spill] sm:$0xff] }
 0x28f   : > { %v2177_v24 = vmul.f32 %v5280_v12, %v5280_v12  ;;  %v2261_v44 = vadd.f32 %v2260_v40, %v2174_v20  ;;  %v2178_v9 = vmul.f32 %v5287_v42, %v5287_v42  ;;  %v2257_v3 = vadd.f32 %v2256_v41, %v2172_v19  ;;  %v7173_v40 = vld [vmem:[#allocation16_spill] sm:$0xff] }
 0x290   : > { %2150 = vadd.xlane.f32.xlu1 %v2149_v26  ;;  %v2240_v26 = vsel %vm2023_vm2, %v2165_v34, 0.0  ;;  %v2176_v33 = vmul.f32 %v5294_v39, %v5294_v39  ;;  %v2183_v37 = vmul.f32 %v5301_v51, %v5301_v51  ;;  %v2181_v12 = vmul.f32 %v5306_v32, %v5306_v32 }
 0x291   : > { %2146 = vadd.xlane.f32.xlu0 %v2145_v5  ;;  %v2245_v5 = vadd.f32 %v2244_v18, %v2166_v13  ;;  %v2241_v52 = vadd.f32 %v2240_v26, %v2164_v56  ;;  %v2264_v38 = vsel %vm2023_vm2, %v2177_v24, 0.0  ;;  %v2182_v42 = vmul.f32 %v5313_v55, %v5313_v55 }
 0x292   : > { %v2265_v36 = vadd.f32 %v2264_v38, %v2176_v33  ;;  %v2276_v54 = vsel %vm2023_vm2, %v2183_v37, 0.0  ;;  %v2180_v39 = vmul.f32 %v5320_v4, %v5320_v4  ;;  %v2187_v51 = vmul.f32 %v5327_v0, %v5327_v0  ;;  %v7176_v33 = vld [vmem:[#allocation19_spill] sm:$0xff]  ;;  %v7177_v38 = vld [vmem:[#allocation20_spill] sm:$0xff] }
 0x293   : > { %v2272_v50 = vsel %vm2023_vm2, %v2181_v12, 0.0  ;;  %v2185_v32 = vmul.f32 %v5332_v45, %v5332_v45  ;;  %v2277_v46 = vadd.f32 %v2276_v54, %v2182_v42  ;;  %v2186_v55 = vmul.f32 %v5339_v21, %v5339_v21  ;;  %v7178_v42 = vld [vmem:[#allocation21_spill] sm:$0xff] }
 0x294   : > { %2222 = vadd.xlane.f32.xlu1 %v2221_v60  ;;  %v2252_v60 = vsel %vm2023_vm2, %v2171_v48, 0.0  ;;  %v2273_v34 = vadd.f32 %v2272_v50, %v2180_v39  ;;  %v2184_v4 = vmul.f32 %v5346_v8, %v5346_v8  ;;  %v2191_v0 = vmul.f32 %v5353_v53, %v5353_v53  ;;  %v7179_v39 = vld [vmem:[#allocation22_spill] sm:$0xff] }
 0x295   : > { %2218 = vadd.xlane.f32.xlu0 %v2217_v47  ;;  %v2253_v47 = vadd.f32 %v2252_v60, %v2170_v17  ;;  %v2280_v13 = vsel %vm2023_vm2, %v2185_v32, 0.0  ;;  %v2189_v45 = vmul.f32 %v5358_v63, %v5358_v63  ;;  %v2190_v21 = vmul.f32 %v5365_v62, %v5365_v62 }
 0x296   : > { %v2281_v18 = vadd.f32 %v2280_v13, %v2184_v4  ;;  %v2292_v56 = vsel %vm2023_vm2, %v2191_v0, 0.0  ;;  %v2188_v8 = vmul.f32 %v5372_v27, %v5372_v27  ;;  %v2195_v53 = vmul.f32 %v5379_v30, %v5379_v30  ;;  %v7182_v0 = vld [vmem:[#allocation25_spill] sm:$0xff] }
 0x297   : > { %v2288_v48 = vsel %vm2023_vm2, %v2189_v45, 0.0  ;;  %v2193_v63 = vmul.f32 %v5384_v49, %v5384_v49  ;;  %v2293_v26 = vadd.f32 %v2292_v56, %v2190_v21  ;;  %v2194_v62 = vmul.f32 %v5391_v23, %v5391_v23 }
 0x298   : > { %2230 = vadd.xlane.f32.xlu1 %v2229_v14  ;;  %v2268_v14 = vsel %vm2023_vm2, %v2179_v57, 0.0  ;;  %v2289_v61 = vadd.f32 %v2288_v48, %v2188_v8  ;;  %v2192_v27 = vmul.f32 %v5398_v28, %v5398_v28  ;;  %v2199_v30 = vmul.f32 %v5405_v22, %v5405_v22  ;;  %v7174_v57 = vld [vmem:[#allocation17_spill] sm:$0xff] }
 0x299   : > { %2226 = vadd.xlane.f32.xlu0 %v2225_v11  ;;  %v2269_v11 = vadd.f32 %v2268_v14, %v2178_v9  ;;  %v2296_v17 = vsel %vm2023_vm2, %v2193_v63, 0.0  ;;  %v2197_v49 = vmul.f32 %v5410_v29, %v5410_v29  ;;  %v2198_v23 = vmul.f32 %v5417_v35, %v5417_v35 }
 0x29a   : > { %v2297_v60 = vadd.f32 %v2296_v17, %v2192_v27  ;;  %v2308_v1 = vsel %vm2023_vm2, %v2199_v30, 0.0  ;;  %v2196_v28 = vmul.f32 %v5424_v25, %v5424_v25  ;;  %v2203_v22 = vmul.f32 %v5431_v43, %v5431_v43  ;;  %v2665_v27 = vld [vmem:[%s7062_s3] sm:$0xff] }
 0x29b   : > { %v2304_v16 = vsel %vm2023_vm2, %v2197_v49, 0.0  ;;  %v2201_v29 = vmul.f32 %v5436_v7, %v5436_v7  ;;  %v2309_v2 = vadd.f32 %v2308_v1, %v2198_v23  ;;  %v2202_v35 = vmul.f32 %v7171_v10, %v7171_v10  ;;  %v2668_v49 = vld [vmem:[%s7062_s3 + $0x18] sm:$0xff]  ;;  %v2669_v1 = vld [vmem:[%s7062_s3 + $0x20] sm:$0xff] }
 0x29c   : > { %2238 = vadd.xlane.f32.xlu1 %v2237_v31  ;;  %v2284_v31 = vsel %vm2023_vm2, %v2187_v51, 0.0  ;;  %v2316_v20 = vsel %vm2023_vm2, %v2203_v22, 0.0  ;;  %v2207_v43 = vmul.f32 %v7173_v40, %v7173_v40  ;;  %v2205_v41 = vmul.f32 %v7174_v57, %v7174_v57 }
 0x29d   : > { %2234 = vadd.xlane.f32.xlu0 %v2233_v15  ;;  %v2285_v15 = vadd.f32 %v2284_v31, %v2186_v55  ;;  %v2312_v19 = vsel %vm2023_vm2, %v2201_v29, 0.0  ;;  %v2317_v24 = vadd.f32 %v2316_v20, %v2202_v35  ;;  %v2204_v37 = vmul.f32 %v7176_v33, %v7176_v33  ;;  %v2670_v29 = vld [vmem:[%s7062_s3 + $0x28] sm:$0xff]  ;;  %v2680_v20 = vld [vmem:[%s7062_s3 + $0x78] sm:$0xff] }
 0x29e   : > { %v2324_v14 = vsel %vm2023_vm2, %v2207_v43, 0.0  ;;  %v2211_v12 = vmul.f32 %v7177_v38, %v7177_v38  ;;  %v2210_v51 = vmul.f32 %v7179_v39, %v7179_v39  ;;  %v2213_v13 = vmul.f32 %v7182_v0, %v7182_v0  ;;  %v2672_v43 = vld [vmem:[%s7062_s3 + $0x38] sm:$0xff]  ;;  %v2686_v38 = vld [vmem:[%s7062_s3 + $0xa8] sm:$0xff] }
 0x29f   : > { %v2212_v56 = vmul.f32 %v5530_v6, %v5530_v6 }
 0x2a0   : > { %2246 = vadd.xlane.f32.xlu1 %v2245_v5  ;;  %v2300_v5 = vsel %vm2023_vm2, %v2195_v53, 0.0  ;;  %v2332_v32 = vsel %vm2023_vm2, %v2211_v12, 0.0  ;;  %v2336_v8 = vsel %vm2023_vm2, %v2213_v13, 0.0 }
 0x2a1   : > { %2242 = vadd.xlane.f32.xlu0 %v2241_v52  ;;  %v2301_v52 = vadd.f32 %v2300_v5, %v2194_v62  ;;  %v2333_v45 = vadd.f32 %v2332_v32, %v2210_v51  ;;  %v2337_v48 = vadd.f32 %v2336_v8, %v2212_v56  ;;  %v2667_v5 = vld [vmem:[%s7062_s3 + $0x10] sm:$0xff]  ;;  %v2690_v32 = vld [vmem:[%s7062_s3 + $0xc8] sm:$0xff]  ;;  %v2685_v8 = vld [vmem:[%s7062_s3 + $0xa0] sm:$0xff] }
 0x2a4   : > { %2254 = vadd.xlane.f32.xlu1 %v2253_v47  ;;  %v2305_v47 = vadd.f32 %v2304_v16, %v2196_v28  ;;  %v2676_v28 = vld [vmem:[%s7062_s3 + $0x58] sm:$0xff] }
 0x2a5   : > { %2250 = vadd.xlane.f32.xlu0 %v2249_v58  ;;  %v7172_v58 = vld [vmem:[#allocation15_spill] sm:$0xff] }
 0x2a6   : > { %v2200_v25 = vmul.f32 %v7172_v58, %v7172_v58 }
 0x2a8   : > { %2262 = vadd.xlane.f32.xlu1 %v2261_v44  ;;  %v7175_v44 = vld [vmem:[#allocation18_spill] sm:$0xff] }
 0x2a9   : > { %2258 = vadd.xlane.f32.xlu0 %v2257_v3  ;;  %v2206_v9 = vmul.f32 %v7175_v44, %v7175_v44  ;;  %v2313_v3 = vadd.f32 %v2312_v19, %v2200_v25  ;;  %v2682_v19 = vld [vmem:[%s7062_s3 + $0x88] sm:$0xff]  ;;  %v2673_v44 = vld [vmem:[%s7062_s3 + $0x40] sm:$0xff] }
 0x2ab   : > { %v2325_v54 = vadd.f32 %v2324_v14, %v2206_v9  ;;  %v2684_v9 = vld [vmem:[%s7062_s3 + $0x98] sm:$0xff] }
 0x2ac   : > { %2270 = vadd.xlane.f32.xlu1 %v2269_v11  ;;  %v2320_v11 = vsel %vm2023_vm2, %v2205_v41, 0.0 }
 0x2ad   : > { %2266 = vadd.xlane.f32.xlu0 %v2265_v36  ;;  %v2209_v36 = vmul.f32 %v7178_v42, %v7178_v42  ;;  %v2321_v50 = vadd.f32 %v2320_v11, %v2204_v37  ;;  %v2675_v37 = vld [vmem:[%s7062_s3 + $0x50] sm:$0xff] }
 0x2af   : > { %v2328_v4 = vsel %vm2023_vm2, %v2209_v36, 0.0  ;;  %v2677_v36 = vld [vmem:[%s7062_s3 + $0x60] sm:$0xff] }
 0x2b0   : > { %2278 = vadd.xlane.f32.xlu1 %v2277_v46  ;;  %v7180_v46 = vld [vmem:[#allocation23_spill] sm:$0xff] }
 0x2b1   : > { %2274 = vadd.xlane.f32.xlu0 %v2273_v34  ;;  %v2208_v55 = vmul.f32 %v7180_v46, %v7180_v46  ;;  %v7181_v34 = vld [vmem:[#allocation24_spill] sm:$0xff] }
 0x2b2   : > { %v2215_v31 = vmul.f32 %v7181_v34, %v7181_v34 }
 0x2b3   : > { %v2329_v21 = vadd.f32 %v2328_v4, %v2208_v55  ;;  %v2692_v4 = vld [vmem:[%s7062_s3 + $0xd8] sm:$0xff] }
 0x2b4   : > { %2286 = vadd.xlane.f32.xlu1 %v2285_v15  ;;  %v2214_v15 = vmul.f32 %v5521_v59, %v5521_v59  ;;  %v2666_v59 = vld [vmem:[%s7062_s3 + $0x8] sm:$0xff] }
 0x2b5   : > { %2282 = vadd.xlane.f32.xlu0 %v2281_v18  ;;  %v2340_v18 = vsel %vm2023_vm2, %v2215_v31, 0.0  ;;  %v2681_v31 = vld [vmem:[%s7062_s3 + $0x80] sm:$0xff] }
 0x2b6   : > { %v2341_v53 = vadd.f32 %v2340_v18, %v2214_v15  ;;  %v2683_v15 = vld [vmem:[%s7062_s3 + $0x90] sm:$0xff] }
 0x2b8   : > { %2294 = vadd.xlane.f32.xlu1 %v2293_v26 }
 0x2b9   : > { %2290 = vadd.xlane.f32.xlu0 %v2289_v61 }
 0x2bc   : > { %2302 = vadd.xlane.f32.xlu1 %v2301_v52  ;;  %v2674_v52 = vld [vmem:[%s7062_s3 + $0x48] sm:$0xff] }
 0x2bd   : > { %2298 = vadd.xlane.f32.xlu0 %v2297_v60 }
 0x2c0   : > { %2310 = vadd.xlane.f32.xlu1 %v2309_v2  ;;  %v2678_v2 = vld [vmem:[%s7062_s3 + $0x68] sm:$0xff] }
 0x2c1   : > { %2306 = vadd.xlane.f32.xlu0 %v2305_v47  ;;  %v2671_v47 = vld [vmem:[%s7062_s3 + $0x30] sm:$0xff] }
 0x2c4   : > { %2318 = vadd.xlane.f32.xlu1 %v2317_v24 }
 0x2c5   : > { %2314 = vadd.xlane.f32.xlu0 %v2313_v3 }
 0x2c8   : > { %2326 = vadd.xlane.f32.xlu1 %v2325_v54  ;;  %v2688_v54 = vld [vmem:[%s7062_s3 + $0xb8] sm:$0xff] }
 0x2c9   : > { %2322 = vadd.xlane.f32.xlu0 %v2321_v50  ;;  %v2679_v50 = vld [vmem:[%s7062_s3 + $0x70] sm:$0xff] }
 0x2cc   : > { %2334 = vadd.xlane.f32.xlu1 %v2333_v45 }
 0x2cd   : > { %2330 = vadd.xlane.f32.xlu0 %v2329_v21  ;;  %v2694_v21 = vld [vmem:[%s7062_s3 + $0xe8] sm:$0xff] }
 0x2d0   : > { %2342 = vadd.xlane.f32.xlu1 %v2341_v53  ;;  %v2696_v53 = vld [vmem:[%s7062_s3 + $0xf8] sm:$0xff] }
 0x2d1   : > { %2338 = vadd.xlane.f32.xlu0 %v2337_v48 }
 0x2dd   : > { %v5694_v63 = vpop.xlane.xlu1 %2034 }
 0x2de   : > { %v5696_v26 = vpop.xlane.xlu0 %2026 }
 0x2e1   : > { %v5701_v62 = vpop.xlane.xlu1 %2038  ;;  %2704 = vperm.xlu1 %3347, %v2666_v59  }
 0x2e2   : > { %v5703_v61 = vpop.xlane.xlu0 %2030 }
 0x2e5   : > { %v5711_v30 = vpop.xlane.xlu1 %2046  ;;  %2709 = vperm.xlu1 %3347, %v2667_v5   ;;  %v2687_v5 = vld [vmem:[%s7062_s3 + $0xb0] sm:$0xff] }
 0x2e6   : > { %v5713_v17 = vpop.xlane.xlu0 %2042 }
 0x2e7   : > { %2699 = vperm.xlu0 %3346, %v2665_v27   ;;  %v2922_v27 = vld [vmem:[%s7063_s4 + $0x8] sm:$0xff] }
 0x2e9   : > { %v5721_v23 = vpop.xlane.xlu1 %2054  ;;  %2714 = vperm.xlu1 %3347, %v2668_v49  }
 0x2ea   : > { %v5723_v60 = vpop.xlane.xlu0 %2050 }
 0x2eb   : > { %2744 = vperm.xlu0 %3346, %v2674_v52  }
 0x2ed   : > { %v5731_v22 = vpop.xlane.xlu1 %2062  ;;  %2719 = vperm.xlu1 %3347, %v2669_v1   ;;  %v2689_v1 = vld [vmem:[%s7062_s3 + $0xc0] sm:$0xff] }
 0x2ee   : > { %v5733_v16 = vpop.xlane.xlu0 %2058 }
 0x2ef   : > { %2754 = vperm.xlu0 %3346, %v2676_v28   ;;  %v2924_v28 = vld [vmem:[%s7063_s4 + $0x18] sm:$0xff] }
 0x2f1   : > { %v5741_v10 = vpop.xlane.xlu1 %2070  ;;  %2724 = vperm.xlu1 %3347, %v2670_v29  }
 0x2f2   : > { %v5743_v35 = vpop.xlane.xlu0 %2066 }
 0x2f3   : > { %2764 = vperm.xlu0 %3346, %v2678_v2  }
 0x2f5   : > { %v5751_v25 = vpop.xlane.xlu1 %2078  ;;  %2729 = vperm.xlu1 %3347, %v2671_v47   ;;  %v2691_v47 = vld [vmem:[%s7062_s3 + $0xd0] sm:$0xff] }
 0x2f6   : > { %v5753_v40 = vpop.xlane.xlu0 %2074 }
 0x2f7   : > { %2774 = vperm.xlu0 %3346, %v2680_v20   ;;  %v2926_v20 = vld [vmem:[%s7063_s4 + $0x28] sm:$0xff] }
 0x2f9   : > { %v5761_v41 = vpop.xlane.xlu1 %2086  ;;  %2734 = vperm.xlu1 %3347, %v2672_v43  }
 0x2fa   : > { %v5763_v24 = vpop.xlane.xlu0 %2082 }
 0x2fb   : > { %2784 = vperm.xlu0 %3346, %v2682_v19  }
 0x2fd   : > { %v5771_v3 = vpop.xlane.xlu1 %2094  ;;  %2739 = vperm.xlu1 %3347, %v2673_v44   ;;  %v2693_v44 = vld [vmem:[%s7062_s3 + $0xe0] sm:$0xff] }
 0x2fe   : > { %v5773_v14 = vpop.xlane.xlu0 %2090 }
 0x2ff   : > { %2794 = vperm.xlu0 %3346, %v2684_v9   ;;  %v2928_v9 = vld [vmem:[%s7063_s4 + $0x38] sm:$0xff] }
 0x301   : > { %v5781_v12 = vpop.xlane.xlu1 %2102  ;;  %2749 = vperm.xlu1 %3347, %v2675_v37  }
 0x302   : > { %v5783_v11 = vpop.xlane.xlu0 %2098 }
 0x303   : > { %2804 = vperm.xlu0 %3346, %v2686_v38  }
 0x305   : > { %v5791_v39 = vpop.xlane.xlu1 %2110  ;;  %2759 = vperm.xlu1 %3347, %v2677_v36   ;;  %v2695_v36 = vld [vmem:[%s7062_s3 + $0xf0] sm:$0xff] }
 0x306   : > { %v5793_v51 = vpop.xlane.xlu0 %2106 }
 0x307   : > { %2814 = vperm.xlu0 %3346, %v2688_v54   ;;  %v2930_v54 = vld [vmem:[%s7063_s4 + $0x48] sm:$0xff] }
 0x309   : > { %v5801_v55 = vpop.xlane.xlu1 %2118  ;;  %2769 = vperm.xlu1 %3347, %v2679_v50  }
 0x30a   : > { %7183 = vst [vmem:[#allocation14_spill] sm:$0xff] %v5801_v55  ;;  %v5803_v34 = vpop.xlane.xlu0 %2114 }
 0x30b   : > { %7184 = vst [vmem:[#allocation15_spill] sm:$0xff] %v5803_v34  ;;  %2824 = vperm.xlu0 %3346, %v2690_v32  }
 0x30d   : > { %v5811_v13 = vpop.xlane.xlu1 %2126  ;;  %2779 = vperm.xlu1 %3347, %v2681_v31   ;;  %v2921_v31 = vld [vmem:[%s7063_s4] sm:$0xff] }
 0x30e   : > { %7185 = vst [vmem:[#allocation16_spill] sm:$0xff] %v5811_v13  ;;  %v5813_v45 = vpop.xlane.xlu0 %2122 }
 0x30f   : > { %2834 = vperm.xlu0 %3346, %v2692_v4   ;;  %v2932_v4 = vld [vmem:[%s7063_s4 + $0x58] sm:$0xff] }
 0x311   : > { %v5821_v18 = vpop.xlane.xlu1 %2134  ;;  %2789 = vperm.xlu1 %3347, %v2683_v15  }
 0x312   : > { %7186 = vst [vmem:[#allocation17_spill] sm:$0xff] %v5821_v18  ;;  %v5823_v56 = vpop.xlane.xlu0 %2130 }
 0x313   : > { %2844 = vperm.xlu0 %3346, %v2694_v21  }
 0x315   : > { %v5831_v48 = vpop.xlane.xlu1 %2142  ;;  %2799 = vperm.xlu1 %3347, %v2685_v8   ;;  %v2923_v8 = vld [vmem:[%s7063_s4 + $0x10] sm:$0xff] }
 0x316   : > { %7187 = vst [vmem:[#allocation18_spill] sm:$0xff] %v5831_v48  ;;  %v5833_v59 = vpop.xlane.xlu0 %2138 }
 0x317   : > { %2854 = vperm.xlu0 %3346, %v2696_v53   ;;  %v2934_v53 = vld [vmem:[%s7063_s4 + $0x68] sm:$0xff] }
 0x319   : > { %v5841_v49 = vpop.xlane.xlu1 %2150  ;;  %2809 = vperm.xlu1 %3347, %v2687_v5  }
 0x31a   : > { %7188 = vst [vmem:[#allocation19_spill] sm:$0xff] %v5841_v49  ;;  %v5843_v52 = vpop.xlane.xlu0 %2146  ;;  %v2933_v49 = vld [vmem:[%s7063_s4 + $0x60] sm:$0xff] }
 0x31b   : > { %2960 = vperm.xlu0 %3346, %v2922_v27  }
 0x31d   : > { %2819 = vperm.xlu1 %3347, %v2689_v1   ;;  %v5851_v29 = vpop.xlane.xlu1 %2222  ;;  %v2925_v1 = vld [vmem:[%s7063_s4 + $0x20] sm:$0xff] }
 0x31e   : > { %v2219_v2 = vpop.xlane.xlu0 %2218 }
 0x31f   : > { %2970 = vperm.xlu0 %3346, %v2924_v28   ;;  %v2936_v28 = vld [vmem:[%s7063_s4 + $0x78] sm:$0xff]  ;;  %v2377_v48 = vmul.f32 0.0051020407, %v2219_v2 }
 0x321   : > { %2829 = vperm.xlu1 %3347, %v2691_v47   ;;  %v5859_v43 = vpop.xlane.xlu1 %2230 }
 0x322   : > { %v2227_v19 = vpop.xlane.xlu0 %2226 }
 0x323   : > { %2980 = vperm.xlu0 %3346, %v2926_v20  }
 0x325   : > { %2839 = vperm.xlu1 %3347, %v2693_v44   ;;  %v5867_v37 = vpop.xlane.xlu1 %2238  ;;  %v2927_v44 = vld [vmem:[%s7063_s4 + $0x30] sm:$0xff] }
 0x326   : > { %v5869_v38 = vpop.xlane.xlu0 %2234 }
 0x327   : > { %2990 = vperm.xlu0 %3346, %v2928_v9   ;;  %v2938_v9 = vld [vmem:[%s7063_s4 + $0x88] sm:$0xff] }
 0x329   : > { %2849 = vperm.xlu1 %3347, %v2695_v36   ;;  %v5877_v50 = vpop.xlane.xlu1 %2246 }
 0x32a   : > { %v5879_v32 = vpop.xlane.xlu0 %2242 }
 0x32b   : > { %3000 = vperm.xlu0 %3346, %v2930_v54  }
 0x32d   : > { %2955 = vperm.xlu1 %3347, %v2921_v31   ;;  %v5887_v15 = vpop.xlane.xlu1 %2254  ;;  %v2929_v31 = vld [vmem:[%s7063_s4 + $0x40] sm:$0xff] }
 0x32e   : > { %v5889_v21 = vpop.xlane.xlu0 %2250 }
 0x32f   : > { %3010 = vperm.xlu0 %3346, %v2932_v4   ;;  %v2940_v4 = vld [vmem:[%s7063_s4 + $0x98] sm:$0xff] }
 0x331   : > { %2965 = vperm.xlu1 %3347, %v2923_v8   ;;  %v5897_v5 = vpop.xlane.xlu1 %2262 }
 0x332   : > { %v5899_v27 = vpop.xlane.xlu0 %2258 }
 0x333   : > { %7189 = vst [vmem:[#allocation20_spill] sm:$0xff] %v5899_v27  ;;  %3020 = vperm.xlu0 %3346, %v2934_v53  }
 0x335   : > { %2975 = vperm.xlu1 %3347, %v2925_v1   ;;  %v5907_v47 = vpop.xlane.xlu1 %2270  ;;  %v2931_v1 = vld [vmem:[%s7063_s4 + $0x50] sm:$0xff] }
 0x336   : > { %v5909_v20 = vpop.xlane.xlu0 %2266 }
 0x337   : > { %7190 = vst [vmem:[#allocation21_spill] sm:$0xff] %v5909_v20  ;;  %3030 = vperm.xlu0 %3346, %v2936_v28   ;;  %v2942_v28 = vld [vmem:[%s7063_s4 + $0xa8] sm:$0xff]  ;;  %v6002_v20 = vmul.f32 0.0051020407, %v5723_v60  ;;  %v2952_v60 = vld [vmem:[%s7063_s4 + $0xf8] sm:$0xff] }
 0x339   : > { %2985 = vperm.xlu1 %3347, %v2927_v44   ;;  %v5917_v36 = vpop.xlane.xlu1 %2278 }
 0x33a   : > { %v5919_v54 = vpop.xlane.xlu0 %2274 }
 0x33b   : > { %7191 = vst [vmem:[#allocation22_spill] sm:$0xff] %v5919_v54  ;;  %3040 = vperm.xlu0 %3346, %v2938_v9   ;;  %v5940_v9 = vmul.f32 0.0051020407, %v5694_v63  ;;  %v5970_v54 = vmul.f32 0.0051020407, %v5713_v17 }
 0x33d   : > { %2995 = vperm.xlu1 %3347, %v2929_v31   ;;  %v5927_v8 = vpop.xlane.xlu1 %2286  ;;  %v2411_v63 = vmul.f32 %v5940_v9, %v5940_v9 }
 0x33e   : > { %v5929_v53 = vpop.xlane.xlu0 %2282 }
 0x33f   : > { %7192 = vst [vmem:[#allocation23_spill] sm:$0xff] %v5929_v53  ;;  %3050 = vperm.xlu0 %3346, %v2940_v4   ;;  %v5948_v53 = vmul.f32 0.0051020407, %v5696_v26  ;;  %v2379_v4 = vmul.f32 0.0051020407, %v2227_v19  ;;  %v2935_v26 = vld [vmem:[%s7063_s4 + $0x70] sm:$0xff] }
 0x341   : > { %3005 = vperm.xlu1 %3347, %v2931_v1   ;;  %v5937_v44 = vpop.xlane.xlu1 %2294  ;;  %v2944_v1 = vld [vmem:[%s7063_s4 + $0xb8] sm:$0xff]  ;;  %v2409_v19 = vmul.f32 %v5948_v53, %v5948_v53 }
 0x342   : > { %7193 = vst [vmem:[#allocation24_spill] sm:$0xff] %v5937_v44  ;;  %v5942_v31 = vpop.xlane.xlu0 %2290 }
 0x343   : > { %7194 = vst [vmem:[#allocation25_spill] sm:$0xff] %v5942_v31  ;;  %3060 = vperm.xlu0 %3346, %v2942_v28   ;;  %v2443_v28 = vsub.f32 %v2379_v4, %v2411_v63  ;;  %v2441_v2 = vsub.f32 %v2377_v48, %v2409_v19  ;;  %v2381_v63 = vmul.f32 0.0051020407, %v5869_v38  ;;  %v2948_v48 = vld [vmem:[%s7063_s4 + $0xd8] sm:$0xff]  ;;  %v2413_v19 = vmul.f32 %v5970_v54, %v5970_v54 }
 0x345   : > { %3015 = vperm.xlu1 %3347, %v2933_v49   ;;  %v5953_v18 = vpop.xlane.xlu1 %2302  ;;  %v2946_v49 = vld [vmem:[%s7063_s4 + $0xc8] sm:$0xff]  ;;  %v2475_v4 = vadd.f32 1e-05, %v2443_v28  ;;  %v5992_v28 = vmul.f32 0.0051020407, %v5823_v56 }
 0x346   : > { %7195 = vst [vmem:[#allocation26_spill] sm:$0xff] %v5953_v18  ;;  %v5957_v31 = vpop.xlane.xlu0 %2298  ;;  %v2937_v18 = vld [vmem:[%s7063_s4 + $0x80] sm:$0xff] }
 0x347   : > { %7196 = vst [vmem:[#allocation27_spill] sm:$0xff] %v5957_v31  ;;  %3070 = vperm.xlu0 %3346, %v2944_v1   ;;  %v5978_v1 = vmul.f32 0.0051020407, %v5813_v45  ;;  %v2939_v45 = vld [vmem:[%s7063_s4 + $0x90] sm:$0xff]  ;;  %3348 = vrsqrt.f32 %v2475_v4  ;;  %v6008_v4 = vmul.f32 0.0051020407, %v5833_v59  ;;  %v2415_v59 = vmul.f32 %v6002_v20, %v6002_v20 }
 0x349   : > { %3025 = vperm.xlu1 %3347, %v2935_v26   ;;  %v5967_v13 = vpop.xlane.xlu1 %2310  ;;  %v2473_v26 = vadd.f32 1e-05, %v2441_v2  ;;  %v2433_v38 = vmul.f32 %v5978_v1, %v5978_v1  ;;  %v2950_v2 = vld [vmem:[%s7063_s4 + $0xe8] sm:$0xff] }
 0x34a   : > { %7197 = vst [vmem:[#allocation28_spill] sm:$0xff] %v5967_v13  ;;  %v5972_v31 = vpop.xlane.xlu0 %2306 }
 0x34b   : > { %7198 = vst [vmem:[#allocation29_spill] sm:$0xff] %v5972_v31  ;;  %3080 = vperm.xlu0 %3346, %v2946_v49   ;;  %3350 = vrsqrt.f32 %v2473_v26 }
 0x34d   : > { %3035 = vperm.xlu1 %3347, %v2937_v18   ;;  %v5984_v17 = vpop.xlane.xlu1 %2318  ;;  %v2445_v18 = vsub.f32 %v2381_v63, %v2413_v19 }
 0x34e   : > { %7199 = vst [vmem:[#allocation30_spill] sm:$0xff] %v5984_v17  ;;  %v2315_v31 = vpop.xlane.xlu0 %2314 }
 0x34f   : > { %v2401_v49 = vmul.f32 0.0051020407, %v2315_v31  ;;  %3090 = vperm.xlu0 %3346, %v2948_v48   ;;  %v2941_v31 = vld [vmem:[%s7063_s4 + $0xa0] sm:$0xff]  ;;  %v2435_v48 = vmul.f32 %v5992_v28, %v5992_v28  ;;  %v2477_v19 = vadd.f32 1e-05, %v2445_v18 }
 0x350   : > { %v6024_v18 = vmul.f32 0.0051020407, %v5843_v52 }
 0x351   : > { %v2465_v17 = vsub.f32 %v2401_v49, %v2433_v38  ;;  %3045 = vperm.xlu1 %3347, %v2939_v45   ;;  %v5999_v13 = vpop.xlane.xlu1 %2326  ;;  %v2383_v45 = vmul.f32 0.0051020407, %v5879_v32 }
 0x352   : > { %7200 = vst [vmem:[#allocation31_spill] sm:$0xff] %v5999_v13  ;;  %v2323_v56 = vpop.xlane.xlu0 %2322  ;;  %v2945_v13 = vld [vmem:[%s7063_s4 + $0xc0] sm:$0xff] }
 0x353   : > { %v2497_v63 = vadd.f32 1e-05, %v2465_v17  ;;  %v2403_v26 = vmul.f32 0.0051020407, %v2323_v56  ;;  %3100 = vperm.xlu0 %3346, %v2950_v2   ;;  %v2943_v2 = vld [vmem:[%s7063_s4 + $0xb0] sm:$0xff]  ;;  %v2437_v56 = vmul.f32 %v6008_v4, %v6008_v4 }
 0x355   : > { %3352 = vrsqrt.f32 %v2497_v63  ;;  %v2467_v38 = vsub.f32 %v2403_v26, %v2435_v48  ;;  %3055 = vperm.xlu1 %3347, %v2941_v31   ;;  %v6016_v49 = vpop.xlane.xlu1 %2334  ;;  %v2447_v31 = vsub.f32 %v2383_v45, %v2415_v59  ;;  %v2947_v59 = vld [vmem:[%s7063_s4 + $0xd0] sm:$0xff] }
 0x356   : > { %7201 = vst [vmem:[#allocation32_spill] sm:$0xff] %v6016_v49  ;;  %v2331_v17 = vpop.xlane.xlu0 %2330  ;;  %3354 = vrsqrt.f32 %v2477_v19 }
 0x357   : > { %v2499_v32 = vadd.f32 1e-05, %v2467_v38  ;;  %v2405_v63 = vmul.f32 0.0051020407, %v2331_v17  ;;  %3110 = vperm.xlu0 %3346, %v2952_v60   ;;  %v2439_v38 = vmul.f32 %v6024_v18, %v6024_v18  ;;  %v2479_v44 = vadd.f32 1e-05, %v2447_v31  ;;  %v3349_v17 = vpop.eup %3348 }
 0x358   : > { %v3351_v60 = vpop.eup %3350  ;;  %v3415_v31 = vld [vmem:[%s7064_s5 + $0x8] sm:$0xff] }
 0x359   : > { %3356 = vrsqrt.f32 %v2499_v32  ;;  %v2469_v48 = vsub.f32 %v2405_v63, %v2437_v56  ;;  %3065 = vperm.xlu1 %3347, %v2943_v2   ;;  %v6028_v26 = vpop.xlane.xlu1 %2342  ;;  %v3412_v2 = vld [vmem:[%s7064_s5 + $0x20] sm:$0xff] }
 0x35a   : > { %7202 = vst [vmem:[#allocation33_spill] sm:$0xff] %v6028_v26  ;;  %v2339_v49 = vpop.xlane.xlu0 %2338  ;;  %v2541_v32 = vsub.f32 %v3412_v2, %v5940_v9  ;;  %v3414_v56 = vld [vmem:[%s7064_s5] sm:$0xff] }
 0x35b   : > { %v2501_v52 = vadd.f32 1e-05, %v2469_v48  ;;  %v2407_v34 = vmul.f32 0.0051020407, %v2339_v49  ;;  %v3413_v49 = vld [vmem:[%s7064_s5 + $0x28] sm:$0xff]  ;;  %v2537_v63 = vsub.f32 %v3414_v56, %v5948_v53  ;;  %v2538_v48 = vsub.f32 %v3415_v31, %v5948_v53  ;;  %v2951_v31 = vld [vmem:[%s7063_s4 + $0xf0] sm:$0xff] }
 0x35d   : > { %3358 = vrsqrt.f32 %v2501_v52  ;;  %v2471_v19 = vsub.f32 %v2407_v34, %v2439_v38  ;;  %3075 = vperm.xlu1 %3347, %v2945_v13   ;;  %v6035_v45 = vpop.permute.xlu1 %2704  ;;  %v2542_v34 = vsub.f32 %v3413_v49, %v5940_v9  ;;  %v2585_v52 = vsub.f32 %v7172_v58, %v5978_v1  ;;  %v2949_v58 = vld [vmem:[%s7063_s4 + $0xe0] sm:$0xff] }
 0x35e   : > { %3360 = vrsqrt.f32 %v2479_v44  ;;  %v2605_v38 = vmul.f32 %v3349_v17, %v2541_v32  ;;  %v2586_v9 = vsub.f32 %v5436_v7, %v5978_v1  ;;  %v2601_v49 = vmul.f32 %v3351_v60, %v2537_v63 }
 0x35f   : > { %v2503_v13 = vadd.f32 1e-05, %v2471_v19  ;;  %v2606_v2 = vmul.f32 %v3349_v17, %v2542_v34  ;;  %v2602_v56 = vmul.f32 %v3351_v60, %v2538_v48  ;;  %v2589_v60 = vsub.f32 %v7176_v33, %v5992_v28 }
 0x360   : > { %v2590_v32 = vsub.f32 %v7174_v57, %v5992_v28  ;;  %v3417_v57 = vld [vmem:[%s7064_s5 + $0x48] sm:$0xff] }
 0x361   : > { %3362 = vrsqrt.f32 %v2503_v13  ;;  %3085 = vperm.xlu1 %3347, %v2947_v59   ;;  %v2710_v19 = vpop.permute.xlu1 %2709  ;;  %v2546_v33 = vsub.f32 %v3417_v57, %v5970_v54  ;;  %v3419_v57 = vld [vmem:[%s7064_s5 + $0x68] sm:$0xff] }
 0x362   : > { %v3353_v26 = vpop.eup %3352  ;;  %v6060_v55 = vmul.f32 %v2710_v19, %v2605_v38  ;;  %v6062_v27 = vmul.f32 %v2710_v19, %v2606_v2  ;;  %v2700_v53 = vpop.permute.xlu0 %2699  ;;  %v2594_v19 = vsub.f32 %v7178_v42, %v6008_v4  ;;  %v2598_v42 = vsub.f32 %v7182_v0, %v6024_v18 }
 0x363   : > { %v6067_v44 = vmul.f32 %v2700_v53, %v2601_v49  ;;  %v6069_v17 = vmul.f32 %v2700_v53, %v2602_v56  ;;  %v6071_v7 = vmul.f32 %v3353_v26, %v2585_v52  ;;  %v6073_v1 = vmul.f32 %v3353_v26, %v2586_v9  ;;  %v3355_v59 = vpop.eup %3354  ;;  %v3416_v26 = vld [vmem:[%s7064_s5 + $0x40] sm:$0xff] }
 0x364   : > { %7203 = vst [vmem:[#allocation34_spill] sm:$0xff] %v6062_v27  ;;  %v2545_v48 = vsub.f32 %v3416_v26, %v5970_v54  ;;  %v2610_v2 = vmul.f32 %v3355_v59, %v2546_v33  ;;  %v2593_v9 = vsub.f32 %v7180_v46, %v6008_v4  ;;  %v2597_v46 = vsub.f32 %v5530_v6, %v6024_v18  ;;  %v3418_v26 = vld [vmem:[%s7064_s5 + $0x60] sm:$0xff] }
 0x365   : > { %7204 = vst [vmem:[#allocation35_spill] sm:$0xff] %v6071_v7  ;;  %7205 = vst [vmem:[#allocation36_spill] sm:$0xff] %v6073_v1  ;;  %3095 = vperm.xlu1 %3347, %v2949_v58   ;;  %v6079_v34 = vpop.permute.xlu1 %2714  ;;  %v2550_v6 = vsub.f32 %v3419_v57, %v6002_v20  ;;  %v2380_v57 = vmul.f32 0.0051020407, %v5859_v43  ;;  %v6246_v1 = vld [vmem:[%s7064_s5 + $0x90] sm:$0xff]  ;;  %v6253_v7 = vld [vmem:[%s7064_s5 + $0x78] sm:$0xff] }
 0x366   : > { %v3357_v13 = vpop.eup %3356  ;;  %v6081_v63 = vpop.permute.xlu0 %2744  ;;  %v2609_v38 = vmul.f32 %v3355_v59, %v2545_v48  ;;  %v2549_v48 = vsub.f32 %v3418_v26, %v6002_v20  ;;  %v2378_v20 = vmul.f32 0.0051020407, %v5851_v29  ;;  %v6422_v27 = vmul.f32 0.0051020407, %v5783_v11 }
 0x367   : > { %v6094_v28 = vmul.f32 %v3357_v13, %v2589_v60  ;;  %v6096_v52 = vmul.f32 %v3357_v13, %v2590_v32 }
 0x368   : > { %7244 = vst [vmem:[#allocation75_spill] sm:$0xff] %v6422_v27 }
 0x369   : > { %7206 = vst [vmem:[#allocation37_spill] sm:$0xff] %v6094_v28  ;;  %7207 = vst [vmem:[#allocation38_spill] sm:$0xff] %v6096_v52  ;;  %3105 = vperm.xlu1 %3347, %v2951_v31   ;;  %v2720_v49 = vpop.permute.xlu1 %2719  ;;  %v6232_v52 = vld [vmem:[%s7064_s5 + $0x70] sm:$0xff] }
 0x36a   : > { %v3359_v56 = vpop.eup %3358  ;;  %v6102_v53 = vmul.f32 %v2720_v49, %v2609_v38  ;;  %v6104_v58 = vmul.f32 %v2720_v49, %v2610_v2  ;;  %v6106_v54 = vpop.permute.xlu0 %2754 }
 0x36b   : > { %v6108_v60 = vmul.f32 %v3359_v56, %v2593_v9  ;;  %v6110_v32 = vmul.f32 %v3359_v56, %v2594_v19  ;;  %v3361_v59 = vpop.eup %3360  ;;  %v6139_v56 = vmul.f32 0.0051020407, %v5703_v61  ;;  %v6157_v61 = vmul.f32 0.0051020407, %v5711_v30 }
 0x36c   : > { %7208 = vst [vmem:[#allocation39_spill] sm:$0xff] %v6102_v53  ;;  %7209 = vst [vmem:[#allocation40_spill] sm:$0xff] %v6104_v58  ;;  %v2613_v18 = vmul.f32 %v3361_v59, %v2549_v48  ;;  %v2614_v38 = vmul.f32 %v3361_v59, %v2550_v6  ;;  %v6172_v30 = vmul.f32 0.0051020407, %v5731_v22 }
 0x36d   : > { %7210 = vst [vmem:[#allocation41_spill] sm:$0xff] %v6108_v60  ;;  %7211 = vst [vmem:[#allocation42_spill] sm:$0xff] %v6110_v32  ;;  %v6116_v4 = vpop.permute.xlu1 %2724  ;;  %v2410_v59 = vmul.f32 %v6139_v56, %v6139_v56  ;;  %v2414_v43 = vmul.f32 %v6157_v61, %v6157_v61  ;;  %v6200_v60 = vmul.f32 0.0051020407, %v5733_v16  ;;  %v6218_v16 = vmul.f32 0.0051020407, %v5741_v10 }
 0x36e   : > { %v3363_v13 = vpop.eup %3362  ;;  %v6118_v31 = vpop.permute.xlu0 %2764  ;;  %v6241_v28 = vmul.f32 %v6172_v30, %v6172_v30 }
 0x36f   : > { %v6128_v33 = vmul.f32 %v3363_v13, %v2597_v46  ;;  %v6130_v0 = vmul.f32 %v3363_v13, %v2598_v42  ;;  %v6147_v42 = vmul.f32 0.0051020407, %v5701_v62  ;;  %v2442_v48 = vsub.f32 %v2378_v20, %v2410_v59  ;;  %v6177_v59 = vld [vmem:[%s7064_s5 + $0x30] sm:$0xff]  ;;  %7224 = vst [vmem:[#allocation55_spill] sm:$0xff] %v6200_v60 }
 0x370   : > { %v6167_v20 = vmul.f32 0.0051020407, %v5721_v23  ;;  %v2384_v23 = vmul.f32 0.0051020407, %v5877_v50 }
 0x371   : > { %7212 = vst [vmem:[#allocation43_spill] sm:$0xff] %v6128_v33  ;;  %7213 = vst [vmem:[#allocation44_spill] sm:$0xff] %v6130_v0  ;;  %v2730_v2 = vpop.permute.xlu1 %2729  ;;  %v2412_v29 = vmul.f32 %v6147_v42, %v6147_v42  ;;  %v2474_v62 = vadd.f32 1e-05, %v2442_v48  ;;  %v6193_v33 = vld [vmem:[%s7064_s5 + $0x10] sm:$0xff]  ;;  %v6225_v48 = vld [vmem:[%s7064_s5 + $0x58] sm:$0xff] }
 0x372   : > { %v6132_v9 = vmul.f32 %v2730_v2, %v2613_v18  ;;  %v6134_v19 = vmul.f32 %v2730_v2, %v2614_v38  ;;  %v6136_v49 = vpop.permute.xlu0 %2774  ;;  %v2382_v2 = vmul.f32 0.0051020407, %v5867_v37  ;;  %v6184_v37 = vld [vmem:[%s7064_s5 + $0x38] sm:$0xff]  ;;  %v2416_v50 = vmul.f32 %v6167_v20, %v6167_v20 }
 0x373   : > { %7216 = vst [vmem:[#allocation47_spill] sm:$0xff] %v6136_v49  ;;  %v2444_v38 = vsub.f32 %v2380_v57, %v2412_v29  ;;  %3364 = vrsqrt.f32 %v2474_v62  ;;  %v6206_v62 = vld [vmem:[%s7064_s5 + $0x18] sm:$0xff]  ;;  %v6353_v49 = vmul.f32 0.0051020407, %v5771_v3 }
 0x374   : > { %7214 = vst [vmem:[#allocation45_spill] sm:$0xff] %v6132_v9  ;;  %7215 = vst [vmem:[#allocation46_spill] sm:$0xff] %v6134_v19  ;;  %v2446_v29 = vsub.f32 %v2382_v2, %v2414_v43  ;;  %v6213_v2 = vld [vmem:[%s7064_s5 + $0x50] sm:$0xff]  ;;  %v6237_v43 = vmul.f32 0.0051020407, %v5743_v35  ;;  %v6321_v19 = vld [vmem:[%s7064_s5 + $0xa0] sm:$0xff] }
 0x375   : > { %v6141_v26 = vpop.permute.xlu1 %2734  ;;  %v2476_v22 = vadd.f32 1e-05, %v2444_v38  ;;  %v2386_v35 = vmul.f32 0.0051020407, %v5887_v15  ;;  %v6293_v15 = vld [vmem:[%s7064_s5 + $0xb0] sm:$0xff]  ;;  %v6300_v38 = vld [vmem:[%s7064_s5 + $0x88] sm:$0xff] }
 0x376   : > { %v6144_v46 = vpop.permute.xlu0 %2784  ;;  %7225 = vst [vmem:[#allocation56_spill] sm:$0xff] %v6237_v43  ;;  %7230 = vst [vmem:[#allocation61_spill] sm:$0xff] %v6300_v38  ;;  %v6328_v9 = vmul.f32 0.0051020407, %v5763_v24  ;;  %v2388_v24 = vmul.f32 0.0051020407, %v5897_v5 }
 0x377   : > { %7217 = vst [vmem:[#allocation48_spill] sm:$0xff] %v6144_v46  ;;  %3366 = vrsqrt.f32 %v2476_v22  ;;  %v6305_v22 = vmul.f32 0.0051020407, %v5761_v41  ;;  %7231 = vst [vmem:[#allocation62_spill] sm:$0xff] %v6321_v19  ;;  %v6377_v19 = vmul.f32 0.0051020407, %v5781_v12 }
 0x378   : > { %7233 = vst [vmem:[#allocation64_spill] sm:$0xff] %v6328_v9  ;;  %7236 = vst [vmem:[#allocation67_spill] sm:$0xff] %v6353_v49  ;;  %v6386_v5 = vld [vmem:[%s7064_s5 + $0xc8] sm:$0xff]  ;;  %v6399_v12 = vld [vmem:[%s7064_s5 + $0xf0] sm:$0xff] }
 0x379   : > { %v6151_v13 = vpop.permute.xlu1 %2739  ;;  %7239 = vst [vmem:[#allocation70_spill] sm:$0xff] %v6386_v5  ;;  %v6434_v5 = vld [vmem:[%s7064_s5 + $0x110] sm:$0xff] }
 0x37a   : > { %7218 = vst [vmem:[#allocation49_spill] sm:$0xff] %v6151_v13  ;;  %v6154_v6 = vpop.permute.xlu0 %2794  ;;  %v6314_v13 = vld [vmem:[%s7064_s5 + $0xb8] sm:$0xff]  ;;  %7245 = vst [vmem:[#allocation76_spill] sm:$0xff] %v6434_v5  ;;  %v6486_v5 = vmul.f32 %v6422_v27, %v6422_v27 }
 0x37b   : > { %7219 = vst [vmem:[#allocation50_spill] sm:$0xff] %v6154_v6  ;;  %v2448_v6 = vsub.f32 %v2384_v23, %v2416_v50  ;;  %v6288_v23 = vmul.f32 %v6218_v16, %v6218_v16  ;;  %v6337_v50 = vld [vmem:[%s7064_s5 + $0xa8] sm:$0xff] }
 0x37c   : > { %7234 = vst [vmem:[#allocation65_spill] sm:$0xff] %v6337_v50  ;;  %v6425_v50 = vmul.f32 0.0051020407, %v5791_v39  ;;  %v6445_v39 = vmul.f32 %v6377_v19, %v6377_v19 }
 0x37d   : > { %v6161_v18 = vpop.permute.xlu1 %2749  ;;  %v2480_v41 = vadd.f32 1e-05, %v2448_v6  ;;  %v6369_v6 = vld [vmem:[%s7064_s5 + $0xc0] sm:$0xff] }
 0x37e   : > { %7220 = vst [vmem:[#allocation51_spill] sm:$0xff] %v6161_v18  ;;  %v6164_v0 = vpop.permute.xlu0 %2804  ;;  %7237 = vst [vmem:[#allocation68_spill] sm:$0xff] %v6369_v6  ;;  %v6406_v6 = vld [vmem:[%s7064_s5 + $0xf8] sm:$0xff] }
 0x37f   : > { %7221 = vst [vmem:[#allocation52_spill] sm:$0xff] %v6164_v0  ;;  %v6265_v0 = vld [vmem:[%s7064_s5 + $0x98] sm:$0xff]  ;;  %7241 = vst [vmem:[#allocation72_spill] sm:$0xff] %v6406_v6  ;;  %v6429_v6 = vmul.f32 %v6353_v49, %v6353_v49 }
 0x380   : > { %v3365_v38 = vpop.eup %3364 }
 0x381   : > { %v6188_v57 = vpop.permute.xlu1 %2759 }
 0x382   : > { %7222 = vst [vmem:[#allocation53_spill] sm:$0xff] %v6188_v57  ;;  %v6197_v32 = vpop.permute.xlu0 %2814  ;;  %v2478_v57 = vadd.f32 1e-05, %v2446_v29  ;;  %v6284_v29 = vmul.f32 0.0051020407, %v5753_v40 }
 0x383   : > { %7223 = vst [vmem:[#allocation54_spill] sm:$0xff] %v6197_v32  ;;  %v6260_v32 = vmul.f32 0.0051020407, %v5751_v25  ;;  %v6279_v25 = vld [vmem:[%s7064_s5 + $0x80] sm:$0xff] }
 0x384   : > { %7228 = vst [vmem:[#allocation59_spill] sm:$0xff] %v6279_v25  ;;  %7229 = vst [vmem:[#allocation60_spill] sm:$0xff] %v6284_v29  ;;  %3368 = vrsqrt.f32 %v2478_v57  ;;  %v6348_v57 = vld [vmem:[%s7064_s5 + $0xd0] sm:$0xff]  ;;  %v6357_v58 = vmul.f32 %v6284_v29, %v6284_v29  ;;  %v2390_v25 = vmul.f32 0.0051020407, %v5907_v47 }
 0x385   : > { %v6257_v10 = vpop.permute.xlu1 %2769  ;;  %v6332_v46 = vmul.f32 %v6260_v32, %v6260_v32  ;;  %3370 = vrsqrt.f32 %v2480_v41  ;;  %v2392_v47 = vmul.f32 0.0051020407, %v5917_v36  ;;  %v2385_v36 = vmul.f32 0.0051020407, %v5889_v21  ;;  %v6470_v41 = vld [vmem:[%s7064_s5 + $0x138] sm:$0xff] }
 0x386   : > { %7226 = vst [vmem:[#allocation57_spill] sm:$0xff] %v6257_v10  ;;  %v6269_v18 = vpop.permute.xlu0 %2824  ;;  %v6274_v10 = vmul.f32 %v6200_v60, %v6200_v60  ;;  %v2452_v60 = vsub.f32 %v2388_v24, %v6288_v23  ;;  %v7248_v23 = vsub.f32 %v6193_v33, %v6139_v56  ;;  %v3367_v33 = vpop.eup %3366  ;;  %v6490_v21 = vmul.f32 %v6425_v50, %v6425_v50 }
 0x387   : > { %7227 = vst [vmem:[#allocation58_spill] sm:$0xff] %v6269_v18  ;;  %v6309_v18 = vmul.f32 %v6237_v43, %v6237_v43 }
 0x389   : > { %v6325_v40 = vpop.permute.xlu1 %2779 }
 0x38a   : > { %7232 = vst [vmem:[#allocation63_spill] sm:$0xff] %v6325_v40  ;;  %v6341_v53 = vpop.permute.xlu0 %2834  ;;  %v2450_v40 = vsub.f32 %v2386_v35, %v6241_v28  ;;  %v6362_v28 = vld [vmem:[%s7064_s5 + $0xd8] sm:$0xff]  ;;  %v6374_v35 = vmul.f32 0.0051020407, %v5773_v14  ;;  %v6394_v14 = vmul.f32 %v6328_v9, %v6328_v9  ;;  %v2454_v9 = vsub.f32 %v2390_v25, %v6332_v46  ;;  %v7254_v25 = vld [vmem:[#allocation20_spill] sm:$0xff] }
 0x38b   : > { %7235 = vst [vmem:[#allocation66_spill] sm:$0xff] %v6341_v53  ;;  %v6381_v53 = vmul.f32 %v6305_v22, %v6305_v22 }
 0x38c   : > { %7238 = vst [vmem:[#allocation69_spill] sm:$0xff] %v6374_v35  ;;  %v2482_v3 = vadd.f32 1e-05, %v2450_v40  ;;  %v6441_v11 = vmul.f32 %v6374_v35, %v6374_v35  ;;  %v6450_v40 = vld [vmem:[%s7064_s5 + $0x118] sm:$0xff]  ;;  %v6463_v35 = vld [vmem:[%s7064_s5 + $0x130] sm:$0xff] }
 0x38d   : > { %v6390_v43 = vpop.permute.xlu1 %2789  ;;  %7246 = vst [vmem:[#allocation77_spill] sm:$0xff] %v6450_v40  ;;  %7249 = vst [vmem:[#allocation79_spill] sm:$0xff] %v6463_v35  ;;  %v7251_v40 = vsub.f32 %v6206_v62, %v6139_v56  ;;  %v2394_v35 = vmul.f32 0.0051020407, %v5927_v8 }
 0x38e   : > { %7240 = vst [vmem:[#allocation71_spill] sm:$0xff] %v6390_v43  ;;  %v6413_v43 = vld [vmem:[%s7064_s5 + $0xe0] sm:$0xff]  ;;  %v6417_v29 = vpop.permute.xlu0 %2844  ;;  %3372 = vrsqrt.f32 %v2482_v3  ;;  %v2387_v3 = vmul.f32 0.0051020407, %v7254_v25 }
 0x38f   : > { %7242 = vst [vmem:[#allocation73_spill] sm:$0xff] %v6413_v43  ;;  %7243 = vst [vmem:[#allocation74_spill] sm:$0xff] %v6417_v29  ;;  %v2603_v29 = vmul.f32 %v3365_v38, %v7248_v23  ;;  %v2484_v23 = vadd.f32 1e-05, %v2452_v60  ;;  %v2604_v49 = vmul.f32 %v3365_v38, %v7251_v40  ;;  %v6481_v43 = vmul.f32 0.0051020407, %v5793_v51 }
 0x390   : > { %v2456_v60 = vsub.f32 %v2392_v47, %v6381_v53  ;;  %v6498_v51 = vld [vmem:[%s7064_s5 + $0x150] sm:$0xff]  ;;  %v2449_v38 = vsub.f32 %v2385_v36, %v6274_v10  ;;  %v7255_v53 = vsub.f32 %v6177_v59, %v6147_v42  ;;  %v2458_v10 = vsub.f32 %v2394_v35, %v6429_v6  ;;  %v7258_v36 = vld [vmem:[#allocation24_spill] sm:$0xff]  ;;  %v6520_v59 = vld [vmem:[%s7064_s5 + $0x158] sm:$0xff] }
 0x391   : > { %v6454_v24 = vpop.permute.xlu1 %2799  ;;  %v2859_v46 = vmul.f32 %v6035_v45, %v2603_v29  ;;  %v2860_v56 = vmul.f32 %v6035_v45, %v2604_v49  ;;  %7252 = vst [vmem:[#allocation81_spill] sm:$0xff] %v6498_v51  ;;  %v7256_v45 = vsub.f32 %v6184_v37, %v6147_v42  ;;  %v3369_v40 = vpop.eup %3368  ;;  %3374 = vrsqrt.f32 %v2484_v23  ;;  %v7257_v51 = vld [vmem:[#allocation14_spill] sm:$0xff]  ;;  %v7259_v35 = vld [vmem:[#allocation15_spill] sm:$0xff] }
 0x392   : > { %7247 = vst [vmem:[#allocation78_spill] sm:$0xff] %v6454_v24  ;;  %v6474_v24 = vpop.permute.xlu0 %2854  ;;  %v2607_v29 = vmul.f32 %v3367_v33, %v7255_v53  ;;  %v2396_v25 = vmul.f32 0.0051020407, %v7258_v36  ;;  %v2580_v42 = vsub.f32 %v6520_v59, %v6425_v50  ;;  %v2488_v37 = vadd.f32 1e-05, %v2456_v60 }
 0x393   : > { %7250 = vst [vmem:[#allocation80_spill] sm:$0xff] %v6474_v24  ;;  %v2608_v49 = vmul.f32 %v3367_v33, %v7256_v45  ;;  %v2486_v24 = vadd.f32 1e-05, %v2454_v9  ;;  %v6526_v9 = vmul.f32 %v6481_v43, %v6481_v43  ;;  %v6540_v60 = vmul.f32 0.0051020407, %v7259_v35 }
 0x394   : > { %v2863_v33 = vmul.f32 %v6079_v34, %v2607_v29  ;;  %v2490_v35 = vadd.f32 1e-05, %v2458_v10 }
 0x395   : > { %v6502_v62 = vpop.permute.xlu1 %2809  ;;  %v2864_v23 = vmul.f32 %v6079_v34, %v2608_v49  ;;  %v7260_v34 = vsub.f32 %v6213_v2, %v6157_v61  ;;  %3376 = vrsqrt.f32 %v2486_v24  ;;  %v3371_v49 = vpop.eup %3370  ;;  %v7263_v2 = vld [vmem:[#allocation26_spill] sm:$0xff] }
 0x396   : > { %7253 = vst [vmem:[#allocation82_spill] sm:$0xff] %v6502_v62  ;;  %v2961_v47 = vpop.permute.xlu0 %2960  ;;  %v6513_v62 = vmul.f32 0.0051020407, %v7257_v51  ;;  %3378 = vrsqrt.f32 %v2488_v37  ;;  %v7264_v37 = vsub.f32 %v6232_v52, %v6167_v20 }
 0x397   : > { %v3115_v27 = vadd.f32 %v2961_v47, %v2859_v46  ;;  %v3116_v8 = vadd.f32 %v2961_v47, %v2860_v56  ;;  %v2481_v46 = vadd.f32 1e-05, %v2449_v38  ;;  %v2451_v56 = vsub.f32 %v2387_v3, %v6309_v18  ;;  %v7262_v47 = vld [vmem:[#allocation21_spill] sm:$0xff] }
 0x398   : > { %v2611_v51 = vmul.f32 %v3369_v40, %v7260_v34  ;;  %v2389_v36 = vmul.f32 0.0051020407, %v7262_v47  ;;  %v2460_v38 = vsub.f32 %v2396_v25, %v6445_v39  ;;  %v6553_v18 = vmul.f32 %v6513_v62, %v6513_v62  ;;  %v7267_v47 = vld [vmem:[#allocation28_spill] sm:$0xff] }
 0x399   : > { %3179 = vst [vmem:[%s7064_s5 + $0x10] sm:$0xff] %v3115_v27  ;;  %3180 = vst.msk [vmem:[%s7064_s5 + $0x18] sm:$0xff] %vm2023_vm2, %v3116_v8  ;;  %v6537_v6 = vpop.permute.xlu1 %2819  ;;  %v7261_v27 = vsub.f32 %v6225_v48, %v6157_v61  ;;  %v2398_v3 = vmul.f32 0.0051020407, %v7263_v2  ;;  %3380 = vrsqrt.f32 %v2481_v46  ;;  %v2483_v39 = vadd.f32 1e-05, %v2451_v56 }
 0x39a   : > { %v2971_v53 = vpop.permute.xlu0 %2970  ;;  %v2867_v24 = vmul.f32 %v6116_v4, %v2611_v51  ;;  %3382 = vrsqrt.f32 %v2490_v35  ;;  %v2400_v2 = vmul.f32 0.0051020407, %v7267_v47 }
 0x39b   : > { %v2612_v29 = vmul.f32 %v3369_v40, %v7261_v27  ;;  %v3119_v45 = vadd.f32 %v2971_v53, %v2863_v33  ;;  %v3120_v8 = vadd.f32 %v2971_v53, %v2864_v23  ;;  %v6569_v40 = vmul.f32 %v6540_v60, %v6540_v60  ;;  %v3373_v51 = vpop.eup %3372  ;;  %v7266_v27 = vld [vmem:[#allocation22_spill] sm:$0xff] }
 0x39c   : > { %v2615_v33 = vmul.f32 %v3371_v49, %v7264_v37  ;;  %v7265_v23 = vsub.f32 %v6253_v7, %v6167_v20  ;;  %v2453_v53 = vsub.f32 %v2389_v36, %v6357_v58  ;;  %v7268_v58 = vld [vmem:[#allocation16_spill] sm:$0xff]  ;;  %v7270_v36 = vld [vmem:[#allocation18_spill] sm:$0xff]  ;;  %3384 = vrsqrt.f32 %v2483_v39 }
 0x39d   : > { %v2868_v61 = vmul.f32 %v6116_v4, %v2612_v29  ;;  %3183 = vst [vmem:[%s7064_s5 + $0x30] sm:$0xff] %v3119_v45  ;;  %3184 = vst.msk [vmem:[%s7064_s5 + $0x38] sm:$0xff] %vm2023_vm2, %v3120_v8  ;;  %v6565_v48 = vpop.permute.xlu1 %2829  ;;  %v6574_v4 = vld [vmem:[%s7064_s5 + $0x170] sm:$0xff]  ;;  %v2391_v29 = vmul.f32 0.0051020407, %v7266_v27  ;;  %v2462_v8 = vsub.f32 %v2398_v3, %v6490_v21  ;;  %v2464_v39 = vsub.f32 %v2400_v2, %v6553_v18 }
 0x39e   : > { %v2583_v10 = vsub.f32 %v6574_v4, %v6513_v62  ;;  %v2981_v25 = vpop.permute.xlu0 %2980  ;;  %v2616_v46 = vmul.f32 %v3371_v49, %v7265_v23  ;;  %v2492_v45 = vadd.f32 1e-05, %v2460_v38  ;;  %v2871_v52 = vmul.f32 %v6141_v26, %v2615_v33  ;;  %v7269_v21 = vld [vmem:[#allocation17_spill] sm:$0xff]  ;;  %v3375_v23 = vpop.eup %3374 }
 0x39f   : > { %v3123_v56 = vadd.f32 %v2981_v25, %v2867_v24  ;;  %v3124_v34 = vadd.f32 %v2981_v25, %v2868_v61  ;;  %v6600_v20 = vmul.f32 0.0051020407, %v7268_v58  ;;  %v6603_v49 = vmul.f32 0.0051020407, %v7269_v21 }
 0x3a0   : > { %v2872_v37 = vmul.f32 %v6141_v26, %v2616_v46  ;;  %v6606_v35 = vmul.f32 0.0051020407, %v7270_v36  ;;  %v7271_v38 = vsub.f32 %v6246_v1, %v6172_v30  ;;  %v7272_v24 = vsub.f32 %v6265_v0, %v6172_v30  ;;  %v7277_v36 = vld [vmem:[#allocation19_spill] sm:$0xff] }
 0x3a1   : > { %3187 = vst [vmem:[%s7064_s5 + $0x50] sm:$0xff] %v3123_v56  ;;  %3188 = vst.msk [vmem:[%s7064_s5 + $0x58] sm:$0xff] %vm2023_vm2, %v3124_v34  ;;  %v6597_v7 = vpop.permute.xlu1 %2839  ;;  %v2485_v46 = vadd.f32 1e-05, %v2453_v53  ;;  %v2455_v56 = vsub.f32 %v2391_v29, %v6394_v14  ;;  %v7273_v34 = vld [vmem:[#allocation23_spill] sm:$0xff]  ;;  %3386 = vrsqrt.f32 %v2492_v45  ;;  %v2434_v30 = vmul.f32 %v6600_v20, %v6600_v20  ;;  %v7274_v14 = vld [vmem:[#allocation30_spill] sm:$0xff] }
 0x3a2   : > { %v2991_v26 = vpop.permute.xlu0 %2990  ;;  %v2619_v3 = vmul.f32 %v3373_v51, %v7271_v38  ;;  %v2620_v61 = vmul.f32 %v3373_v51, %v7272_v24  ;;  %v2393_v27 = vmul.f32 0.0051020407, %v7273_v34  ;;  %v2494_v47 = vadd.f32 1e-05, %v2462_v8  ;;  %v3377_v21 = vpop.eup %3376 }
 0x3a3   : > { %v3127_v25 = vadd.f32 %v2991_v26, %v2871_v52  ;;  %v3128_v33 = vadd.f32 %v2991_v26, %v2872_v37  ;;  %v2402_v18 = vmul.f32 0.0051020407, %v7274_v14  ;;  %v6633_v51 = vmul.f32 %v6603_v49, %v6603_v49  ;;  %v7281_v14 = vld [vmem:[#allocation25_spill] sm:$0xff] }
 0x3a4   : > { %v2875_v58 = vmul.f32 %v6081_v63, %v2619_v3  ;;  %v2876_v1 = vmul.f32 %v6081_v63, %v2620_v61  ;;  %v6637_v63 = vmul.f32 %v6606_v35, %v6606_v35  ;;  %v7275_v29 = vsub.f32 %v6293_v15, %v6218_v16 }
 0x3a5   : > { %3191 = vst [vmem:[%s7064_s5 + $0x70] sm:$0xff] %v3127_v25  ;;  %3192 = vst.msk [vmem:[%s7064_s5 + $0x78] sm:$0xff] %vm2023_vm2, %v3128_v33  ;;  %v6626_v0 = vpop.permute.xlu1 %2849  ;;  %v7276_v8 = vsub.f32 %v6314_v13, %v6218_v16  ;;  %v6646_v26 = vmul.f32 0.0051020407, %v7277_v36  ;;  %3388 = vrsqrt.f32 %v2485_v46  ;;  %v2487_v38 = vadd.f32 1e-05, %v2455_v56  ;;  %v3379_v16 = vpop.eup %3378 }
 0x3a6   : > { %v3001_v53 = vpop.permute.xlu0 %3000  ;;  %v2623_v45 = vmul.f32 %v3375_v23, %v7275_v29  ;;  %v2457_v3 = vsub.f32 %v2393_v27, %v6441_v11  ;;  %3390 = vrsqrt.f32 %v2494_v47  ;;  %v2496_v24 = vadd.f32 1e-05, %v2464_v39  ;;  %v7278_v33 = vld [vmem:[#allocation31_spill] sm:$0xff] }
 0x3a7   : > { %v2624_v2 = vmul.f32 %v3375_v23, %v7276_v8  ;;  %v3131_v52 = vadd.f32 %v3001_v53, %v2875_v58  ;;  %v3132_v37 = vadd.f32 %v3001_v53, %v2876_v1  ;;  %v2466_v25 = vsub.f32 %v2402_v18, %v2434_v30 }
 0x3a8   : > { %v2879_v61 = vmul.f32 %v6106_v54, %v2623_v45  ;;  %v2404_v11 = vmul.f32 0.0051020407, %v7278_v33  ;;  %v7279_v34 = vsub.f32 %v6348_v57, %v6260_v32  ;;  %v7280_v47 = vsub.f32 %v6362_v28, %v6260_v32  ;;  %v7287_v33 = vld [vmem:[#allocation27_spill] sm:$0xff] }
 0x3a9   : > { %v2880_v15 = vmul.f32 %v6106_v54, %v2624_v2  ;;  %3195 = vst [vmem:[%s7064_s5 + $0x90] sm:$0xff] %v3131_v52  ;;  %3196 = vst.msk [vmem:[%s7064_s5 + $0x98] sm:$0xff] %vm2023_vm2, %v3132_v37  ;;  %v2956_v13 = vpop.permute.xlu1 %2955  ;;  %v3381_v54 = vpop.eup %3380  ;;  %3392 = vrsqrt.f32 %v2487_v38  ;;  %v2489_v30 = vadd.f32 1e-05, %v2457_v3  ;;  %v2395_v18 = vmul.f32 0.0051020407, %v7281_v14 }
 0x3aa   : > { %v3113_v23 = vadd.f32 %v2956_v13, %v6067_v44  ;;  %v3114_v46 = vadd.f32 %v2956_v13, %v6069_v17  ;;  %v3011_v56 = vpop.permute.xlu0 %3010  ;;  %v2627_v27 = vmul.f32 %v3377_v21, %v7279_v34  ;;  %v2628_v39 = vmul.f32 %v3377_v21, %v7280_v47  ;;  %v3383_v17 = vpop.eup %3382  ;;  %v7284_v21 = vld [vmem:[#allocation32_spill] sm:$0xff]  ;;  %v7297_v14 = vld [vmem:[#allocation77_spill] sm:$0xff] }
 0x3ab   : > { %v3135_v58 = vadd.f32 %v3011_v56, %v2879_v61  ;;  %v3136_v1 = vadd.f32 %v3011_v56, %v2880_v15  ;;  %v6670_v44 = vmul.f32 %v6646_v26, %v6646_v26  ;;  %3394 = vrsqrt.f32 %v2496_v24  ;;  %v7285_v38 = vld [vmem:[#allocation72_spill] sm:$0xff] }
 0x3ac   : > { %3177 = vst [vmem:[%s7064_s5] sm:$0xff] %v3113_v23  ;;  %3178 = vst.msk [vmem:[%s7064_s5 + $0x8] sm:$0xff] %vm2023_vm2, %v3114_v46  ;;  %v2883_v32 = vmul.f32 %v6118_v31, %v2627_v27  ;;  %v2884_v57 = vmul.f32 %v6118_v31, %v2628_v39  ;;  %v7282_v28 = vsub.f32 %v6399_v12, %v6305_v22  ;;  %v2498_v45 = vadd.f32 1e-05, %v2466_v25  ;;  %v7283_v31 = vld [vmem:[#allocation34_spill] sm:$0xff]  ;;  %v3385_v12 = vpop.eup %3384  ;;  %v7288_v23 = vld [vmem:[#allocation59_spill] sm:$0xff] }
 0x3ad   : > { %3199 = vst [vmem:[%s7064_s5 + $0xb0] sm:$0xff] %v3135_v58  ;;  %3200 = vst.msk [vmem:[%s7064_s5 + $0xb8] sm:$0xff] %vm2023_vm2, %v3136_v1  ;;  %v2966_v29 = vpop.permute.xlu1 %2965  ;;  %v2468_v8 = vsub.f32 %v2404_v11, %v6633_v51  ;;  %v2406_v36 = vmul.f32 0.0051020407, %v7284_v21  ;;  %v7286_v3 = vsub.f32 %v7285_v38, %v6305_v22  ;;  %v2459_v13 = vsub.f32 %v2395_v18, %v6486_v5  ;;  %v7289_v51 = vld [vmem:[#allocation55_spill] sm:$0xff]  ;;  %v7291_v46 = vld [vmem:[#allocation61_spill] sm:$0xff] }
 0x3ae   : > { %v2631_v53 = vmul.f32 %v3379_v16, %v7282_v28  ;;  %v3117_v2 = vadd.f32 %v2966_v29, %v6060_v55  ;;  %v3118_v52 = vadd.f32 %v2966_v29, %v7283_v31  ;;  %v3021_v37 = vpop.permute.xlu0 %3020  ;;  %v2397_v25 = vmul.f32 0.0051020407, %v7287_v33  ;;  %v3387_v22 = vpop.eup %3386  ;;  %v7293_v5 = vld [vmem:[#allocation47_spill] sm:$0xff]  ;;  %v7294_v47 = vld [vmem:[#allocation76_spill] sm:$0xff] }
 0x3af   : > { %v2632_v24 = vmul.f32 %v3379_v16, %v7286_v3  ;;  %v3139_v61 = vadd.f32 %v3021_v37, %v2883_v32  ;;  %v3140_v15 = vadd.f32 %v3021_v37, %v2884_v57  ;;  %v7290_v11 = vsub.f32 %v7288_v23, %v7289_v51  ;;  %v7295_v39 = vld [vmem:[#allocation67_spill] sm:$0xff]  ;;  %v7300_v29 = vld [vmem:[#allocation40_spill] sm:$0xff] }
 0x3b0   : > { %v7292_v56 = vsub.f32 %v7291_v46, %v7289_v51  ;;  %3181 = vst [vmem:[%s7064_s5 + $0x20] sm:$0xff] %v3117_v2  ;;  %3182 = vst.msk [vmem:[%s7064_s5 + $0x28] sm:$0xff] %vm2023_vm2, %v3118_v52  ;;  %v2887_v16 = vmul.f32 %v7293_v5, %v2631_v53  ;;  %v7296_v58 = vsub.f32 %v7294_v47, %v7295_v39  ;;  %3396 = vrsqrt.f32 %v2498_v45  ;;  %v7299_v28 = vld [vmem:[#allocation39_spill] sm:$0xff]  ;;  %v7311_v47 = vld [vmem:[#allocation46_spill] sm:$0xff] }
 0x3b1   : > { %v2617_v55 = vmul.f32 %v3381_v54, %v7290_v11  ;;  %v2888_v27 = vmul.f32 %v7293_v5, %v2632_v24  ;;  %3203 = vst [vmem:[%s7064_s5 + $0xd0] sm:$0xff] %v3139_v61  ;;  %3204 = vst.msk [vmem:[%s7064_s5 + $0xd8] sm:$0xff] %vm2023_vm2, %v3140_v15  ;;  %v2976_v32 = vpop.permute.xlu1 %2975  ;;  %v2500_v57 = vadd.f32 1e-05, %v2468_v8  ;;  %v2470_v52 = vsub.f32 %v2406_v36, %v6637_v63  ;;  %v7302_v61 = vld [vmem:[#allocation62_spill] sm:$0xff]  ;;  %v7303_v15 = vld [vmem:[#allocation56_spill] sm:$0xff] }
 0x3b2   : > { %v2618_v34 = vmul.f32 %v3381_v54, %v7292_v56  ;;  %v2635_v1 = vmul.f32 %v3383_v17, %v7296_v58  ;;  %v7298_v54 = vsub.f32 %v7297_v14, %v7295_v39  ;;  %v3121_v53 = vadd.f32 %v2976_v32, %v7299_v28  ;;  %v3031_v31 = vpop.permute.xlu0 %3030  ;;  %v3389_v63 = vpop.eup %3388  ;;  %v7305_v8 = vld [vmem:[#allocation29_spill] sm:$0xff] }
 0x3b3   : > { %v3122_v2 = vadd.f32 %v2976_v32, %v7300_v29  ;;  %v3143_v21 = vadd.f32 %v3031_v31, %v2887_v16  ;;  %v3144_v38 = vadd.f32 %v3031_v31, %v2888_v27  ;;  %3398 = vrsqrt.f32 %v2489_v30  ;;  %v7306_v30 = vld [vmem:[#allocation48_spill] sm:$0xff]  ;;  %v3391_v46 = vpop.eup %3390  ;;  %v7310_v16 = vld [vmem:[#allocation45_spill] sm:$0xff] }
 0x3b4   : > { %v2636_v18 = vmul.f32 %v3383_v17, %v7298_v54  ;;  %v7301_v17 = vld [vmem:[#allocation33_spill] sm:$0xff]  ;;  %v2491_v3 = vadd.f32 1e-05, %v2459_v13  ;;  %v2461_v24 = vsub.f32 %v2397_v25, %v6526_v9  ;;  %v7304_v33 = vsub.f32 %v7302_v61, %v7303_v15  ;;  %3185 = vst [vmem:[%s7064_s5 + $0x40] sm:$0xff] %v3121_v53  ;;  %v7307_v25 = vld [vmem:[#allocation79_spill] sm:$0xff] }
 0x3b5   : > { %v2408_v37 = vmul.f32 0.0051020407, %v7301_v17  ;;  %3186 = vst.msk [vmem:[%s7064_s5 + $0x48] sm:$0xff] %vm2023_vm2, %v3122_v2  ;;  %v2399_v36 = vmul.f32 0.0051020407, %v7305_v8  ;;  %v2891_v13 = vmul.f32 %v7306_v30, %v2635_v1  ;;  %v7308_v23 = vsub.f32 %v7307_v25, %v6377_v19  ;;  %3207 = vst [vmem:[%s7064_s5 + $0xf0] sm:$0xff] %v3143_v21  ;;  %v2986_v11 = vpop.permute.xlu1 %2985 }
 0x3b6   : > { %v2621_v45 = vmul.f32 %v3385_v12, %v7304_v33  ;;  %v2892_v9 = vmul.f32 %v7306_v30, %v2636_v18  ;;  %3208 = vst.msk [vmem:[%s7064_s5 + $0xf8] sm:$0xff] %vm2023_vm2, %v3144_v38  ;;  %3400 = vrsqrt.f32 %v2500_v57  ;;  %v7309_v56 = vsub.f32 %v6470_v41, %v6377_v19  ;;  %v3041_v58 = vpop.permute.xlu0 %3040  ;;  %v7312_v32 = vld [vmem:[#allocation49_spill] sm:$0xff]  ;;  %v3393_v41 = vpop.eup %3392  ;;  %v7318_v33 = vld [vmem:[#allocation51_spill] sm:$0xff]  ;;  %v7319_v30 = vld [vmem:[#allocation68_spill] sm:$0xff] }
 0x3b7   : > { %v2639_v51 = vmul.f32 %v3387_v22, %v7308_v23  ;;  %v3125_v27 = vadd.f32 %v2986_v11, %v7310_v16  ;;  %v3126_v39 = vadd.f32 %v2986_v11, %v7311_v47  ;;  %v2502_v1 = vadd.f32 1e-05, %v2470_v52  ;;  %v7313_v57 = vld [vmem:[#allocation65_spill] sm:$0xff] }
 0x3b8   : > { %v2640_v5 = vmul.f32 %v3387_v22, %v7309_v56  ;;  %v2472_v14 = vsub.f32 %v2408_v37, %v6670_v44  ;;  %v3147_v54 = vadd.f32 %v3041_v58, %v2891_v13  ;;  %v3148_v18 = vadd.f32 %v3041_v58, %v2892_v9  ;;  %v3395_v31 = vpop.eup %3394  ;;  %v7316_v52 = vld [vmem:[#allocation81_spill] sm:$0xff]  ;;  %v7320_v13 = vld [vmem:[#allocation60_spill] sm:$0xff] }
 0x3b9   : > { %3402 = vrsqrt.f32 %v2491_v3  ;;  %v2873_v28 = vmul.f32 %v7312_v32, %v2617_v55  ;;  %v2874_v53 = vmul.f32 %v7312_v32, %v2618_v34  ;;  %v7314_v29 = vsub.f32 %v7313_v57, %v7303_v15  ;;  %3189 = vst [vmem:[%s7064_s5 + $0x60] sm:$0xff] %v3125_v27  ;;  %3190 = vst.msk [vmem:[%s7064_s5 + $0x68] sm:$0xff] %vm2023_vm2, %v3126_v39  ;;  %v7315_v55 = vld [vmem:[#allocation50_spill] sm:$0xff] }
 0x3ba   : > { %v2493_v44 = vadd.f32 1e-05, %v2461_v24  ;;  %v2463_v22 = vsub.f32 %v2399_v36, %v6569_v40  ;;  %v2895_v2 = vmul.f32 %v7315_v55, %v2639_v51  ;;  %v2896_v34 = vmul.f32 %v7315_v55, %v2640_v5  ;;  %3211 = vst [vmem:[%s7064_s5 + $0x110] sm:$0xff] %v3147_v54  ;;  %3212 = vst.msk [vmem:[%s7064_s5 + $0x118] sm:$0xff] %vm2023_vm2, %v3148_v18  ;;  %v3051_v3 = vpop.permute.xlu0 %3050  ;;  %v7323_v51 = vld [vmem:[#allocation70_spill] sm:$0xff]  ;;  %v7325_v54 = vld [vmem:[#allocation53_spill] sm:$0xff] }
 0x3bb   : > { %v2622_v19 = vmul.f32 %v3385_v12, %v7314_v29  ;;  %v2996_v12 = vpop.permute.xlu1 %2995  ;;  %v7317_v17 = vsub.f32 %v7316_v52, %v6425_v50  ;;  %v2644_v40 = vmul.f32 %v3391_v46, %v2580_v42  ;;  %3404 = vrsqrt.f32 %v2502_v1  ;;  %v3450_v50 = vld [vmem:[%s7064_s5 + $0x178] sm:$0xff]  ;;  %v7322_v42 = vld [vmem:[#allocation52_spill] sm:$0xff] }
 0x3bc   : > { %v3129_v21 = vadd.f32 %v2996_v12, %v2873_v28  ;;  %v3130_v38 = vadd.f32 %v2996_v12, %v2874_v53  ;;  %v2504_v24 = vadd.f32 1e-05, %v2472_v14  ;;  %v3151_v61 = vadd.f32 %v3051_v3, %v2895_v2  ;;  %v3451_v28 = vld [vmem:[%s7064_s5 + $0xe8] sm:$0xff]  ;;  %v7327_v29 = vld [vmem:[#allocation54_spill] sm:$0xff] }
 0x3bd   : > { %v2643_v37 = vmul.f32 %v3391_v46, %v7317_v17  ;;  %v3152_v15 = vadd.f32 %v3051_v3, %v2896_v34  ;;  %v2877_v8 = vmul.f32 %v7318_v33, %v2621_v45  ;;  %v2878_v36 = vmul.f32 %v7318_v33, %v2622_v19  ;;  %v3397_v58 = vpop.eup %3396  ;;  %v7326_v53 = vld [vmem:[#allocation64_spill] sm:$0xff]  ;;  %v3453_v34 = vld [vmem:[%s7064_s5 + $0x198] sm:$0xff] }
 0x3be   : > { %v7321_v9 = vsub.f32 %v7319_v30, %v7320_v13  ;;  %v2584_v59 = vsub.f32 %v3450_v50, %v6513_v62  ;;  %3193 = vst [vmem:[%s7064_s5 + $0x80] sm:$0xff] %v3129_v21  ;;  %3194 = vst.msk [vmem:[%s7064_s5 + $0x88] sm:$0xff] %vm2023_vm2, %v3130_v38  ;;  %3406 = vrsqrt.f32 %v2493_v44  ;;  %v2900_v23 = vmul.f32 %v7322_v42, %v2644_v40  ;;  %v3061_v39 = vpop.permute.xlu0 %3060  ;;  %v3452_v62 = vld [vmem:[%s7064_s5 + $0x190] sm:$0xff] }
 0x3bf   : > { %v2899_v45 = vmul.f32 %v7322_v42, %v2643_v37  ;;  %v7324_v11 = vsub.f32 %v7323_v51, %v7320_v13  ;;  %3215 = vst [vmem:[%s7064_s5 + $0x130] sm:$0xff] %v3151_v61  ;;  %3216 = vst.msk [vmem:[%s7064_s5 + $0x138] sm:$0xff] %vm2023_vm2, %v3152_v15  ;;  %v3006_v56 = vpop.permute.xlu1 %3005  ;;  %v2495_v5 = vadd.f32 1e-05, %v2463_v22  ;;  %v2647_v16 = vmul.f32 %v3395_v31, %v2583_v10  ;;  %v7328_v22 = vld [vmem:[#allocation73_spill] sm:$0xff] }
 0x3c0   : > { %v2625_v25 = vmul.f32 %v3389_v63, %v7321_v9  ;;  %v3133_v27 = vadd.f32 %v3006_v56, %v2877_v8  ;;  %v3134_v47 = vadd.f32 %v3006_v56, %v2878_v36  ;;  %3408 = vrsqrt.f32 %v2504_v24  ;;  %v3399_v10 = vpop.eup %3398  ;;  %v7330_v61 = vld [vmem:[#allocation57_spill] sm:$0xff]  ;;  %v3454_v8 = vld [vmem:[%s7064_s5 + $0x100] sm:$0xff] }
 0x3c1   : > { %v2626_v46 = vmul.f32 %v3389_v63, %v7324_v11  ;;  %v2648_v63 = vmul.f32 %v3395_v31, %v2584_v59  ;;  %v3155_v1 = vadd.f32 %v3061_v39, %v2899_v45  ;;  %v3156_v14 = vadd.f32 %v3061_v39, %v2900_v23  ;;  %v7331_v36 = vld [vmem:[#allocation69_spill] sm:$0xff]  ;;  %v3457_v23 = vld [vmem:[%s7064_s5 + $0x1b8] sm:$0xff] }
 0x3c2   : > { %v2881_v18 = vmul.f32 %v7325_v54, %v2625_v25  ;;  %v2566_v57 = vsub.f32 %v3451_v28, %v7326_v53  ;;  %v2587_v4 = vsub.f32 %v3452_v62, %v6600_v20  ;;  %3197 = vst [vmem:[%s7064_s5 + $0xa0] sm:$0xff] %v3133_v27  ;;  %3198 = vst.msk [vmem:[%s7064_s5 + $0xa8] sm:$0xff] %vm2023_vm2, %v3134_v47  ;;  %3410 = vrsqrt.f32 %v2495_v5  ;;  %v3071_v40 = vpop.permute.xlu0 %3070  ;;  %v7332_v25 = vld [vmem:[#allocation58_spill] sm:$0xff]  ;;  %v3456_v42 = vld [vmem:[%s7064_s5 + $0x1b0] sm:$0xff] }
 0x3c3   : > { %v2882_v32 = vmul.f32 %v7325_v54, %v2626_v46  ;;  %v2903_v19 = vmul.f32 %v7327_v29, %v2647_v16  ;;  %v2904_v44 = vmul.f32 %v7327_v29, %v2648_v63  ;;  %v7329_v55 = vsub.f32 %v7328_v22, %v7326_v53  ;;  %3219 = vst [vmem:[%s7064_s5 + $0x150] sm:$0xff] %v3155_v1  ;;  %v3016_v31 = vpop.permute.xlu1 %3015  ;;  %v3401_v21 = vpop.eup %3400  ;;  %v7333_v1 = vld [vmem:[#allocation63_spill] sm:$0xff]  ;;  %v3459_v53 = vld [vmem:[%s7064_s5 + $0x128] sm:$0xff]  ;;  %v7335_v62 = vld [vmem:[#allocation66_spill] sm:$0xff] }
 0x3c4   : > { %v2588_v12 = vsub.f32 %v3453_v34, %v6600_v20  ;;  %3220 = vst.msk [vmem:[%s7064_s5 + $0x158] sm:$0xff] %vm2023_vm2, %v3156_v14  ;;  %v2630_v52 = vmul.f32 %v3393_v41, %v2566_v57  ;;  %v3137_v17 = vadd.f32 %v3016_v31, %v2881_v18  ;;  %v2651_v38 = vmul.f32 %v3397_v58, %v2587_v4  ;;  %v3458_v18 = vld [vmem:[%s7064_s5 + $0x120] sm:$0xff]  ;;  %v3460_v29 = vld [vmem:[%s7064_s5 + $0x1d0] sm:$0xff] }
 0x3c5   : > { %v2629_v2 = vmul.f32 %v3393_v41, %v7329_v55  ;;  %v3138_v37 = vadd.f32 %v3016_v31, %v2882_v32  ;;  %v3159_v24 = vadd.f32 %v3071_v40, %v2903_v19  ;;  %v3160_v20 = vadd.f32 %v3071_v40, %v2904_v44  ;;  %v3455_v41 = vld [vmem:[%s7064_s5 + $0x108] sm:$0xff]  ;;  %v7334_v32 = vld [vmem:[#allocation75_spill] sm:$0xff]  ;;  %v3461_v44 = vld [vmem:[%s7064_s5 + $0x1d8] sm:$0xff] }
 0x3c6   : > { %v2652_v3 = vmul.f32 %v3397_v58, %v2588_v12  ;;  %v2886_v33 = vmul.f32 %v7330_v61, %v2630_v52  ;;  %v2569_v30 = vsub.f32 %v3454_v8, %v7331_v36  ;;  %v2570_v13 = vsub.f32 %v3455_v41, %v7331_v36  ;;  %3201 = vst [vmem:[%s7064_s5 + $0xc0] sm:$0xff] %v3137_v17  ;;  %v3403_v9 = vpop.eup %3402  ;;  %v3081_v27 = vpop.permute.xlu0 %3080  ;;  %v7337_v36 = vld [vmem:[#allocation74_spill] sm:$0xff] }
 0x3c7   : > { %v2885_v15 = vmul.f32 %v7330_v61, %v2629_v2  ;;  %3202 = vst.msk [vmem:[%s7064_s5 + $0xc8] sm:$0xff] %vm2023_vm2, %v3138_v37  ;;  %v2907_v50 = vmul.f32 %v7332_v25, %v2651_v38  ;;  %v2591_v45 = vsub.f32 %v3456_v42, %v6603_v49  ;;  %v2592_v51 = vsub.f32 %v3457_v23, %v6603_v49  ;;  %v3026_v11 = vpop.permute.xlu1 %3025  ;;  %v3462_v61 = vld [vmem:[%s7064_s5 + $0x140] sm:$0xff] }
 0x3c8   : > { %v2908_v59 = vmul.f32 %v7332_v25, %v2652_v3  ;;  %3223 = vst [vmem:[%s7064_s5 + $0x170] sm:$0xff] %v3159_v24  ;;  %3224 = vst.msk [vmem:[%s7064_s5 + $0x178] sm:$0xff] %vm2023_vm2, %v3160_v20  ;;  %v2633_v46 = vmul.f32 %v3399_v10, %v2569_v30  ;;  %v2634_v56 = vmul.f32 %v3399_v10, %v2570_v13  ;;  %v3405_v49 = vpop.eup %3404  ;;  %v7336_v3 = vld [vmem:[#allocation71_spill] sm:$0xff]  ;;  %v3464_v13 = vld [vmem:[%s7064_s5 + $0x1f0] sm:$0xff] }
 0x3c9   : > { %v3141_v5 = vadd.f32 %v3026_v11, %v2885_v15  ;;  %v3142_v16 = vadd.f32 %v3026_v11, %v2886_v33  ;;  %v2655_v47 = vmul.f32 %v3401_v21, %v2591_v45  ;;  %v2656_v39 = vmul.f32 %v3401_v21, %v2592_v51  ;;  %v3463_v33 = vld [vmem:[%s7064_s5 + $0x148] sm:$0xff] }
 0x3ca   : > { %v3163_v58 = vadd.f32 %v3081_v27, %v2907_v50  ;;  %v3164_v63 = vadd.f32 %v3081_v27, %v2908_v59  ;;  %v2889_v14 = vmul.f32 %v7333_v1, %v2633_v46  ;;  %v2890_v54 = vmul.f32 %v7333_v1, %v2634_v56  ;;  %v3091_v17 = vpop.permute.xlu0 %3090  ;;  %v7339_v1 = vld [vmem:[#allocation80_spill] sm:$0xff] }
 0x3cb   : > { %v2573_v28 = vsub.f32 %v3458_v18, %v7334_v32  ;;  %v2574_v57 = vsub.f32 %v3459_v53, %v7334_v32  ;;  %3205 = vst [vmem:[%s7064_s5 + $0xe0] sm:$0xff] %v3141_v5  ;;  %3206 = vst.msk [vmem:[%s7064_s5 + $0xe8] sm:$0xff] %vm2023_vm2, %v3142_v16  ;;  %v2911_v4 = vmul.f32 %v7335_v62, %v2655_v47  ;;  %v3036_v55 = vpop.permute.xlu1 %3035  ;;  %v3407_v2 = vpop.eup %3406  ;;  %v7338_v16 = vld [vmem:[#allocation78_spill] sm:$0xff] }
 0x3cc   : > { %v2912_v10 = vmul.f32 %v7335_v62, %v2656_v39  ;;  %v2595_v19 = vsub.f32 %v3460_v29, %v6606_v35  ;;  %v2596_v22 = vsub.f32 %v3461_v44, %v6606_v35  ;;  %3227 = vst [vmem:[%s7064_s5 + $0x190] sm:$0xff] %v3163_v58  ;;  %3228 = vst.msk [vmem:[%s7064_s5 + $0x198] sm:$0xff] %vm2023_vm2, %v3164_v63  ;;  %v3466_v39 = vld [vmem:[%s7064_s5 + $0x160] sm:$0xff]  ;;  %v3467_v63 = vld [vmem:[%s7064_s5 + $0x168] sm:$0xff] }
 0x3cd   : > { %v2637_v34 = vmul.f32 %v3403_v9, %v2573_v28  ;;  %v2638_v12 = vmul.f32 %v3403_v9, %v2574_v57  ;;  %v3145_v31 = vadd.f32 %v3036_v55, %v2889_v14  ;;  %v3146_v52 = vadd.f32 %v3036_v55, %v2890_v54  ;;  %v3409_v38 = vpop.eup %3408 }
 0x3ce   : > { %v2659_v37 = vmul.f32 %v3405_v49, %v2595_v19  ;;  %v2660_v40 = vmul.f32 %v3405_v49, %v2596_v22  ;;  %v3167_v21 = vadd.f32 %v3091_v17, %v2911_v4  ;;  %v3168_v35 = vadd.f32 %v3091_v17, %v2912_v10  ;;  %v3101_v51 = vpop.permute.xlu0 %3100  ;;  %v7340_v10 = vld [vmem:[#allocation82_spill] sm:$0xff] }
 0x3cf   : > { %v2893_v24 = vmul.f32 %v7336_v3, %v2637_v34  ;;  %v2894_v20 = vmul.f32 %v7336_v3, %v2638_v12  ;;  %v2577_v15 = vsub.f32 %v3462_v61, %v6481_v43  ;;  %v2578_v8 = vsub.f32 %v3463_v33, %v6481_v43  ;;  %3209 = vst [vmem:[%s7064_s5 + $0x100] sm:$0xff] %v3145_v31  ;;  %v3465_v43 = vld [vmem:[%s7064_s5 + $0x1f8] sm:$0xff]  ;;  %v3046_v50 = vpop.permute.xlu1 %3045  ;;  %v3411_v11 = vpop.eup %3410  ;;  %v7342_v12 = vld [vmem:[#allocation36_spill] sm:$0xff] }
 0x3d0   : > { %3210 = vst.msk [vmem:[%s7064_s5 + $0x108] sm:$0xff] %vm2023_vm2, %v3146_v52  ;;  %v2915_v30 = vmul.f32 %v7337_v36, %v2659_v37  ;;  %v2916_v41 = vmul.f32 %v7337_v36, %v2660_v40  ;;  %v2599_v9 = vsub.f32 %v3464_v13, %v6646_v26  ;;  %v2600_v25 = vsub.f32 %v3465_v43, %v6646_v26  ;;  %v7343_v40 = vld [vmem:[#allocation37_spill] sm:$0xff]  ;;  %v7348_v13 = vld [vmem:[#allocation44_spill] sm:$0xff] }
 0x3d1   : > { %3231 = vst [vmem:[%s7064_s5 + $0x1b0] sm:$0xff] %v3167_v21  ;;  %3232 = vst.msk [vmem:[%s7064_s5 + $0x1b8] sm:$0xff] %vm2023_vm2, %v3168_v35  ;;  %v2641_v59 = vmul.f32 %v3407_v2, %v2577_v15  ;;  %v2642_v42 = vmul.f32 %v3407_v2, %v2578_v8  ;;  %v3149_v45 = vadd.f32 %v3046_v50, %v2893_v24  ;;  %v7341_v2 = vld [vmem:[#allocation35_spill] sm:$0xff]  ;;  %v7344_v35 = vld [vmem:[#allocation38_spill] sm:$0xff] }
 0x3d2   : > { %v3150_v23 = vadd.f32 %v3046_v50, %v2894_v20  ;;  %v2663_v46 = vmul.f32 %v3409_v38, %v2599_v9  ;;  %v2664_v56 = vmul.f32 %v3409_v38, %v2600_v25  ;;  %v3171_v5 = vadd.f32 %v3101_v51, %v2915_v30  ;;  %v3111_v57 = vpop.permute.xlu0 %3110  ;;  %v7345_v20 = vld [vmem:[#allocation41_spill] sm:$0xff]  ;;  %v7346_v15 = vld [vmem:[#allocation42_spill] sm:$0xff]  ;;  %v7347_v30 = vld [vmem:[#allocation43_spill] sm:$0xff] }
 0x3d3   : > { %v3172_v26 = vadd.f32 %v3101_v51, %v2916_v41  ;;  %v2897_v27 = vmul.f32 %v7338_v16, %v2641_v59  ;;  %v2898_v47 = vmul.f32 %v7338_v16, %v2642_v42  ;;  %v2581_v58 = vsub.f32 %v3466_v39, %v6540_v60  ;;  %3213 = vst [vmem:[%s7064_s5 + $0x120] sm:$0xff] %v3149_v45 }
 0x3d4   : > { %v2582_v49 = vsub.f32 %v3467_v63, %v6540_v60  ;;  %3214 = vst.msk [vmem:[%s7064_s5 + $0x128] sm:$0xff] %vm2023_vm2, %v3150_v23  ;;  %v2919_v14 = vmul.f32 %v7339_v1, %v2663_v46  ;;  %v2920_v54 = vmul.f32 %v7339_v1, %v2664_v56  ;;  %3235 = vst [vmem:[%s7064_s5 + $0x1d0] sm:$0xff] %v3171_v5  ;;  %v3056_v60 = vpop.permute.xlu1 %3055 }
 0x3d5   : > { %3236 = vst.msk [vmem:[%s7064_s5 + $0x1d8] sm:$0xff] %vm2023_vm2, %v3172_v26  ;;  %v2645_v18 = vmul.f32 %v3411_v11, %v2581_v58  ;;  %v3153_v28 = vadd.f32 %v3056_v60, %v2897_v27  ;;  %v3154_v53 = vadd.f32 %v3056_v60, %v2898_v47  ;;  %v2905_v34 = vmul.f32 %v6537_v6, %v7341_v2 }
 0x3d6   : > { %v2646_v32 = vmul.f32 %v3411_v11, %v2582_v49  ;;  %v3175_v62 = vadd.f32 %v3111_v57, %v2919_v14  ;;  %v3176_v4 = vadd.f32 %v3111_v57, %v2920_v54  ;;  %v2906_v31 = vmul.f32 %v6537_v6, %v7342_v12 }
 0x3d7   : > { %v2901_v29 = vmul.f32 %v7340_v10, %v2645_v18  ;;  %3217 = vst [vmem:[%s7064_s5 + $0x140] sm:$0xff] %v3153_v28  ;;  %3218 = vst.msk [vmem:[%s7064_s5 + $0x148] sm:$0xff] %vm2023_vm2, %v3154_v53  ;;  %v2909_v21 = vmul.f32 %v6565_v48, %v7343_v40  ;;  %v2910_v38 = vmul.f32 %v6565_v48, %v7344_v35 }
 0x3d8   : > { %v2902_v19 = vmul.f32 %v7340_v10, %v2646_v32  ;;  %3239 = vst [vmem:[%s7064_s5 + $0x1f0] sm:$0xff] %v3175_v62  ;;  %3240 = vst.msk [vmem:[%s7064_s5 + $0x1f8] sm:$0xff] %vm2023_vm2, %v3176_v4  ;;  %v3066_v44 = vpop.permute.xlu1 %3065  ;;  %v2913_v61 = vmul.f32 %v6597_v7, %v7345_v20  ;;  %v2914_v33 = vmul.f32 %v6597_v7, %v7346_v15 }
 0x3d9   : > { %v3157_v22 = vadd.f32 %v3066_v44, %v2901_v29  ;;  %v2917_v41 = vmul.f32 %v6626_v0, %v7347_v30  ;;  %v2918_v9 = vmul.f32 %v6626_v0, %v7348_v13 }
 0x3da   : > { %v3158_v55 = vadd.f32 %v3066_v44, %v2902_v19 }
 0x3db   : > { %3221 = vst [vmem:[%s7064_s5 + $0x160] sm:$0xff] %v3157_v22 }
 0x3dc   : > { %3222 = vst.msk [vmem:[%s7064_s5 + $0x168] sm:$0xff] %vm2023_vm2, %v3158_v55  ;;  %v3076_v52 = vpop.permute.xlu1 %3075 }
 0x3dd   : > { %v3161_v17 = vadd.f32 %v3076_v52, %v2905_v34  ;;  %v3162_v37 = vadd.f32 %v3076_v52, %v2906_v31 }
 0x3df   : > { %3225 = vst [vmem:[%s7064_s5 + $0x180] sm:$0xff] %v3161_v17  ;;  %3226 = vst.msk [vmem:[%s7064_s5 + $0x188] sm:$0xff] %vm2023_vm2, %v3162_v37 }
 0x3e0   : > { %v3086_v6 = vpop.permute.xlu1 %3085 }
 0x3e1   : > { %v3165_v3 = vadd.f32 %v3086_v6, %v2909_v21  ;;  %v3166_v24 = vadd.f32 %v3086_v6, %v2910_v38 }
 0x3e3   : > { %3229 = vst [vmem:[%s7064_s5 + $0x1a0] sm:$0xff] %v3165_v3  ;;  %3230 = vst.msk [vmem:[%s7064_s5 + $0x1a8] sm:$0xff] %vm2023_vm2, %v3166_v24 }
 0x3e4   : > { %v3096_v48 = vpop.permute.xlu1 %3095 }
 0x3e5   : > { %v3169_v8 = vadd.f32 %v3096_v48, %v2913_v61  ;;  %v3170_v36 = vadd.f32 %v3096_v48, %v2914_v33 }
 0x3e7   : > { %3233 = vst [vmem:[%s7064_s5 + $0x1c0] sm:$0xff] %v3169_v8  ;;  %3234 = vst.msk [vmem:[%s7064_s5 + $0x1c8] sm:$0xff] %vm2023_vm2, %v3170_v36 }
 0x3e8   : > { %v3106_v7 = vpop.permute.xlu1 %3105 }
 0x3e9   : > { %v3173_v43 = vadd.f32 %v3106_v7, %v2917_v41  ;;  %v3174_v25 = vadd.f32 %v3106_v7, %v2918_v9 }
 0x3eb   : > { %3237 = vst [vmem:[%s7064_s5 + $0x1e0] sm:$0xff] %v3173_v43  ;;  %3238 = vst.msk [vmem:[%s7064_s5 + $0x1e8] sm:$0xff] %vm2023_vm2, %v3174_v25 }
 0x3ec PF: > { %p12_p12 = scmp.ge.s32.totalorder %s3542_s22, 4   ;;  %s7349_s18 = smov %s3486_s19 }
 0x3ed   : > { %s7350_s19 = smov %s3551_s25  ;;  %s7351_s20 = smov %s3542_s22 }
 0x3ee   :  { %14 = sbr.rel (!%p12_p12) target bundleno = 2 (0x2), region = 112 }

</bundles_post_ra>
